<compile_context>
chip_gen: v6e
topology: v6e:2x2x1
jax: 0.10.0
libtpu: 0.0.40
codegen_flags: <defaults>
</compile_context>

<pallas_src>
import functools
import math

import jax
import jax.numpy as jnp
from jax import lax
from jax.experimental import pallas as pl
from jax.experimental.pallas import tpu as pltpu

BF16 = jnp.bfloat16
F32 = jnp.float32


# ----------------------------------------------------------------------------------
# Small helpers
# ----------------------------------------------------------------------------------

def _round_up(x, m):
    return ((x + m - 1) // m) * m


def _pick_rows(M, C, max_bytes=8 << 20):
    """Largest row-tile that divides M and keeps a (rows, C) f32 block under max_bytes."""
    for c in (2048, 1024, 512, 256, 128, 64, 32, 16, 8):
        if M % c == 0 and c * C * 4 <= max_bytes:
            return c
    return M          # full-dim block (exempt from the (8,128) divisibility rule)


def _pick_strip(H):
    """Row-strip height dividing H (<= 8 output rows per grid step)."""
    if H <= 8:
        return H
    for d in (8, 4, 2, 1):
        if H % d == 0:
            return d
    return 1


def _apply_act(x, act):
    if act == 'relu':
        return jnp.maximum(x, 0.0)
    if act == 'relu6':
        return jnp.clip(x, 0.0, 6.0)
    if act == 'sigmoid':
        return 1.0 / (1.0 + jnp.exp(-x))
    return x


# ----------------------------------------------------------------------------------
# Single-buffered (weight-resident) BlockSpec helper with a one-time capability probe
# ----------------------------------------------------------------------------------

_BUFFERED1_OK = None


def _buffered1_ok():
    global _BUFFERED1_OK
    if _BUFFERED1_OK is None:
        try:
            def _probe_kernel(x_ref, o_ref):
                o_ref[...] = x_ref[...] + 1.0

            f = pl.pallas_call(
                _probe_kernel,
                out_shape=jax.ShapeDtypeStruct((8, 128), F32),
                grid=(2,),
                in_specs=[pl.BlockSpec((8, 128), lambda i: (0, 0),
                                       pipeline_mode=pl.Buffered(1))],
                out_specs=pl.BlockSpec((8, 128), lambda i: (0, 0)),
            )
            jax.block_until_ready(f(jnp.zeros((8, 128), F32)))
            _BUFFERED1_OK = True
        except Exception:
            _BUFFERED1_OK = False
    return _BUFFERED1_OK


def _wspec(block_shape, index_map):
    """BlockSpec for grid-invariant operands (weights / bias): single-buffered if supported."""
    if _buffered1_ok():
        return pl.BlockSpec(block_shape, index_map, pipeline_mode=pl.Buffered(1))
    return pl.BlockSpec(block_shape, index_map)


# ----------------------------------------------------------------------------------
# GEMM with fused bias + activation (bf16 in, f32 accumulate)
# ----------------------------------------------------------------------------------

def _gemm_kernel(x_ref, w_ref, b_ref, o_ref, *, act):
    acc = jnp.dot(x_ref[...], w_ref[...], preferred_element_type=jnp.float32)
    o_ref[...] = _apply_act(acc + b_ref[...], act).astype(o_ref.dtype)


def matmul_bias_act(x, w, b, act='none', out_dtype=BF16):
    """act(x @ w + b): x (M,K), w (K,N), b (N,).  Full-K / full-N blocks, VMEM-budgeted M tile."""
    M, K = (int(d) for d in x.shape)
    N = int(w.shape[1])
    x = x.astype(BF16)
    w = w.astype(BF16)
    b2 = b.reshape(1, N).astype(F32)

    w_bytes = K * N * 2 + N * 4                 # resident weight + bias
    budget = 10 << 20                           # VMEM budget for tiled operands (v5e/v7x safe)
    bm = None
    for c in (1024, 512, 256, 128, 64, 32, 16, 8):
        if M % c == 0 and (2 * c * K * 2 + 2 * c * N * 4 + 2 * w_bytes) <= budget:
            bm = c
            break
    pad = 0
    if bm is None:
        if M <= 2048:
            bm = M
        else:                                   # rare fallback: pad M only
            bm = 256
            pad = _round_up(M, bm) - M
            x = jnp.pad(x, ((0, pad), (0, 0)))
    Mp = M + pad

    est = 2 * bm * K * 2 + 2 * bm * N * 4 + 2 * w_bytes + (2 << 20)
    vmem_limit = int(min(max(est, 32 << 20), 48 << 20))

    out = pl.pallas_call(
        functools.partial(_gemm_kernel, act=act),
        out_shape=jax.ShapeDtypeStruct((Mp, N), out_dtype),
        grid=(Mp // bm,),
        in_specs=[pl.BlockSpec((bm, K), lambda i: (i, 0)),
                  _wspec((K, N), lambda i: (0, 0)),
                  _wspec((1, N), lambda i: (0, 0))],
        out_specs=pl.BlockSpec((bm, N), lambda i: (i, 0)),
        compiler_params=pltpu.CompilerParams(
            dimension_semantics=("parallel",),
            vmem_limit_bytes=vmem_limit),
    )(x, w, b2)
    return out[:M] if pad else out


# ----------------------------------------------------------------------------------
# Direct 3x3 stride-1 conv: flattened spatial with 8-aligned row pitch, row-strip grid,
# 9 shifted-row MXU matmuls accumulated in f32, valid columns stored directly (no crop).
# ----------------------------------------------------------------------------------

def _pad_flat_3x3(x, W):
    """Zero-pad a stride-1 3x3 'same' conv input and flatten rows with an 8-aligned pitch."""
    N, H, _, C = (int(d) for d in x.shape)
    Wp = _round_up(W + 2, 8)
    xp = jnp.pad(x.astype(BF16), ((0, 0), (1, 2), (1, Wp - W - 1), (0, 0)))
    L = (H + 3) * Wp
    return xp.reshape(N, L, C), Wp, L           # free reshape


def _conv3x3_kernel(x_ref, w_ref, b_ref, o_ref, *, th, W, Wp, act):
    s = pl.program_id(1)
    rows = th * Wp
    base = pl.multiple_of(s * rows, 8)
    Cout = o_ref.shape[-1]
    # strip + 3x3 halo, dynamic but sublane-aligned start
    xs = x_ref[0, pl.ds(base, rows + 2 * Wp + 8), :]
    # 9 back-to-back MXU matmuls accumulating in f32 (MRB-friendly ordering on v7x).
    acc = jnp.zeros((rows, Cout), jnp.float32)
    for dy in range(3):
        for dx in range(3):
            off = dy * Wp + dx
            acc = acc + jnp.dot(xs[off:off + rows, :], w_ref[dy * 3 + dx],
                                preferred_element_type=jnp.float32)
    out = _apply_act(acc + b_ref[...], act).astype(o_ref.dtype)
    for r in range(th):                          # store exactly the W valid columns
        o_ref[0, r] = out[r * Wp:r * Wp + W, :]


def conv3x3_direct(x, w9, b, act):
    """3x3 / stride 1 / same-padding conv.  x (N,H,W,Cin) bf16, w9 (9,Cin,Cout) bf16."""
    N, H, W, Cin = (int(d) for d in x.shape)
    Cout = int(w9.shape[2])
    xf, Wp, L = _pad_flat_3x3(x, W)
    th = _pick_strip(H)
    return pl.pallas_call(
        functools.partial(_conv3x3_kernel, th=th, W=W, Wp=Wp, act=act),
        out_shape=jax.ShapeDtypeStruct((N, H, W, Cout), BF16),
        grid=(N, H // th),
        in_specs=[pl.BlockSpec((1, L, Cin), lambda n, s: (n, 0, 0)),   # sample stays resident
                  _wspec((9, Cin, Cout), lambda n, s: (0, 0, 0)),
                  _wspec((1, Cout), lambda n, s: (0, 0))],
        out_specs=pl.BlockSpec((1, th, W, Cout), lambda n, s: (n, s, 0, 0)),
        compiler_params=pltpu.CompilerParams(
            dimension_semantics=("parallel", "parallel")),
    )(xf, w9, b.reshape(1, Cout).astype(F32))


# ----------------------------------------------------------------------------------
# Depthwise 3x3 + bias + ReLU6 (UNet conv2): same flattened / row-strip structure,
# bf16 tap multiplies with f32 accumulation.
# ----------------------------------------------------------------------------------

def _dw3x3_kernel(x_ref, w_ref, b_ref, o_ref, *, th, W, Wp):
    s = pl.program_id(1)
    rows = th * Wp
    base = pl.multiple_of(s * rows, 8)
    C = o_ref.shape[-1]
    xs = x_ref[0, pl.ds(base, rows + 2 * Wp + 8), :]
    acc = jnp.zeros((rows, C), jnp.float32)
    for dy in range(3):
        for dx in range(3):
            off = dy * Wp + dx
            k = dy * 3 + dx
            acc = acc + xs[off:off + rows, :] * w_ref[k:k + 1, :]   # bf16 mul, f32 accumulate
    out = jnp.clip(acc + b_ref[...], 0.0, 6.0).astype(o_ref.dtype)
    for r in range(th):
        o_ref[0, r] = out[r * Wp:r * Wp + W, :]


def depthwise3x3_relu6(x, w9, b):
    N, H, W, C = (int(d) for d in x.shape)
    xf, Wp, L = _pad_flat_3x3(x, W)
    th = _pick_strip(H)
    return pl.pallas_call(
        functools.partial(_dw3x3_kernel, th=th, W=W, Wp=Wp),
        out_shape=jax.ShapeDtypeStruct((N, H, W, C), BF16),
        grid=(N, H // th),
        in_specs=[pl.BlockSpec((1, L, C), lambda n, s: (n, 0, 0)),
                  _wspec((9, C), lambda n, s: (0, 0)),
                  _wspec((1, C), lambda n, s: (0, 0))],
        out_specs=pl.BlockSpec((1, th, W, C), lambda n, s: (n, s, 0, 0)),
        compiler_params=pltpu.CompilerParams(
            dimension_semantics=("parallel", "parallel")),
    )(xf, w9.astype(BF16), b.reshape(1, C).astype(F32))


# ----------------------------------------------------------------------------------
# Max pooling (stride 2, k in {2,3}): windows built in-kernel, no k*k HBM copies.
# The wrapper only does a free pair-column reshape: (N,Hp,Wp,C) -> (N,Hp,Wp/2,2C).
# ----------------------------------------------------------------------------------

def _pool3_kernel(xa_ref, xb_ref, o_ref, *, tho, Wo, C):
    n_in = xa_ref.shape[1]
    for r in range(tho):
        r0 = xa_ref[0, 2 * r]
        r1 = xa_ref[0, 2 * r + 1]
        r2 = xa_ref[0, 2 * r + 2] if (2 * r + 2) < n_in else xb_ref[0, 0]
        rows = jnp.maximum(jnp.maximum(r0, r1), r2)                 # (Wo+1, 2C)
        m = jnp.maximum(jnp.maximum(rows[:Wo, :C], rows[:Wo, C:]),
                        rows[1:Wo + 1, :C])
        o_ref[0, r] = m.astype(o_ref.dtype)


def _pool2_kernel(xa_ref, o_ref, *, tho, C):
    for r in range(tho):
        rows = jnp.maximum(xa_ref[0, 2 * r], xa_ref[0, 2 * r + 1])  # (Wo, 2C)
        o_ref[0, r] = jnp.maximum(rows[:, :C], rows[:, C:]).astype(o_ref.dtype)


def max_pool_s2(x, k):
    """k x k / stride 2 max pool (k=3 -> pad 1, k=2 -> pad 0)."""
    N, H, W, C = (int(d) for d in x.shape)
    pad = 1 if k == 3 else 0
    Ho = (H + 2 * pad - k) // 2 + 1
    Wo = (W + 2 * pad - k) // 2 + 1
    extra = 1 if k == 3 else 0
    Hp = 2 * Ho + 2 * extra
    Wp = 2 * (Wo + extra)
    xp = jnp.pad(x.astype(BF16),
                 ((0, 0), (pad, Hp - H - pad), (pad, Wp - W - pad), (0, 0)),
                 constant_values=-jnp.inf)
    Wp2 = Wp // 2
    xr = xp.reshape(N, Hp, Wp2, 2 * C)          # free reshape
    tho = _pick_strip(Ho)
    S = Ho // tho
    if k == 3:
        return pl.pallas_call(
            functools.partial(_pool3_kernel, tho=tho, Wo=Wo, C=C),
            out_shape=jax.ShapeDtypeStruct((N, Ho, Wo, C), BF16),
            grid=(N, S),
            in_specs=[pl.BlockSpec((1, 2 * tho, Wp2, 2 * C), lambda n, s: (n, s, 0, 0)),
                      pl.BlockSpec((1, 2, Wp2, 2 * C),
                                   lambda n, s: (n, (s + 1) * tho, 0, 0))],
            out_specs=pl.BlockSpec((1, tho, Wo, C), lambda n, s: (n, s, 0, 0)),
            compiler_params=pltpu.CompilerParams(
                dimension_semantics=("parallel", "parallel")),
        )(xr, xr)
    return pl.pallas_call(
        functools.partial(_pool2_kernel, tho=tho, C=C),
        out_shape=jax.ShapeDtypeStruct((N, Ho, Wo, C), BF16),
        grid=(N, S),
        in_specs=[pl.BlockSpec((1, 2 * tho, Wp2, 2 * C), lambda n, s: (n, s, 0, 0))],
        out_specs=pl.BlockSpec((1, tho, Wo, C), lambda n, s: (n, s, 0, 0)),
        compiler_params=pltpu.CompilerParams(
            dimension_semantics=("parallel", "parallel")),
    )(xr)


# ----------------------------------------------------------------------------------
# Elementwise / reduction kernels
# ----------------------------------------------------------------------------------

def _add_act_kernel(a_ref, b_ref, o_ref, *, act):
    s = a_ref[...].astype(jnp.float32) + b_ref[...].astype(jnp.float32)
    o_ref[...] = _apply_act(s, act).astype(o_ref.dtype)


def add_act(a, b, act):
    shape = tuple(int(d) for d in a.shape)
    C = shape[-1]
    M = math.prod(shape[:-1])
    tr = _pick_rows(M, C)
    out = pl.pallas_call(
        functools.partial(_add_act_kernel, act=act),
        out_shape=jax.ShapeDtypeStruct((M, C), BF16),
        grid=(M // tr,),
        in_specs=[pl.BlockSpec((tr, C), lambda i: (i, 0)),
                  pl.BlockSpec((tr, C), lambda i: (i, 0))],
        out_specs=pl.BlockSpec((tr, C), lambda i: (i, 0)),
        compiler_params=pltpu.CompilerParams(dimension_semantics=("parallel",)),
    )(a.reshape(M, C).astype(BF16), b.reshape(M, C).astype(BF16))
    return out.reshape(shape)


def _se_res_kernel(x_ref, y_ref, m_ref, o_ref):
    # CoreCNNBlock epilogue.  SE_Block returns x*gate, and the block multiplies by x again,
    # so this is ReLU6(x*x*gate + match(identity)) -- exactly as in the reference.
    x = x_ref[...].astype(jnp.float32)
    y = y_ref[...]                                  # (1, 1, C) gate, broadcast in-kernel
    m = m_ref[...].astype(jnp.float32)
    o_ref[...] = jnp.clip(x * x * y + m, 0.0, 6.0).astype(o_ref.dtype)


def se_residual_relu6(x, gate, m):
    N, H, W, C = (int(d) for d in x.shape)
    HW = H * W
    tr = _pick_rows(HW, C)
    out = pl.pallas_call(
        _se_res_kernel,
        out_shape=jax.ShapeDtypeStruct((N, HW, C), BF16),
        grid=(N, HW // tr),
        in_specs=[pl.BlockSpec((1, tr, C), lambda n, r: (n, r, 0)),
                  pl.BlockSpec((1, 1, C), lambda n, r: (n, 0, 0)),
                  pl.BlockSpec((1, tr, C), lambda n, r: (n, r, 0))],
        out_specs=pl.BlockSpec((1, tr, C), lambda n, r: (n, r, 0)),
        compiler_params=pltpu.CompilerParams(
            dimension_semantics=("parallel", "parallel")),
    )(x.reshape(N, HW, C).astype(BF16),
      gate.reshape(N, 1, C).astype(F32),
      m.reshape(N, HW, C).astype(BF16))
    return out.reshape(N, H, W, C)


def _gap_kernel(x_ref, o_ref, *, inv):
    @pl.when(pl.program_id(1) == 0)
    def _():
        o_ref[...] = jnp.zeros_like(o_ref)
    o_ref[...] += jnp.sum(x_ref[...].astype(jnp.float32), axis=1, keepdims=True)

    @pl.when(pl.program_id(1) == pl.num_programs(1) - 1)
    def _():
        o_ref[...] = o_ref[...] * inv


def global_avg_pool(x):
    """AdaptiveAvgPool2d(1) + flatten -> (N, C) f32."""
    N, H, W, C = (int(d) for d in x.shape)
    HW = H * W
    tr = _pick_rows(HW, C)
    out = pl.pallas_call(
        functools.partial(_gap_kernel, inv=1.0 / HW),
        out_shape=jax.ShapeDtypeStruct((N, 1, C), F32),
        grid=(N, HW // tr),
        in_specs=[pl.BlockSpec((1, tr, C), lambda n, r: (n, r, 0))],
        out_specs=pl.BlockSpec((1, 1, C), lambda n, r: (n, 0, 0)),
        compiler_params=pltpu.CompilerParams(
            dimension_semantics=("parallel", "arbitrary")),
    )(x.reshape(N, HW, C).astype(BF16))
    return out.reshape(N, C)


def _gap_se_kernel(x_ref, w1_ref, w2_ref, o_ref, *, inv):
    # Fused SE excitation: running GAP sum in the f32 output ref, then fc1+ReLU, fc2+sigmoid
    # at the final reduction step (intermediates never leave VMEM).
    @pl.when(pl.program_id(1) == 0)
    def _():
        o_ref[...] = jnp.zeros_like(o_ref)
    o_ref[...] += jnp.sum(x_ref[...].astype(jnp.float32), axis=1, keepdims=True)

    @pl.when(pl.program_id(1) == pl.num_programs(1) - 1)
    def _():
        mean = (o_ref[0] * inv).astype(BF16)                               # (1, C)
        t = jnp.dot(mean, w1_ref[...], preferred_element_type=jnp.float32)
        t = jnp.maximum(t, 0.0).astype(BF16)                               # (1, r)
        g = jnp.dot(t, w2_ref[...], preferred_element_type=jnp.float32)    # (1, C)
        o_ref[0] = 1.0 / (1.0 + jnp.exp(-g))


def gap_se_gate(x, w1, w2):
    """Fused AdaptiveAvgPool2d(1) + Linear/ReLU + Linear/Sigmoid -> sigmoid gate (N, C) f32."""
    N, H, W, C = (int(d) for d in x.shape)
    HW = H * W
    r = int(w1.shape[1])
    tr = _pick_rows(HW, C)
    out = pl.pallas_call(
        functools.partial(_gap_se_kernel, inv=1.0 / HW),
        out_shape=jax.ShapeDtypeStruct((N, 1, C), F32),
        grid=(N, HW // tr),
        in_specs=[pl.BlockSpec((1, tr, C), lambda n, i: (n, i, 0)),
                  _wspec((C, r), lambda n, i: (0, 0)),
                  _wspec((r, C), lambda n, i: (0, 0))],
        out_specs=pl.BlockSpec((1, 1, C), lambda n, i: (n, 0, 0)),
        compiler_params=pltpu.CompilerParams(
            dimension_semantics=("parallel", "arbitrary")),
    )(x.reshape(N, HW, C).astype(BF16), w1.astype(BF16), w2.astype(BF16))
    return out.reshape(N, C)


# ----------------------------------------------------------------------------------
# Conv wrappers
# ----------------------------------------------------------------------------------

def _gemm_s2_kernel(x_ref, w_ref, b_ref, o_ref, *, act):
    tho = o_ref.shape[1]
    for r in range(tho):
        xr = x_ref[0, r, 0]                                   # (Wo, Cin): even row, even cols
        acc = jnp.dot(xr, w_ref[...], preferred_element_type=jnp.float32) + b_ref[...]
        o_ref[0, r] = _apply_act(acc, act).astype(o_ref.dtype)


def conv1x1_strided2(x, w, b, act):
    """1x1 conv with stride 2: even rows/cols selected by the BlockSpec (no HBM slice copy)."""
    N, H, W, Cin = (int(d) for d in x.shape)
    Ho, Wo = H // 2, W // 2
    Cout = int(w.shape[1])
    xr = x.astype(BF16).reshape(N, Ho, 2, Wo, 2 * Cin)        # free reshape
    tho = _pick_strip(Ho)
    return pl.pallas_call(
        functools.partial(_gemm_s2_kernel, act=act),
        out_shape=jax.ShapeDtypeStruct((N, Ho, Wo, Cout), BF16),
        grid=(N, Ho // tho),
        in_specs=[pl.BlockSpec((1, tho, 1, Wo, Cin), lambda n, s: (n, s, 0, 0, 0)),
                  _wspec((Cin, Cout), lambda n, s: (0, 0)),
                  _wspec((1, Cout), lambda n, s: (0, 0))],
        out_specs=pl.BlockSpec((1, tho, Wo, Cout), lambda n, s: (n, s, 0, 0)),
        compiler_params=pltpu.CompilerParams(
            dimension_semantics=("parallel", "parallel")),
    )(xr, w.astype(BF16), b.reshape(1, Cout).astype(F32))


def conv1x1(x, w, b, act, stride=1):
    """1x1 conv as a GEMM (im2col is a free reshape).  w: (Cin, Cout)."""
    if stride != 1:
        N, H, W, Cin = (int(d) for d in x.shape)
        if stride == 2 and Cin % 128 == 0 and H % 2 == 0 and W % 2 == 0:
            return conv1x1_strided2(x, w, b, act)
        x = x[:, ::stride, ::stride, :]
    N, H, W, Cin = (int(d) for d in x.shape)
    Cout = int(w.shape[1])
    out = matmul_bias_act(x.reshape(N * H * W, Cin), w, b, act)
    return out.reshape(N, H, W, Cout)


def conv_im2col(x, w2, b, k, stride, pad, act):
    """Strided k x k conv via bf16 im2col + GEMM (only the few strided convs use this)."""
    # TODO(synk): patches are still materialized in HBM for these convs (bounded inflation).
    x = x.astype(BF16)
    if pad:
        x = jnp.pad(x, ((0, 0), (pad, pad), (pad, pad), (0, 0)))
    N, Hp, Wp, Cin = (int(d) for d in x.shape)
    Ho = (Hp - k) // stride + 1
    Wo = (Wp - k) // stride + 1
    cols = [x[:, i:i + (Ho - 1) * stride + 1:stride,
              j:j + (Wo - 1) * stride + 1:stride, :]
            for i in range(k) for j in range(k)]
    patches = jnp.concatenate(cols, axis=-1).reshape(N * Ho * Wo, k * k * Cin)
    Cout = int(w2.shape[1])
    out = matmul_bias_act(patches, w2, b, act)
    return out.reshape(N, Ho, Wo, Cout)


# ----------------------------------------------------------------------------------
# Parameter construction (deterministic synthetic weights, BN folded at build time)
# ----------------------------------------------------------------------------------

class ParamGen:
    def __init__(self, seed):
        self._key = jax.random.PRNGKey(seed)

    def _next(self):
        self._key, sub = jax.random.split(self._key)
        return sub

    def conv(self, cout, cin, kh, kw):
        fan_in = cin * kh * kw
        std = (2.0 / fan_in) ** 0.5
        return std * jax.random.normal(self._next(), (cout, cin, kh, kw), F32)

    def linear(self, cout, cin):
        std = (1.0 / cin) ** 0.5
        w = std * jax.random.normal(self._next(), (cout, cin), F32)
        b = jnp.zeros((cout,), F32)
        return w, b


def make_bn(c):
    return dict(gamma=jnp.ones((c,), F32), beta=jnp.zeros((c,), F32),
                mean=jnp.zeros((c,), F32), var=jnp.ones((c,), F32))


def fold_bn(w, conv_b, bn, eps=1e-5):
    a = bn['gamma'] / jnp.sqrt(bn['var'] + eps)
    wf = w * a[:, None, None, None]
    cb = conv_b if conv_b is not None else 0.0
    bf = a * (cb - bn['mean']) + bn['beta']
    return wf, bf


def prep_gemm_w(w4, conv_b, bn):                  # (Cout,Cin,1,1) -> (Cin,Cout) bf16
    wf, bf = fold_bn(w4, conv_b, bn)
    return wf[:, :, 0, 0].T.astype(BF16), bf.astype(F32)


def prep_conv_w(w4, conv_b, bn):                  # (Cout,Cin,kh,kw) -> (kh*kw,Cin,Cout) bf16
    wf, bf = fold_bn(w4, conv_b, bn)
    Cout, Cin, kh, kw = (int(d) for d in wf.shape)
    wt = jnp.transpose(wf, (2, 3, 1, 0)).reshape(kh * kw, Cin, Cout)
    return wt.astype(BF16), bf.astype(F32)


def prep_im2col_w(w4, conv_b, bn):                # -> (kh*kw*Cin, Cout) bf16
    wt, bf = prep_conv_w(w4, conv_b, bn)
    kk, Cin, Cout = (int(d) for d in wt.shape)
    return wt.reshape(kk * Cin, Cout), bf


def prep_dw_w(w4, conv_b, bn):                    # (C,1,3,3) -> (9, C) bf16
    wf, bf = fold_bn(w4, conv_b, bn)
    C = int(wf.shape[0])
    wt = jnp.transpose(wf[:, 0], (1, 2, 0)).reshape(9, C)
    return wt.astype(BF16), bf.astype(F32)


def _stack_blocks(blocks):
    return jax.tree_util.tree_map(lambda *xs: jnp.stack(xs, axis=0), *blocks)


# ---------------------------- ResNet152 feature extractor --------------------------

RESNET152_LAYERS = ((64, 3, 1), (128, 8, 2), (256, 36, 2), (512, 3, 2))


def make_resnet152_params(pg):
    p = {}
    p['conv1_w'], p['conv1_b'] = prep_im2col_w(pg.conv(64, 3, 7, 7), None, make_bn(64))
    p['layers'] = []
    inplanes = 64
    for planes, nblocks, stride in RESNET152_LAYERS:
        blocks = []
        for bi in range(nblocks):
            s = stride if bi == 0 else 1
            bp = {}
            bp['w1'], bp['b1'] = prep_gemm_w(pg.conv(planes, inplanes, 1, 1),
                                             None, make_bn(planes))
            w2 = pg.conv(planes, planes, 3, 3)
            if s == 1:
                bp['w2'], bp['b2'] = prep_conv_w(w2, None, make_bn(planes))
            else:
                bp['w2'], bp['b2'] = prep_im2col_w(w2, None, make_bn(planes))
            bp['w3'], bp['b3'] = prep_gemm_w(pg.conv(planes * 4, planes, 1, 1),
                                             None, make_bn(planes * 4))
            if bi == 0:                                           # downsample identity path
                bp['dw'], bp['db'] = prep_gemm_w(pg.conv(planes * 4, inplanes, 1, 1),
                                                 None, make_bn(planes * 4))
            blocks.append(bp)
            inplanes = planes * 4
        p['layers'].append((blocks[0], _stack_blocks(blocks[1:]), stride))
    return p


def _bottleneck(x, p, stride, first):
    out = conv1x1(x, p['w1'], p['b1'], 'relu')
    if stride == 1:
        out = conv3x3_direct(out, p['w2'], p['b2'], 'relu')
    else:
        out = conv_im2col(out, p['w2'], p['b2'], 3, stride, 1, 'relu')
    out = conv1x1(out, p['w3'], p['b3'], 'none')
    idn = conv1x1(x, p['dw'], p['db'], 'none', stride=stride) if first else x
    return add_act(out, idn, 'relu')


@functools.partial(jax.jit, static_argnames=('stride',))
def _resnet_layer(x, first_p, rest_p, *, stride):
    x = _bottleneck(x, first_p, stride, True)

    def body(h, bp):
        return _bottleneck(h, bp, 1, False), None

    x, _ = lax.scan(body, x, rest_p)
    return x


@jax.jit
def _resnet_stem(x, w, b):
    h = conv_im2col(x, w, b, 7, 2, 3, 'relu')
    return max_pool_s2(h, 3)


def resnet_features(x, p):
    x = _resnet_stem(x, p['conv1_w'], p['conv1_b'])
    for first_p, rest_p, stride in p['layers']:
        x = _resnet_layer(x, first_p, rest_p, stride=stride)
    return x


# --------------------------------- CoreUnet ----------------------------------------

UNET_DEPTHS = (3, 3, 9, 3)
UNET_DIMS = (48, 96, 192, 384)     # [96, 192, 384, 768] // 2


def make_core_cnn_block_params(pg, cin, cout):
    zc = jnp.zeros((cout,), F32)
    p = {}
    p['w1'], p['b1'] = prep_gemm_w(pg.conv(cout, cin, 1, 1), zc, make_bn(cout))
    p['w2'], p['b2'] = prep_dw_w(pg.conv(cout, 1, 3, 3), zc, make_bn(cout))
    p['w3'], p['b3'] = prep_conv_w(pg.conv(cout, cout, 3, 3), zc, make_bn(cout))
    r = max(cout // 16, 1)
    se1, _ = pg.linear(r, cout)                     # SE linears have bias=False
    se2, _ = pg.linear(cout, r)
    p['se_w1'] = se1.T.astype(BF16)                 # (cout, r)
    p['se_w2'] = se2.T.astype(BF16)                 # (r, cout)
    if cin != cout:
        p['mw'], p['mb'] = prep_gemm_w(pg.conv(cout, cin, 1, 1), None, make_bn(cout))
    return p


def _core_block(x, p, has_match):
    identity = x
    h = conv1x1(x, p['w1'], p['b1'], 'relu6')                 # conv1 1x1 + BN + ReLU6
    h = depthwise3x3_relu6(h, p['w2'], p['b2'])               # depthwise 3x3 + BN + ReLU6
    h = conv3x3_direct(h, p['w3'], p['b3'], 'none')           # conv3 3x3 + BN
    gate = gap_se_gate(h, p['se_w1'], p['se_w2'])             # fused SE excitation
    m = conv1x1(identity, p['mw'], p['mb'], 'none') if has_match else identity
    return se_residual_relu6(h, gate, m)                      # ReLU6(h*h*gate + m)


@functools.partial(jax.jit, static_argnames=('has_match', 'pool'))
def _core_stage(x, first_p, rest_p, *, has_match, pool):
    x = _core_block(x, first_p, has_match)
    if rest_p is not None:
        def body(h, bp):
            return _core_block(h, bp, False), None
        x, _ = lax.scan(body, x, rest_p)
    if pool:
        x = max_pool_s2(x, 2)
    return x


def make_core_unet_params(pg, input_dim=12):
    p = {'stem': make_core_cnn_block_params(pg, input_dim, UNET_DIMS[0]), 'encoders': []}
    for i in range(len(UNET_DEPTHS)):
        cin = UNET_DIMS[i - 1] if i > 0 else UNET_DIMS[0]
        cout = UNET_DIMS[i]
        blocks = [make_core_cnn_block_params(pg, cin if bi == 0 else cout, cout)
                  for bi in range(UNET_DEPTHS[i])]
        rest = _stack_blocks(blocks[1:]) if len(blocks) > 1 else None
        p['encoders'].append((blocks[0], rest, cin != cout))
    p['bridge'] = make_core_cnn_block_params(pg, UNET_DIMS[-1], UNET_DIMS[-1])
    return p


def core_unet_forward(x, p):
    # CoreUnet.forward returns right after the bridge (decoder/head are unused).
    x = _core_stage(x, p['stem'], None, has_match=True, pool=False)
    for first_p, rest_p, has_match in p['encoders']:
        x = _core_stage(x, first_p, rest_p, has_match=has_match, pool=True)
    x = _core_stage(x, p['bridge'], None, has_match=False, pool=False)
    return x


# ------------------------------ ResNet152 (the module) -----------------------------

def make_model_params(seed=0):
    pg = ParamGen(seed)
    params = {'resnet1': make_resnet152_params(pg),     # self.model.features
              'resnet2': make_resnet152_params(pg),     # self.model.features2
              'unet': make_core_unet_params(pg, input_dim=12)}
    l0_w, l0_b = pg.linear(7, 4480)                      # nn.Linear(4480, 7)
    params['l0_w'] = l0_w.T.astype(BF16)                 # (4480, 7)
    params['l0_b'] = l0_b
    return params


@jax.jit
def _head(feats, w, b):
    return matmul_bias_act(feats, w, b, 'none', out_dtype=F32)


gap_jit = jax.jit(global_avg_pool)


def resnet152_module_forward(x1, x2, x3, params):
    """Mirrors ResNet152.forward.  Inputs are NCHW (PyTorch convention)."""
    nhwc = lambda t: jnp.transpose(t, (0, 2, 3, 1)).astype(BF16)

    # torch.any(x1 != 0): enqueue the tiny reduce first, dispatch the x2/x3 pipelines,
    # and only then sync on the flag so the device-to-host readback is hidden.
    any_x1 = jnp.any(x1 != 0)

    x2f = resnet_features(nhwc(x2), params['resnet2'])        # self.model.features2(x2)
    x3f = core_unet_forward(nhwc(x3), params['unet'])         # CoreUnet(...)(x3)
    x2p = gap_jit(x2f)                                        # (N, 2048)
    x3p = gap_jit(x3f)                                        # (N, 384)

    if bool(any_x1):
        x1f = resnet_features(nhwc(x1), params['resnet1'])    # self.model.features(x1)
        x1p = gap_jit(x1f)
        feats = jnp.concatenate([x1p, x2p, x3p], axis=1)      # (N, 4480)
    else:
        # NOTE: mirrors the reference; this path only matches the 4480-wide Linear when
        # x1 is nonzero, exactly as in the original module.
        feats = jnp.concatenate([x2p, x3p], axis=1)

    return _head(feats, params['l0_w'], params['l0_b'])


# ----------------------------------------------------------------------------------

if __name__ == "__main__":
    _buffered1_ok()                                    # probe Buffered(1) support once
    key = jax.random.PRNGKey(0)
    k1, k2, k3 = jax.random.split(key, 3)
    batch = 2
    # Small but structurally valid shapes: resnet inputs survive 5 stride-2 stages,
    # unet input survives 4 max-pools; final concat is 2048 + 2048 + 384 = 4480.
    x1 = jax.random.normal(k1, (batch, 3, 64, 64), F32)
    x2 = jax.random.normal(k2, (batch, 3, 64, 64), F32)
    x3 = jax.random.normal(k3, (batch, 12, 32, 32), F32)

    params = make_model_params(seed=0)
    out = resnet152_module_forward(x1, x2, x3, params)
    out = jax.block_until_ready(out)
    assert out.shape == (batch, 7) and out.dtype == jnp.float32
    print("KERNEL_OK")
</pallas_src>

<mosaic_0001>
module attributes {stable_mosaic.version = 11 : i64} {
  func.func @_probe_kernel(%arg0: i32, %arg1: memref<8x128xf32, #tpu.memory_space<vmem>>, %arg2: memref<8x128xf32, #tpu.memory_space<vmem>>) attributes {dimension_semantics = [#tpu.dimension_semantics<arbitrary>], iteration_bounds = array<i64: 2>, scalar_prefetch = 0 : i64, scratch_operands = 0 : i64, tpu.core_type = #tpu.core_type<tc>, window_params = [{pipeline_mode = #tpu.pipeline_mode<synchronous>, transform_indices = @transform_0, window_bounds = array<i64: 8, 128>}, {pipeline_mode = #tpu.pipeline_mode<synchronous>, transform_indices = @transform_1, window_bounds = array<i64: 8, 128>}]} {
    %c0 = arith.constant 0 : index
    %c0_0 = arith.constant 0 : index
    %0 = vector.load %arg1[%c0, %c0_0] : memref<8x128xf32, #tpu.memory_space<vmem>>, vector<8x128xf32>
    %cst = arith.constant 1.000000e+00 : f32
    %1 = vector.broadcast %cst : f32 to vector<8x128xf32>
    %2 = arith.addf %0, %1 : vector<8x128xf32>
    %c0_1 = arith.constant 0 : index
    %c0_2 = arith.constant 0 : index
    %3 = vector.load %arg2[%c0_1, %c0_2] : memref<8x128xf32, #tpu.memory_space<vmem>>, vector<8x128xf32>
    tpu.vector_store %arg2[%c0_1, %c0_2], %2 {strides = array<i32>} : memref<8x128xf32, #tpu.memory_space<vmem>>, vector<8x128xf32>,
    return
  }
  func.func @transform_0(%arg0: i32) -> (i32, i32) {
    %c0_i32 = arith.constant 0 : i32
    %c0_i32_0 = arith.constant 0 : i32
    %c0_i32_1 = arith.constant 0 : i32
    return %c0_i32, %c0_i32_0 : i32, i32
  }
  func.func @transform_1(%arg0: i32) -> (i32, i32) {
    %c0_i32 = arith.constant 0 : i32
    %c0_i32_0 = arith.constant 0 : i32
    %c0_i32_1 = arith.constant 0 : i32
    return %c0_i32, %c0_i32_0 : i32, i32
  }
}

module attributes {stable_mosaic.version = 11 : i64} {
  func.func @_gemm_kernel(%arg0: i32, %arg1: memref<1024x147xbf16, #tpu.memory_space<vmem>>, %arg2: memref<147x64xbf16, #tpu.memory_space<vmem>>, %arg3: memref<1x64xf32, #tpu.memory_space<vmem>>, %arg4: memref<1024x64xbf16, #tpu.memory_space<vmem>>) attributes {dimension_semantics = [#tpu.dimension_semantics<parallel>], iteration_bounds = array<i64: 2>, scalar_prefetch = 0 : i64, scratch_operands = 0 : i64, tpu.core_type = #tpu.core_type<tc>, window_params = [{transform_indices = @transform_0, window_bounds = array<i64: 1024, 147>}, {pipeline_mode = #tpu.pipeline_mode<synchronous>, transform_indices = @transform_1, window_bounds = array<i64: 147, 64>}, {pipeline_mode = #tpu.pipeline_mode<synchronous>, transform_indices = @transform_2, window_bounds = array<i64: 1, 64>}, {transform_indices = @transform_3, window_bounds = array<i64: 1024, 64>}]} {
    %c0 = arith.constant 0 : index
    %c0_0 = arith.constant 0 : index
    %0 = vector.load %arg1[%c0, %c0_0] : memref<1024x147xbf16, #tpu.memory_space<vmem>>, vector<1024x147xbf16>
    %c0_1 = arith.constant 0 : index
    %c0_2 = arith.constant 0 : index
    %1 = vector.load %arg2[%c0_1, %c0_2] : memref<147x64xbf16, #tpu.memory_space<vmem>>, vector<147x64xbf16>
    %cst = arith.constant dense<0.000000e+00> : vector<1024x64xf32>
    %2 = tpu.matmul %0, %1, %cst {dimension_numbers = #tpu.dot_dimension_numbers<[1], [0], [0], [1], [0, 0, 1, 1], [], []>} : vector<1024x147xbf16>, vector<147x64xbf16>, vector<1024x64xf32> -> vector<1024x64xf32>
    %c0_3 = arith.constant 0 : index
    %c0_4 = arith.constant 0 : index
    %3 = vector.load %arg3[%c0_3, %c0_4] : memref<1x64xf32, #tpu.memory_space<vmem>>, vector<1x64xf32>
    %4 = vector.broadcast %3 : vector<1x64xf32> to vector<1024x64xf32>
    %5 = arith.addf %2, %4 : vector<1024x64xf32>
    %cst_5 = arith.constant 0.000000e+00 : f32
    %6 = vector.broadcast %cst_5 : f32 to vector<1024x64xf32>
    %7 = arith.maximumf %5, %6 : vector<1024x64xf32>
    %8 = arith.truncf %7 : vector<1024x64xf32> to vector<1024x64xbf16>
    %c0_6 = arith.constant 0 : index
    %c0_7 = arith.constant 0 : index
    %9 = vector.load %arg4[%c0_6, %c0_7] : memref<1024x64xbf16, #tpu.memory_space<vmem>>, vector<1024x64xbf16>
    tpu.vector_store %arg4[%c0_6, %c0_7], %8 {strides = array<i32>} : memref<1024x64xbf16, #tpu.memory_space<vmem>>, vector<1024x64xbf16>,
    return
  }
  func.func @transform_0(%arg0: i32) -> (i32, i32) {
    %c0_i32 = arith.constant 0 : i32
    %c0_i32_0 = arith.constant 0 : i32
    return %arg0, %c0_i32 : i32, i32
  }
  func.func @transform_1(%arg0: i32) -> (i32, i32) {
    %c0_i32 = arith.constant 0 : i32
    %c0_i32_0 = arith.constant 0 : i32
    %c0_i32_1 = arith.constant 0 : i32
    return %c0_i32, %c0_i32_0 : i32, i32
  }
  func.func @transform_2(%arg0: i32) -> (i32, i32) {
    %c0_i32 = arith.constant 0 : i32
    %c0_i32_0 = arith.constant 0 : i32
    %c0_i32_1 = arith.constant 0 : i32
    return %c0_i32, %c0_i32_0 : i32, i32
  }
  func.func @transform_3(%arg0: i32) -> (i32, i32) {
    %c0_i32 = arith.constant 0 : i32
    %c0_i32_0 = arith.constant 0 : i32
    return %arg0, %c0_i32 : i32, i32
  }
}

module attributes {stable_mosaic.version = 11 : i64} {
  func.func @_pool3_kernel(%arg0: i32, %arg1: i32, %arg2: memref<1x16x17x128xbf16, #tpu.memory_space<vmem>>, %arg3: memref<1x2x17x128xbf16, #tpu.memory_space<vmem>>, %arg4: memref<1x8x16x64xbf16, #tpu.memory_space<vmem>>) attributes {dimension_semantics = [#tpu.dimension_semantics<parallel>, #tpu.dimension_semantics<parallel>], iteration_bounds = array<i64: 2, 2>, scalar_prefetch = 0 : i64, scratch_operands = 0 : i64, tpu.core_type = #tpu.core_type<tc>, window_params = [{transform_indices = @transform_0, window_bounds = array<i64: 1, 16, 17, 128>}, {transform_indices = @transform_1, window_bounds = array<i64: 1, 2, 17, 128>}, {transform_indices = @transform_2, window_bounds = array<i64: 1, 8, 16, 64>}]} {
    %c0 = arith.constant 0 : index
    %c0_0 = arith.constant 0 : index
    %c0_1 = arith.constant 0 : index
    %c0_2 = arith.constant 0 : index
    %0 = vector.load %arg2[%c0, %c0_0, %c0_1, %c0_2] : memref<1x16x17x128xbf16, #tpu.memory_space<vmem>>, vector<1x1x17x128xbf16>
    %1 = vector.shape_cast %0 : vector<1x1x17x128xbf16> to vector<17x128xbf16>
    %c0_3 = arith.constant 0 : index
    %c1 = arith.constant 1 : index
    %c0_4 = arith.constant 0 : index
    %c0_5 = arith.constant 0 : index
    %2 = vector.load %arg2[%c0_3, %c1, %c0_4, %c0_5] : memref<1x16x17x128xbf16, #tpu.memory_space<vmem>>, vector<1x1x17x128xbf16>
    %3 = vector.shape_cast %2 : vector<1x1x17x128xbf16> to vector<17x128xbf16>
    %c0_6 = arith.constant 0 : index
    %c2 = arith.constant 2 : index
    %c0_7 = arith.constant 0 : index
    %c0_8 = arith.constant 0 : index
    %4 = vector.load %arg2[%c0_6, %c2, %c0_7, %c0_8] : memref<1x16x17x128xbf16, #tpu.memory_space<vmem>>, vector<1x1x17x128xbf16>
    %5 = vector.shape_cast %4 : vector<1x1x17x128xbf16> to vector<17x128xbf16>
    %6 = arith.maximumf %1, %3 : vector<17x128xbf16>
    %7 = arith.maximumf %6, %5 : vector<17x128xbf16>
    %8 = vector.extract_strided_slice %7 {offsets = [0, 0], sizes = [16, 64], strides = [1, 1]} : vector<17x128xbf16> to vector<16x64xbf16>
    %9 = vector.extract_strided_slice %7 {offsets = [0, 64], sizes = [16, 64], strides = [1, 1]} : vector<17x128xbf16> to vector<16x64xbf16>
    %10 = arith.maximumf %8, %9 : vector<16x64xbf16>
    %11 = vector.extract_strided_slice %7 {offsets = [1, 0], sizes = [16, 64], strides = [1, 1]} : vector<17x128xbf16> to vector<16x64xbf16>
    %12 = arith.maximumf %10, %11 : vector<16x64xbf16>
    %c0_9 = arith.constant 0 : index
    %c0_10 = arith.constant 0 : index
    %c0_11 = arith.constant 0 : index
    %c0_12 = arith.constant 0 : index
    %13 = vector.load %arg4[%c0_9, %c0_10, %c0_11, %c0_12] : memref<1x8x16x64xbf16, #tpu.memory_space<vmem>>, vector<1x1x16x64xbf16>
    %14 = vector.shape_cast %13 : vector<1x1x16x64xbf16> to vector<16x64xbf16>
    %15 = vector.shape_cast %12 : vector<16x64xbf16> to vector<1x1x16x64xbf16>
    tpu.vector_store %arg4[%c0_9, %c0_10, %c0_11, %c0_12], %15 {strides = array<i32>} : memref<1x8x16x64xbf16, #tpu.memory_space<vmem>>, vector<1x1x16x64xbf16>,
    %c0_13 = arith.constant 0 : index
    %c2_14 = arith.constant 2 : index
    %c0_15 = arith.constant 0 : index
    %c0_16 = arith.constant 0 : index
    %16 = vector.load %arg2[%c0_13, %c2_14, %c0_15, %c0_16] : memref<1x16x17x128xbf16, #tpu.memory_space<vmem>>, vector<1x1x17x128xbf16>
    %17 = vector.shape_cast %16 : vector<1x1x17x128xbf16> to vector<17x128xbf16>
    %c0_17 = arith.constant 0 : index
    %c3 = arith.constant 3 : index
    %c0_18 = arith.constant 0 : index
    %c0_19 = arith.constant 0 : index
    %18 = vector.load %arg2[%c0_17, %c3, %c0_18, %c0_19] : memref<1x16x17x128xbf16, #tpu.memory_space<vmem>>, vector<1x1x17x128xbf16>
    %19 = vector.shape_cast %18 : vector<1x1x17x128xbf16> to vector<17x128xbf16>
    %c0_20 = arith.constant 0 : index
    %c4 = arith.constant 4 : index
    %c0_21 = arith.constant 0 : index
    %c0_22 = arith.constant 0 : index
    %20 = vector.load %arg2[%c0_20, %c4, %c0_21, %c0_22] : memref<1x16x17x128xbf16, #tpu.memory_space<vmem>>, vector<1x1x17x128xbf16>
    %21 = vector.shape_cast %20 : vector<1x1x17x128xbf16> to vector<17x128xbf16>
    %22 = arith.maximumf %17, %19 : vector<17x128xbf16>
    %23 = arith.maximumf %22, %21 : vector<17x128xbf16>
    %24 = vector.extract_strided_slice %23 {offsets = [0, 0], sizes = [16, 64], strides = [1, 1]} : vector<17x128xbf16> to vector<16x64xbf16>
    %25 = vector.extract_strided_slice %23 {offsets = [0, 64], sizes = [16, 64], strides = [1, 1]} : vector<17x128xbf16> to vector<16x64xbf16>
    %26 = arith.maximumf %24, %25 : vector<16x64xbf16>
    %27 = vector.extract_strided_slice %23 {offsets = [1, 0], sizes = [16, 64], strides = [1, 1]} : vector<17x128xbf16> to vector<16x64xbf16>
    %28 = arith.maximumf %26, %27 : vector<16x64xbf16>
    %c0_23 = arith.constant 0 : index
    %c1_24 = arith.constant 1 : index
    %c0_25 = arith.constant 0 : index
    %c0_26 = arith.constant 0 : index
    %29 = vector.load %arg4[%c0_23, %c1_24, %c0_25, %c0_26] : memref<1x8x16x64xbf16, #tpu.memory_space<vmem>>, vector<1x1x16x64xbf16>
    %30 = vector.shape_cast %29 : vector<1x1x16x64xbf16> to vector<16x64xbf16>
    %31 = vector.shape_cast %28 : vector<16x64xbf16> to vector<1x1x16x64xbf16>
    tpu.vector_store %arg4[%c0_23, %c1_24, %c0_25, %c0_26], %31 {strides = array<i32>} : memref<1x8x16x64xbf16, #tpu.memory_space<vmem>>, vector<1x1x16x64xbf16>,
    %c0_27 = arith.constant 0 : index
    %c4_28 = arith.constant 4 : index
    %c0_29 = arith.constant 0 : index
    %c0_30 = arith.constant 0 : index
    %32 = vector.load %arg2[%c0_27, %c4_28, %c0_29, %c0_30] : memref<1x16x17x128xbf16, #tpu.memory_space<vmem>>, vector<1x1x17x128xbf16>
    %33 = vector.shape_cast %32 : vector<1x1x17x128xbf16> to vector<17x128xbf16>
    %c0_31 = arith.constant 0 : index
    %c5 = arith.constant 5 : index
    %c0_32 = arith.constant 0 : index
    %c0_33 = arith.constant 0 : index
    %34 = vector.load %arg2[%c0_31, %c5, %c0_32, %c0_33] : memref<1x16x17x128xbf16, #tpu.memory_space<vmem>>, vector<1x1x17x128xbf16>
    %35 = vector.shape_cast %34 : vector<1x1x17x128xbf16> to vector<17x128xbf16>
    %c0_34 = arith.constant 0 : index
    %c6 = arith.constant 6 : index
    %c0_35 = arith.constant 0 : index
    %c0_36 = arith.constant 0 : index
    %36 = vector.load %arg2[%c0_34, %c6, %c0_35, %c0_36] : memref<1x16x17x128xbf16, #tpu.memory_space<vmem>>, vector<1x1x17x128xbf16>
    %37 = vector.shape_cast %36 : vector<1x1x17x128xbf16> to vector<17x128xbf16>
    %38 = arith.maximumf %33, %35 : vector<17x128xbf16>
    %39 = arith.maximumf %38, %37 : vector<17x128xbf16>
    %40 = vector.extract_strided_slice %39 {offsets = [0, 0], sizes = [16, 64], strides = [1, 1]} : vector<17x128xbf16> to vector<16x64xbf16>
    %41 = vector.extract_strided_slice %39 {offsets = [0, 64], sizes = [16, 64], strides = [1, 1]} : vector<17x128xbf16> to vector<16x64xbf16>
    %42 = arith.maximumf %40, %41 : vector<16x64xbf16>
    %43 = vector.extract_strided_slice %39 {offsets = [1, 0], sizes = [16, 64], strides = [1, 1]} : vector<17x128xbf16> to vector<16x64xbf16>
    %44 = arith.maximumf %42, %43 : vector<16x64xbf16>
    %c0_37 = arith.constant 0 : index
    %c2_38 = arith.constant 2 : index
    %c0_39 = arith.constant 0 : index
    %c0_40 = arith.constant 0 : index
    %45 = vector.load %arg4[%c0_37, %c2_38, %c0_39, %c0_40] : memref<1x8x16x64xbf16, #tpu.memory_space<vmem>>, vector<1x1x16x64xbf16>
    %46 = vector.shape_cast %45 : vector<1x1x16x64xbf16> to vector<16x64xbf16>
    %47 = vector.shape_cast %44 : vector<16x64xbf16> to vector<1x1x16x64xbf16>
    tpu.vector_store %arg4[%c0_37, %c2_38, %c0_39, %c0_40], %47 {strides = array<i32>} : memref<1x8x16x64xbf16, #tpu.memory_space<vmem>>, vector<1x1x16x64xbf16>,
    %c0_41 = arith.constant 0 : index
    %c6_42 = arith.constant 6 : index
    %c0_43 = arith.constant 0 : index
    %c0_44 = arith.constant 0 : index
    %48 = vector.load %arg2[%c0_41, %c6_42, %c0_43, %c0_44] : memref<1x16x17x128xbf16, #tpu.memory_space<vmem>>, vector<1x1x17x128xbf16>
    %49 = vector.shape_cast %48 : vector<1x1x17x128xbf16> to vector<17x128xbf16>
    %c0_45 = arith.constant 0 : index
    %c7 = arith.constant 7 : index
    %c0_46 = arith.constant 0 : index
    %c0_47 = arith.constant 0 : index
    %50 = vector.load %arg2[%c0_45, %c7, %c0_46, %c0_47] : memref<1x16x17x128xbf16, #tpu.memory_space<vmem>>, vector<1x1x17x128xbf16>
    %51 = vector.shape_cast %50 : vector<1x1x17x128xbf16> to vector<17x128xbf16>
    %c0_48 = arith.constant 0 : index
    %c8 = arith.constant 8 : index
    %c0_49 = arith.constant 0 : index
    %c0_50 = arith.constant 0 : index
    %52 = vector.load %arg2[%c0_48, %c8, %c0_49, %c0_50] : memref<1x16x17x128xbf16, #tpu.memory_space<vmem>>, vector<1x1x17x128xbf16>
    %53 = vector.shape_cast %52 : vector<1x1x17x128xbf16> to vector<17x128xbf16>
    %54 = arith.maximumf %49, %51 : vector<17x128xbf16>
    %55 = arith.maximumf %54, %53 : vector<17x128xbf16>
    %56 = vector.extract_strided_slice %55 {offsets = [0, 0], sizes = [16, 64], strides = [1, 1]} : vector<17x128xbf16> to vector<16x64xbf16>
    %57 = vector.extract_strided_slice %55 {offsets = [0, 64], sizes = [16, 64], strides = [1, 1]} : vector<17x128xbf16> to vector<16x64xbf16>
    %58 = arith.maximumf %56, %57 : vector<16x64xbf16>
    %59 = vector.extract_strided_slice %55 {offsets = [1, 0], sizes = [16, 64], strides = [1, 1]} : vector<17x128xbf16> to vector<16x64xbf16>
    %60 = arith.maximumf %58, %59 : vector<16x64xbf16>
    %c0_51 = arith.constant 0 : index
    %c3_52 = arith.constant 3 : index
    %c0_53 = arith.constant 0 : index
    %c0_54 = arith.constant 0 : index
    %61 = vector.load %arg4[%c0_51, %c3_52, %c0_53, %c0_54] : memref<1x8x16x64xbf16, #tpu.memory_space<vmem>>, vector<1x1x16x64xbf16>
    %62 = vector.shape_cast %61 : vector<1x1x16x64xbf16> to vector<16x64xbf16>
    %63 = vector.shape_cast %60 : vector<16x64xbf16> to vector<1x1x16x64xbf16>
    tpu.vector_store %arg4[%c0_51, %c3_52, %c0_53, %c0_54], %63 {strides = array<i32>} : memref<1x8x16x64xbf16, #tpu.memory_space<vmem>>, vector<1x1x16x64xbf16>,
    %c0_55 = arith.constant 0 : index
    %c8_56 = arith.constant 8 : index
    %c0_57 = arith.constant 0 : index
    %c0_58 = arith.constant 0 : index
    %64 = vector.load %arg2[%c0_55, %c8_56, %c0_57, %c0_58] : memref<1x16x17x128xbf16, #tpu.memory_space<vmem>>, vector<1x1x17x128xbf16>
    %65 = vector.shape_cast %64 : vector<1x1x17x128xbf16> to vector<17x128xbf16>
    %c0_59 = arith.constant 0 : index
    %c9 = arith.constant 9 : index
    %c0_60 = arith.constant 0 : index
    %c0_61 = arith.constant 0 : index
    %66 = vector.load %arg2[%c0_59, %c9, %c0_60, %c0_61] : memref<1x16x17x128xbf16, #tpu.memory_space<vmem>>, vector<1x1x17x128xbf16>
    %67 = vector.shape_cast %66 : vector<1x1x17x128xbf16> to vector<17x128xbf16>
    %c0_62 = arith.constant 0 : index
    %c10 = arith.constant 10 : index
    %c0_63 = arith.constant 0 : index
    %c0_64 = arith.constant 0 : index
    %68 = vector.load %arg2[%c0_62, %c10, %c0_63, %c0_64] : memref<1x16x17x128xbf16, #tpu.memory_space<vmem>>, vector<1x1x17x128xbf16>
    %69 = vector.shape_cast %68 : vector<1x1x17x128xbf16> to vector<17x128xbf16>
    %70 = arith.maximumf %65, %67 : vector<17x128xbf16>
    %71 = arith.maximumf %70, %69 : vector<17x128xbf16>
    %72 = vector.extract_strided_slice %71 {offsets = [0, 0], sizes = [16, 64], strides = [1, 1]} : vector<17x128xbf16> to vector<16x64xbf16>
    %73 = vector.extract_strided_slice %71 {offsets = [0, 64], sizes = [16, 64], strides = [1, 1]} : vector<17x128xbf16> to vector<16x64xbf16>
    %74 = arith.maximumf %72, %73 : vector<16x64xbf16>
    %75 = vector.extract_strided_slice %71 {offsets = [1, 0], sizes = [16, 64], strides = [1, 1]} : vector<17x128xbf16> to vector<16x64xbf16>
    %76 = arith.maximumf %74, %75 : vector<16x64xbf16>
    %c0_65 = arith.constant 0 : index
    %c4_66 = arith.constant 4 : index
    %c0_67 = arith.constant 0 : index
    %c0_68 = arith.constant 0 : index
    %77 = vector.load %arg4[%c0_65, %c4_66, %c0_67, %c0_68] : memref<1x8x16x64xbf16, #tpu.memory_space<vmem>>, vector<1x1x16x64xbf16>
    %78 = vector.shape_cast %77 : vector<1x1x16x64xbf16> to vector<16x64xbf16>
    %79 = vector.shape_cast %76 : vector<16x64xbf16> to vector<1x1x16x64xbf16>
    tpu.vector_store %arg4[%c0_65, %c4_66, %c0_67, %c0_68], %79 {strides = array<i32>} : memref<1x8x16x64xbf16, #tpu.memory_space<vmem>>, vector<1x1x16x64xbf16>,
    %c0_69 = arith.constant 0 : index
    %c10_70 = arith.constant 10 : index
    %c0_71 = arith.constant 0 : index
    %c0_72 = arith.constant 0 : index
    %80 = vector.load %arg2[%c0_69, %c10_70, %c0_71, %c0_72] : memref<1x16x17x128xbf16, #tpu.memory_space<vmem>>, vector<1x1x17x128xbf16>
    %81 = vector.shape_cast %80 : vector<1x1x17x128xbf16> to vector<17x128xbf16>
    %c0_73 = arith.constant 0 : index
    %c11 = arith.constant 11 : index
    %c0_74 = arith.constant 0 : index
    %c0_75 = arith.constant 0 : index
    %82 = vector.load %arg2[%c0_73, %c11, %c0_74, %c0_75] : memref<1x16x17x128xbf16, #tpu.memory_space<vmem>>, vector<1x1x17x128xbf16>
    %83 = vector.shape_cast %82 : vector<1x1x17x128xbf16> to vector<17x128xbf16>
    %c0_76 = arith.constant 0 : index
    %c12 = arith.constant 12 : index
    %c0_77 = arith.constant 0 : index
    %c0_78 = arith.constant 0 : index
    %84 = vector.load %arg2[%c0_76, %c12, %c0_77, %c0_78] : memref<1x16x17x128xbf16, #tpu.memory_space<vmem>>, vector<1x1x17x128xbf16>
    %85 = vector.shape_cast %84 : vector<1x1x17x128xbf16> to vector<17x128xbf16>
    %86 = arith.maximumf %81, %83 : vector<17x128xbf16>
    %87 = arith.maximumf %86, %85 : vector<17x128xbf16>
    %88 = vector.extract_strided_slice %87 {offsets = [0, 0], sizes = [16, 64], strides = [1, 1]} : vector<17x128xbf16> to vector<16x64xbf16>
    %89 = vector.extract_strided_slice %87 {offsets = [0, 64], sizes = [16, 64], strides = [1, 1]} : vector<17x128xbf16> to vector<16x64xbf16>
    %90 = arith.maximumf %88, %89 : vector<16x64xbf16>
    %91 = vector.extract_strided_slice %87 {offsets = [1, 0], sizes = [16, 64], strides = [1, 1]} : vector<17x128xbf16> to vector<16x64xbf16>
    %92 = arith.maximumf %90, %91 : vector<16x64xbf16>
    %c0_79 = arith.constant 0 : index
    %c5_80 = arith.constant 5 : index
    %c0_81 = arith.constant 0 : index
    %c0_82 = arith.constant 0 : index
    %93 = vector.load %arg4[%c0_79, %c5_80, %c0_81, %c0_82] : memref<1x8x16x64xbf16, #tpu.memory_space<vmem>>, vector<1x1x16x64xbf16>
    %94 = vector.shape_cast %93 : vector<1x1x16x64xbf16> to vector<16x64xbf16>
    %95 = vector.shape_cast %92 : vector<16x64xbf16> to vector<1x1x16x64xbf16>
    tpu.vector_store %arg4[%c0_79, %c5_80, %c0_81, %c0_82], %95 {strides = array<i32>} : memref<1x8x16x64xbf16, #tpu.memory_space<vmem>>, vector<1x1x16x64xbf16>,
    %c0_83 = arith.constant 0 : index
    %c12_84 = arith.constant 12 : index
    %c0_85 = arith.constant 0 : index
    %c0_86 = arith.constant 0 : index
    %96 = vector.load %arg2[%c0_83, %c12_84, %c0_85, %c0_86] : memref<1x16x17x128xbf16, #tpu.memory_space<vmem>>, vector<1x1x17x128xbf16>
    %97 = vector.shape_cast %96 : vector<1x1x17x128xbf16> to vector<17x128xbf16>
    %c0_87 = arith.constant 0 : index
    %c13 = arith.constant 13 : index
    %c0_88 = arith.constant 0 : index
    %c0_89 = arith.constant 0 : index
    %98 = vector.load %arg2[%c0_87, %c13, %c0_88, %c0_89] : memref<1x16x17x128xbf16, #tpu.memory_space<vmem>>, vector<1x1x17x128xbf16>
    %99 = vector.shape_cast %98 : vector<1x1x17x128xbf16> to vector<17x128xbf16>
    %c0_90 = arith.constant 0 : index
    %c14 = arith.constant 14 : index
    %c0_91 = arith.constant 0 : index
    %c0_92 = arith.constant 0 : index
    %100 = vector.load %arg2[%c0_90, %c14, %c0_91, %c0_92] : memref<1x16x17x128xbf16, #tpu.memory_space<vmem>>, vector<1x1x17x128xbf16>
    %101 = vector.shape_cast %100 : vector<1x1x17x128xbf16> to vector<17x128xbf16>
    %102 = arith.maximumf %97, %99 : vector<17x128xbf16>
    %103 = arith.maximumf %102, %101 : vector<17x128xbf16>
    %104 = vector.extract_strided_slice %103 {offsets = [0, 0], sizes = [16, 64], strides = [1, 1]} : vector<17x128xbf16> to vector<16x64xbf16>
    %105 = vector.extract_strided_slice %103 {offsets = [0, 64], sizes = [16, 64], strides = [1, 1]} : vector<17x128xbf16> to vector<16x64xbf16>
    %106 = arith.maximumf %104, %105 : vector<16x64xbf16>
    %107 = vector.extract_strided_slice %103 {offsets = [1, 0], sizes = [16, 64], strides = [1, 1]} : vector<17x128xbf16> to vector<16x64xbf16>
    %108 = arith.maximumf %106, %107 : vector<16x64xbf16>
    %c0_93 = arith.constant 0 : index
    %c6_94 = arith.constant 6 : index
    %c0_95 = arith.constant 0 : index
    %c0_96 = arith.constant 0 : index
    %109 = vector.load %arg4[%c0_93, %c6_94, %c0_95, %c0_96] : memref<1x8x16x64xbf16, #tpu.memory_space<vmem>>, vector<1x1x16x64xbf16>
    %110 = vector.shape_cast %109 : vector<1x1x16x64xbf16> to vector<16x64xbf16>
    %111 = vector.shape_cast %108 : vector<16x64xbf16> to vector<1x1x16x64xbf16>
    tpu.vector_store %arg4[%c0_93, %c6_94, %c0_95, %c0_96], %111 {strides = array<i32>} : memref<1x8x16x64xbf16, #tpu.memory_space<vmem>>, vector<1x1x16x64xbf16>,
    %c0_97 = arith.constant 0 : index
    %c14_98 = arith.constant 14 : index
    %c0_99 = arith.constant 0 : index
    %c0_100 = arith.constant 0 : index
    %112 = vector.load %arg2[%c0_97, %c14_98, %c0_99, %c0_100] : memref<1x16x17x128xbf16, #tpu.memory_space<vmem>>, vector<1x1x17x128xbf16>
    %113 = vector.shape_cast %112 : vector<1x1x17x128xbf16> to vector<17x128xbf16>
    %c0_101 = arith.constant 0 : index
    %c15 = arith.constant 15 : index
    %c0_102 = arith.constant 0 : index
    %c0_103 = arith.constant 0 : index
    %114 = vector.load %arg2[%c0_101, %c15, %c0_102, %c0_103] : memref<1x16x17x128xbf16, #tpu.memory_space<vmem>>, vector<1x1x17x128xbf16>
    %115 = vector.shape_cast %114 : vector<1x1x17x128xbf16> to vector<17x128xbf16>
    %c0_104 = arith.constant 0 : index
    %c0_105 = arith.constant 0 : index
    %c0_106 = arith.constant 0 : index
    %c0_107 = arith.constant 0 : index
    %116 = vector.load %arg3[%c0_104, %c0_105, %c0_106, %c0_107] : memref<1x2x17x128xbf16, #tpu.memory_space<vmem>>, vector<1x1x17x128xbf16>
    %117 = vector.shape_cast %116 : vector<1x1x17x128xbf16> to vector<17x128xbf16>
    %118 = arith.maximumf %113, %115 : vector<17x128xbf16>
    %119 = arith.maximumf %118, %117 : vector<17x128xbf16>
    %120 = vector.extract_strided_slice %119 {offsets = [0, 0], sizes = [16, 64], strides = [1, 1]} : vector<17x128xbf16> to vector<16x64xbf16>
    %121 = vector.extract_strided_slice %119 {offsets = [0, 64], sizes = [16, 64], strides = [1, 1]} : vector<17x128xbf16> to vector<16x64xbf16>
    %122 = arith.maximumf %120, %121 : vector<16x64xbf16>
    %123 = vector.extract_strided_slice %119 {offsets = [1, 0], sizes = [16, 64], strides = [1, 1]} : vector<17x128xbf16> to vector<16x64xbf16>
    %124 = arith.maximumf %122, %123 : vector<16x64xbf16>
    %c0_108 = arith.constant 0 : index
    %c7_109 = arith.constant 7 : index
    %c0_110 = arith.constant 0 : index
    %c0_111 = arith.constant 0 : index
    %125 = vector.load %arg4[%c0_108, %c7_109, %c0_110, %c0_111] : memref<1x8x16x64xbf16, #tpu.memory_space<vmem>>, vector<1x1x16x64xbf16>
    %126 = vector.shape_cast %125 : vector<1x1x16x64xbf16> to vector<16x64xbf16>
    %127 = vector.shape_cast %124 : vector<16x64xbf16> to vector<1x1x16x64xbf16>
    tpu.vector_store %arg4[%c0_108, %c7_109, %c0_110, %c0_111], %127 {strides = array<i32>} : memref<1x8x16x64xbf16, #tpu.memory_space<vmem>>, vector<1x1x16x64xbf16>,
    return
  }
  func.func @transform_0(%arg0: i32, %arg1: i32) -> (i32, i32, i32, i32) {
    %c0_i32 = arith.constant 0 : i32
    %c0_i32_0 = arith.constant 0 : i32
    %c0_i32_1 = arith.constant 0 : i32
    return %arg0, %arg1, %c0_i32, %c0_i32_0 : i32, i32, i32, i32
  }
  func.func @transform_1(%arg0: i32, %arg1: i32) -> (i32, i32, i32, i32) {
    %c1_i32 = arith.constant 1 : i32
    %0 = arith.addi %arg1, %c1_i32 : i32
    %c8_i32 = arith.constant 8 : i32
    %1 = arith.muli %0, %c8_i32 : i32
    %c0_i32 = arith.constant 0 : i32
    %c0_i32_0 = arith.constant 0 : i32
    %c0_i32_1 = arith.constant 0 : i32
    return %arg0, %1, %c0_i32, %c0_i32_0 : i32, i32, i32, i32
  }
  func.func @transform_2(%arg0: i32, %arg1: i32) -> (i32, i32, i32, i32) {
    %c0_i32 = arith.constant 0 : i32
    %c0_i32_0 = arith.constant 0 : i32
    %c0_i32_1 = arith.constant 0 : i32
    return %arg0, %arg1, %c0_i32, %c0_i32_0 : i32, i32, i32, i32
  }
}

</mosaic_0001>

<bundles_post_ra>
// kernel: tpu_custom_call.1
= control target key start
LH: loop header
LB: loop body
LE: loop exit
PB: predicated region body
PF: predicated region fallthrough
CT: control target
= control target key end

     0   :  { %6 = vsyncpa [#allocation3], 0  ;;  %s305_s0 = inlined_call_operand.hbm [shape: f32[8,128], index: 0, kind: input, shape index: {}]   ;;  %s306_s1 = inlined_call_operand.hbm [shape: f32[8,128], index: 1, kind: output, shape index: {}]  }
   0x1   :  { %7 = vsyncpa [#allocation4], 0  ;;  %s258_s6 = smov 0  }
   0x2 LB: > { %s145_s7 = sadd.s32 4294967295, %s244_s6   ;;  %p146_p0 = scmp.ge.s32.totalorder %s244_s6, 1  ;;  %s244_s6 = sphi %s258_s6, %s13_s6  }
   0x3   : > { %p60_p1 = scmp.lt.s32.totalorder %s244_s6, 3  ;;  %p270_p3 = scmp.eq.s32.totalorder %s145_s7, 0 }
   0x4   : > { %s246_s10 = smov [#allocation2]  }
   0x5   : > { %p266_p2 = pnand %p146_p0, %p60_p1  ;;  %s73_s11 = sshll.u32 %s246_s10, 4  ;;  %s74_s11 = int_to_ptr.vmem [resolvable:$true] %s73_s11 }
   0x6   : > { %s191_s12 = scalar_lea.vmem %s74_s11, 128  ;;  %p199_p10 = scmp.lt.s32.totalorder %s74_s11, %s74_s11 }
   0x7   : > { %p162_p4 = pneg %p266_p2  ;;  %p192_p7 = scmp.ne.s32.totalorder %s74_s11, %s191_s12 }
   0x8   : > { %p200_p11 = scmp.lt.s32.totalorder %s191_s12, %s191_s12 }
   0x9   : > { %p163_p5 = pnand %p270_p3, %p162_p4 }
   0xa   : > { %p201_p12 = por %p200_p11, %p199_p10 }
   0xb   : > { %p182_p6 = pneg %p163_p5 }
   0xd   : > { %p194_p8 = pnand %p192_p7, %p182_p6 }
   0xf   : > { %p195_p9 = pneg %p194_p8 }
  0x11   : > { %p202_p13 = pnand %p201_p12, %p195_p9 }
  0x13   : > { %205 = shalt.err (!%p202_p13)
}
  0x14   : > { %165 = dma.hbm_to_vmem [thread:$0]  (!%p163_p5), %s305_s0, 128, %s74_s11, [#allocation3]  }
  0x15   : > { %86 = sbr.rel (%p266_p2) target bundleno = 42 (0x2a), region = 24 }
  0x1a   : > { %235 = dma.done.wait (%p270_p3), [#allocation3], 128  }
  0x1b   : > { %237 = vsyncadd (%p270_p3), [#allocation3], 4294967168  ;;  %s247_s15 = smov [#allocation5]   ;;  %v96_v0 = vld [vmem:[#allocation2] sm:$0xff]  ;;  %p287_p0 = scmp.eq.s32.totalorder %s145_s7, 1 }
  0x1c   : > { %s106_s16 = sshll.u32 %s247_s15, 4  ;;  %v97_v1 = vadd.f32 1.0, %v96_v0  ;;  %s107_s16 = int_to_ptr.vmem [resolvable:$true] %s106_s16 }
  0x1d   : > { %s206_s18 = scalar_lea.vmem %s107_s16, 128  ;;  %p213_p5 = scmp.lt.s32.totalorder %s107_s16, %s107_s16 }
  0x1e   : > { %98 = vst [vmem:[#allocation5] sm:$0xff] %v97_v1  ;;  %p207_p1 = scmp.ne.s32.totalorder %s107_s16, %s206_s18  ;;  %p214_p6 = scmp.lt.s32.totalorder %s206_s18, %s206_s18 }
  0x20   : > { %p208_p2 = pnand %p207_p1, %p287_p0  ;;  %p215_p7 = por %p214_p6, %p213_p5 }
  0x22   : > { %p209_p4 = pneg %p208_p2 }
  0x24   : > { %p216_p3 = pnand %p215_p7, %p209_p4 }
  0x26   : > { %219 = shalt.err (!%p216_p3)
}
  0x27   : > { %159 = dma.vmem_to_hbm [thread:$0]  (%p287_p0), %s107_s16, 128, %s306_s1, [#allocation4]  }
  0x28   : > { %239 = dma.done.wait (%p287_p0), [#allocation4], 128  }
  0x29   : > { %241 = vsyncadd (%p287_p0), [#allocation4], 4294967168 }
  0x2a PF: > { %s13_s6 = sadd.s32 1, %s244_s6  }
  0x2b   : > { %p10_p8 = scmp.ge.s32.totalorder %s13_s6, 4  }
  0x2d   :  { %12 = sbr.rel (!%p10_p8) target bundleno = 2 (0x2), region = 53 }
  0x32   :  { %119 = vsyncpa [#allocation3], 1 }
  0x33   :  { %121 = vsyncpa [#allocation3 + $0x1], 1 }
  0x34   :  { %122 = vsyncpa [#allocation4], 1 }
  0x35   :  { %124 = vsyncpa [#allocation4 + $0x1], 1 }

// kernel: _resnet_stem.2
= control target key start
LH: loop header
LB: loop body
LE: loop exit
PB: predicated region body
PF: predicated region fallthrough
CT: control target
= control target key end

     0   :  { %s3254_s12 = smov 0   ;;  %s3911_s0 = inlined_call_operand.vmem [shape: bf16[2048,147], index: 0, kind: input, shape index: {}]   ;;  %s3912_s1 = inlined_call_operand.vmem [shape: bf16[147,64], index: 1, kind: input, shape index: {}]   ;;  %s3913_s2 = inlined_call_operand.vmem [shape: f32[1,64], index: 2, kind: input, shape index: {}]   ;;  %s3914_s3 = inlined_call_operand.vmem [shape: bf16[2048,64], index: 3, kind: output, shape index: {}]  }
   0x1 LB: > { %s2535_s13 = sadd.s32 4294967295, %s3230_s12   ;;  %p2539_p0 = scmp.ge.s32.totalorder %s3230_s12, 1  ;;  %s3230_s12 = sphi %s3254_s12, %s13_s12  }
   0x2   : > { %p139_p1 = scmp.lt.s32.totalorder %s3230_s12, 3 }
   0x4   : > { %p140_p2 = pnand %p2539_p0, %p139_p1 }
   0x5   : > { %s2540_s20 = sshll.u32 (!%p140_p2), %s2535_s13, 7 }
   0x6   : > { %143 = sbr.rel (%p140_p2) target bundleno = 504 (0x1f8), region = 32  ;;  %p165_p3 = scmp.lt.s32.totalorder (!%p140_p2), %s2540_s20, 255 }
   0xb   : > { %v3037_v0 = vld [vmem:[%s3912_s1 + $0x38] sm:$0xff]   ;;  %v3232_v1 = vmov 0   ;;  %v3038_v2 = vld [vmem:[%s3912_s1 + $0x30] sm:$0xff]   ;;  %v3039_v3 = vld [vmem:[%s3912_s1 + $0x28] sm:$0xff]   ;;  %s3916_s20 = smov (!%p165_p3, %s2540_s20), 255  ;;  %vm965_vm0 = vcmask 154624  }
   0xc   : > { %1165 = vmatprep.subr.bf16.mxu0 %v3232_v1  ;;  %3007 = vmatprep.subr.bf16.mxu1 %v3232_v1  ;;  %v3040_v4 = vld [vmem:[%s3912_s1 + $0x20] sm:$0xff]   ;;  %s2878_s23 = sshll.u32 %s3916_s20, 3  ;;  %v3041_v5 = vld [vmem:[%s3912_s1 + $0x18] sm:$0xff]   ;;  %v3042_v8 = vld [vmem:[%s3912_s1 + $0x10] sm:$0xff]   ;;  %vm1158_vm1 = vcmask 1040384   ;;  %vm1159_vm2 = vcmask 1041408  }
   0xd   : > { %1166 = vmatpush1.bf16.msra.mxu0 %v3037_v0  ;;  %3017 = vmatpush1.bf16.msra.mxu1 %v3037_v0  ;;  %s3280_s26 = scalar_lea.vmem %s3911_s0, %s2878_s23  ;;  %v3043_v9 = vld [vmem:[%s3912_s1 + $0x8] sm:$0xff]   ;;  %v3233_v10 = vmov 65535   ;;  %v3044_v12 = vld [vmem:[%s3912_s1] sm:$0xff]   ;;  %s2544_s15 = sshll.u32 %s3916_s20, 2  ;;  %vm2350_vm3 = vcmask 519168  }
   0xe   : > { %1167 = vmatprep.subr.bf16.mxu0 %v3232_v1  ;;  %3008 = vmatprep.subr.bf16.mxu1 %v3232_v1  ;;  %v3049_v6 = vld [vmem:[%s3280_s26 + $0x4] ss:$8 sps:$4 sm:$0xff]   ;;  %v1160_v11 = vsel %vm1158_vm1, 4294967295, %v3233_v10  ;;  %v3045_v13 = vld [vmem:[%s3912_s1 + $0x48] ss:$0 sps:$4 sm:$0x33]   ;;  %s3471_s18 = scalar_lea.vmem %s3914_s3, %s2544_s15 }
   0xf   : > { %v3052_v7 = vld [vmem:[%s3280_s26 + $0x204] ss:$8 sps:$4 sm:$0xff]   ;;  %2684 = vmatprep.mubr.msk.bf16.mxu0 %vm965_vm0, %v3049_v6  ;;  %v1161_v14 = vsel %vm1159_vm2, %v1160_v11, 0  ;;  %v3047_v17 = vld [vmem:[%s3280_s26] ss:$8 sps:$4 sm:$0xff]  }
  0x10   : > { %2716 = vmatprep.mubr.msk.bf16.mxu1 %vm965_vm0, %v3052_v7  ;;  %v1163_v15 = vand.u32 %v3045_v13, %v1161_v14  ;;  %v3046_v16 = vld [vmem:[%s3912_s1 + $0x40] sm:$0xff]   ;;  %v3053_v19 = vld [vmem:[%s3280_s26 + $0x14] ss:$8 sps:$4 sm:$0xff]   ;;  %v3057_v21 = vld [vmem:[%s3280_s26 + $0x10] ss:$8 sps:$4 sm:$0xff]  }
  0x11   : > { %1168 = vmatpush1.bf16.msra.mxu0 %v3038_v2  ;;  %3018 = vmatpush1.bf16.msra.mxu1 %v3038_v2  ;;  %v3050_v18 = vld [vmem:[%s3280_s26 + $0x200] ss:$8 sps:$4 sm:$0xff]   ;;  %v3055_v20 = vld [vmem:[%s3280_s26 + $0x214] ss:$8 sps:$4 sm:$0xff]   ;;  %v3058_v22 = vld [vmem:[%s3280_s26 + $0x210] ss:$8 sps:$4 sm:$0xff]  }
  0x12   : > { %1169 = vmatprep.subr.bf16.mxu0 %v3232_v1  ;;  %3009 = vmatprep.subr.bf16.mxu1 %v3232_v1  ;;  %v3059_v23 = vld [vmem:[%s3280_s26 + $0x24] ss:$8 sps:$4 sm:$0xff]   ;;  %v3063_v25 = vld [vmem:[%s3280_s26 + $0x20] ss:$8 sps:$4 sm:$0xff]   ;;  %v3065_v27 = vld [vmem:[%s3280_s26 + $0x34] ss:$8 sps:$4 sm:$0xff]  }
  0x13   : > { %v3061_v24 = vld [vmem:[%s3280_s26 + $0x224] ss:$8 sps:$4 sm:$0xff]   ;;  %v3064_v26 = vld [vmem:[%s3280_s26 + $0x220] ss:$8 sps:$4 sm:$0xff]   ;;  %v3067_v28 = vld [vmem:[%s3280_s26 + $0x234] ss:$8 sps:$4 sm:$0xff]  }
  0x14   : > { %v3069_v29 = vld [vmem:[%s3280_s26 + $0x30] ss:$8 sps:$4 sm:$0xff]   ;;  %v3071_v31 = vld [vmem:[%s3280_s26 + $0x44] ss:$8 sps:$4 sm:$0xff]   ;;  %v3075_v33 = vld [vmem:[%s3280_s26 + $0x40] ss:$8 sps:$4 sm:$0xff]  }
  0x15   : > { %1170 = vmatpush1.bf16.msra.mxu0 %v3039_v3  ;;  %3019 = vmatpush1.bf16.msra.mxu1 %v3039_v3  ;;  %v3070_v30 = vld [vmem:[%s3280_s26 + $0x230] ss:$8 sps:$4 sm:$0xff]   ;;  %v3073_v32 = vld [vmem:[%s3280_s26 + $0x244] ss:$8 sps:$4 sm:$0xff]   ;;  %v3076_v34 = vld [vmem:[%s3280_s26 + $0x240] ss:$8 sps:$4 sm:$0xff]  }
  0x16   : > { %1171 = vmatprep.subr.bf16.mxu0 %v3232_v1  ;;  %3010 = vmatprep.subr.bf16.mxu1 %v3232_v1  ;;  %v3077_v35 = vld [vmem:[%s3280_s26 + $0x54] ss:$8 sps:$4 sm:$0xff]   ;;  %v3081_v37 = vld [vmem:[%s3280_s26 + $0x50] ss:$8 sps:$4 sm:$0xff]   ;;  %v3083_v39 = vld [vmem:[%s3280_s26 + $0x64] ss:$8 sps:$4 sm:$0xff]  }
  0x17   : > { %v3079_v36 = vld [vmem:[%s3280_s26 + $0x254] ss:$8 sps:$4 sm:$0xff]   ;;  %v3082_v38 = vld [vmem:[%s3280_s26 + $0x250] ss:$8 sps:$4 sm:$0xff]   ;;  %v3085_v40 = vld [vmem:[%s3280_s26 + $0x264] ss:$8 sps:$4 sm:$0xff]  }
  0x18   : > { %v3087_v41 = vld [vmem:[%s3280_s26 + $0x60] ss:$8 sps:$4 sm:$0xff]   ;;  %v3089_v43 = vld [vmem:[%s3280_s26 + $0x74] ss:$8 sps:$4 sm:$0xff]   ;;  %v3093_v45 = vld [vmem:[%s3280_s26 + $0x70] ss:$8 sps:$4 sm:$0xff]  }
  0x19   : > { %1172 = vmatpush1.bf16.msra.mxu0 %v3040_v4  ;;  %3020 = vmatpush1.bf16.msra.mxu1 %v3040_v4  ;;  %v3088_v42 = vld [vmem:[%s3280_s26 + $0x260] ss:$8 sps:$4 sm:$0xff]   ;;  %v3091_v44 = vld [vmem:[%s3280_s26 + $0x274] ss:$8 sps:$4 sm:$0xff]   ;;  %v3094_v46 = vld [vmem:[%s3280_s26 + $0x270] ss:$8 sps:$4 sm:$0xff]  }
  0x1a   : > { %1173 = vmatprep.subr.bf16.mxu0 %v3232_v1  ;;  %3011 = vmatprep.subr.bf16.mxu1 %v3232_v1  ;;  %v3095_v47 = vld [vmem:[%s3280_s26 + $0x84] ss:$8 sps:$4 sm:$0xff]   ;;  %v3099_v49 = vld [vmem:[%s3280_s26 + $0x80] ss:$8 sps:$4 sm:$0xff]   ;;  %v3101_v51 = vld [vmem:[%s3280_s26 + $0x94] ss:$8 sps:$4 sm:$0xff]  }
  0x1b   : > { %v3097_v48 = vld [vmem:[%s3280_s26 + $0x284] ss:$8 sps:$4 sm:$0xff]   ;;  %v3100_v50 = vld [vmem:[%s3280_s26 + $0x280] ss:$8 sps:$4 sm:$0xff]   ;;  %v3103_v52 = vld [vmem:[%s3280_s26 + $0x294] ss:$8 sps:$4 sm:$0xff]  }
  0x1c   : > { %v3105_v53 = vld [vmem:[%s3280_s26 + $0x90] ss:$8 sps:$4 sm:$0xff]   ;;  %v3107_v55 = vld [vmem:[%s3280_s26 + $0xa4] ss:$8 sps:$4 sm:$0xff]   ;;  %v3111_v57 = vld [vmem:[%s3280_s26 + $0xa0] ss:$8 sps:$4 sm:$0xff]  }
  0x1d   : > { %1174 = vmatpush1.bf16.msra.mxu0 %v3041_v5  ;;  %3021 = vmatpush1.bf16.msra.mxu1 %v3041_v5  ;;  %v3106_v54 = vld [vmem:[%s3280_s26 + $0x290] ss:$8 sps:$4 sm:$0xff]   ;;  %v3109_v56 = vld [vmem:[%s3280_s26 + $0x2a4] ss:$8 sps:$4 sm:$0xff]   ;;  %v3112_v58 = vld [vmem:[%s3280_s26 + $0x2a0] ss:$8 sps:$4 sm:$0xff]  }
  0x1e   : > { %1175 = vmatprep.subr.bf16.mxu0 %v3232_v1  ;;  %3012 = vmatprep.subr.bf16.mxu1 %v3232_v1  ;;  %v3113_v59 = vld [vmem:[%s3280_s26 + $0xb4] ss:$8 sps:$4 sm:$0xff]   ;;  %v3117_v61 = vld [vmem:[%s3280_s26 + $0xb0] ss:$8 sps:$4 sm:$0xff]   ;;  %v3119_v63 = vld [vmem:[%s3280_s26 + $0xc4] ss:$8 sps:$4 sm:$0xff]  }
  0x1f   : > { %v3115_v60 = vld [vmem:[%s3280_s26 + $0x2b4] ss:$8 sps:$4 sm:$0xff]   ;;  %v3118_v62 = vld [vmem:[%s3280_s26 + $0x2b0] ss:$8 sps:$4 sm:$0xff]   ;;  %v3121_v0 = vld [vmem:[%s3280_s26 + $0x2c4] ss:$8 sps:$4 sm:$0xff]  }
  0x20   : > { %v3124_v2 = vld [vmem:[%s3280_s26 + $0x2c0] ss:$8 sps:$4 sm:$0xff]   ;;  %v3125_v3 = vld [vmem:[%s3280_s26 + $0xd4] ss:$8 sps:$4 sm:$0xff]   ;;  %v3129_v5 = vld [vmem:[%s3280_s26 + $0xd0] ss:$8 sps:$4 sm:$0xff]  }
  0x21   : > { %1176 = vmatpush1.bf16.msra.mxu0 %v3042_v8  ;;  %3022 = vmatpush1.bf16.msra.mxu1 %v3042_v8  ;;  %v3127_v4 = vld [vmem:[%s3280_s26 + $0x2d4] ss:$8 sps:$4 sm:$0xff]   ;;  %v3130_v6 = vld [vmem:[%s3280_s26 + $0x2d0] ss:$8 sps:$4 sm:$0xff]   ;;  %v3131_v7 = vld [vmem:[%s3280_s26 + $0xe4] ss:$8 sps:$4 sm:$0xff]  }
  0x22   : > { %1177 = vmatprep.subr.bf16.mxu0 %v3232_v1  ;;  %3013 = vmatprep.subr.bf16.mxu1 %v3232_v1  ;;  %v3133_v8 = vld [vmem:[%s3280_s26 + $0x2e4] ss:$8 sps:$4 sm:$0xff]   ;;  %v3136_v10 = vld [vmem:[%s3280_s26 + $0x2e0] ss:$8 sps:$4 sm:$0xff]   ;;  %v3137_v11 = vld [vmem:[%s3280_s26 + $0xf4] ss:$8 sps:$4 sm:$0xff]  }
  0x23   : > { %v3141_v13 = vld [vmem:[%s3280_s26 + $0xf0] ss:$8 sps:$4 sm:$0xff]  }
  0x24   : > { %v3142_v14 = vld [vmem:[%s3280_s26 + $0x2f0] ss:$8 sps:$4 sm:$0xff]  }
  0x25   : > { %1178 = vmatpush1.bf16.msra.mxu0 %v3043_v9  ;;  %3023 = vmatpush1.bf16.msra.mxu1 %v3043_v9  ;;  %v3135_v9 = vld [vmem:[%s3280_s26 + $0xe0] ss:$8 sps:$4 sm:$0xff]  }
  0x26   : > { %1179 = vmatprep.subr.bf16.mxu0 %v3232_v1  ;;  %3014 = vmatprep.subr.bf16.mxu1 %v3232_v1 }
  0x29   : > { %1180 = vmatpush1.bf16.msra.mxu0 %v3044_v12  ;;  %3024 = vmatpush1.bf16.msra.mxu1 %v3044_v12  ;;  %v3139_v12 = vld [vmem:[%s3280_s26 + $0x2f4] ss:$8 sps:$4 sm:$0xff]  }
  0x2a   : > { %1193 = vmatprep.subr.bf16.mxu0 %v3232_v1  ;;  %3015 = vmatprep.subr.bf16.mxu1 %v3232_v1 }
  0x2d   : > { %1194 = vmatpush2.bf16.msra.mxu0 %v1163_v15  ;;  %3025 = vmatpush2.bf16.msra.mxu1 %v1163_v15  ;;  %v3143_v15 = vld [vmem:[%s3280_s26 + $0x104] ss:$8 sps:$4 sm:$0xff]  }
  0x2e   : > { %1195 = vmatprep.subr.bf16.mxu0 %v3232_v1  ;;  %3016 = vmatprep.subr.bf16.mxu1 %v3232_v1  ;;  %v3123_v1 = vld [vmem:[%s3280_s26 + $0xc0] ss:$8 sps:$4 sm:$0xff]  }
  0x31   : > { %1196 = vmatpush2.bf16.msra.mxu0 %v3046_v16  ;;  %3026 = vmatpush2.bf16.msra.mxu1 %v3046_v16  ;;  %v3145_v16 = vld [vmem:[%s3280_s26 + $0x304] ss:$8 sps:$4 sm:$0xff]  }
  0x34   : > { %1198 = vmatmul.mubr.bf16.vlgmr.msra.gmra.mxu0 %v3047_v17  ;;  %1454 = vmatmul.mubr.bf16.vlgmr.msra.gmra.mxu1 %v3050_v18  ;;  %v3147_v17 = vld [vmem:[%s3280_s26 + $0x100] ss:$8 sps:$4 sm:$0xff]  }
  0x35   : > { %2685 = vmatprep.mubr.msk.bf16.mxu0 %vm965_vm0, %v3053_v19  ;;  %2717 = vmatprep.mubr.msk.bf16.mxu1 %vm965_vm0, %v3055_v20  ;;  %v3148_v18 = vld [vmem:[%s3280_s26 + $0x300] ss:$8 sps:$4 sm:$0xff]   ;;  %v3149_v19 = vld [vmem:[%s3280_s26 + $0x114] ss:$8 sps:$4 sm:$0xff]  }
  0x36   : > { %v3151_v20 = vld [vmem:[%s3280_s26 + $0x314] ss:$8 sps:$4 sm:$0xff]  }
  0x3c   : > { %1206 = vmatmul.mubr.bf16.gmra.mxu0 %v3057_v21  ;;  %1462 = vmatmul.mubr.bf16.gmra.mxu1 %v3058_v22  ;;  %v3153_v21 = vld [vmem:[%s3280_s26 + $0x110] ss:$8 sps:$4 sm:$0xff]  }
  0x3d   : > { %2686 = vmatprep.mubr.msk.bf16.mxu0 %vm965_vm0, %v3059_v23  ;;  %2718 = vmatprep.mubr.msk.bf16.mxu1 %vm965_vm0, %v3061_v24  ;;  %v3154_v22 = vld [vmem:[%s3280_s26 + $0x310] ss:$8 sps:$4 sm:$0xff]   ;;  %v3155_v23 = vld [vmem:[%s3280_s26 + $0x124] ss:$8 sps:$4 sm:$0xff]  }
  0x3e   : > { %v3157_v24 = vld [vmem:[%s3280_s26 + $0x324] ss:$8 sps:$4 sm:$0xff]  }
  0x44   : > { %1214 = vmatmul.mubr.bf16.gmra.mxu0 %v3063_v25  ;;  %1470 = vmatmul.mubr.bf16.gmra.mxu1 %v3064_v26  ;;  %v3159_v25 = vld [vmem:[%s3280_s26 + $0x120] ss:$8 sps:$4 sm:$0xff]  }
  0x45   : > { %2687 = vmatprep.mubr.msk.bf16.mxu0 %vm965_vm0, %v3065_v27  ;;  %2719 = vmatprep.mubr.msk.bf16.mxu1 %vm965_vm0, %v3067_v28  ;;  %v3160_v26 = vld [vmem:[%s3280_s26 + $0x320] ss:$8 sps:$4 sm:$0xff]   ;;  %v3161_v27 = vld [vmem:[%s3280_s26 + $0x134] ss:$8 sps:$4 sm:$0xff]  }
  0x46   : > { %v3163_v28 = vld [vmem:[%s3280_s26 + $0x334] ss:$8 sps:$4 sm:$0xff]  }
  0x4c   : > { %1222 = vmatmul.mubr.bf16.gmra.mxu0 %v3069_v29  ;;  %1478 = vmatmul.mubr.bf16.gmra.mxu1 %v3070_v30  ;;  %v3165_v29 = vld [vmem:[%s3280_s26 + $0x130] ss:$8 sps:$4 sm:$0xff]  }
  0x4d   : > { %2688 = vmatprep.mubr.msk.bf16.mxu0 %vm965_vm0, %v3071_v31  ;;  %2720 = vmatprep.mubr.msk.bf16.mxu1 %vm965_vm0, %v3073_v32  ;;  %v3166_v30 = vld [vmem:[%s3280_s26 + $0x330] ss:$8 sps:$4 sm:$0xff]   ;;  %v3167_v31 = vld [vmem:[%s3280_s26 + $0x144] ss:$8 sps:$4 sm:$0xff]  }
  0x4e   : > { %v3169_v32 = vld [vmem:[%s3280_s26 + $0x344] ss:$8 sps:$4 sm:$0xff]  }
  0x54   : > { %1230 = vmatmul.mubr.bf16.gmra.mxu0 %v3075_v33  ;;  %1486 = vmatmul.mubr.bf16.gmra.mxu1 %v3076_v34  ;;  %v3171_v33 = vld [vmem:[%s3280_s26 + $0x140] ss:$8 sps:$4 sm:$0xff]  }
  0x55   : > { %2689 = vmatprep.mubr.msk.bf16.mxu0 %vm965_vm0, %v3077_v35  ;;  %2721 = vmatprep.mubr.msk.bf16.mxu1 %vm965_vm0, %v3079_v36  ;;  %v3172_v34 = vld [vmem:[%s3280_s26 + $0x340] ss:$8 sps:$4 sm:$0xff]   ;;  %v3173_v35 = vld [vmem:[%s3280_s26 + $0x154] ss:$8 sps:$4 sm:$0xff]  }
  0x56   : > { %v3175_v36 = vld [vmem:[%s3280_s26 + $0x354] ss:$8 sps:$4 sm:$0xff]  }
  0x5c   : > { %1238 = vmatmul.mubr.bf16.gmra.mxu0 %v3081_v37  ;;  %1494 = vmatmul.mubr.bf16.gmra.mxu1 %v3082_v38  ;;  %v3177_v37 = vld [vmem:[%s3280_s26 + $0x150] ss:$8 sps:$4 sm:$0xff]  }
  0x5d   : > { %2690 = vmatprep.mubr.msk.bf16.mxu0 %vm965_vm0, %v3083_v39  ;;  %2722 = vmatprep.mubr.msk.bf16.mxu1 %vm965_vm0, %v3085_v40  ;;  %v3178_v38 = vld [vmem:[%s3280_s26 + $0x350] ss:$8 sps:$4 sm:$0xff]   ;;  %v3179_v39 = vld [vmem:[%s3280_s26 + $0x164] ss:$8 sps:$4 sm:$0xff]  }
  0x5e   : > { %v3181_v40 = vld [vmem:[%s3280_s26 + $0x364] ss:$8 sps:$4 sm:$0xff]  }
  0x64   : > { %1246 = vmatmul.mubr.bf16.gmra.mxu0 %v3087_v41  ;;  %1502 = vmatmul.mubr.bf16.gmra.mxu1 %v3088_v42  ;;  %v3183_v41 = vld [vmem:[%s3280_s26 + $0x160] ss:$8 sps:$4 sm:$0xff]  }
  0x65   : > { %2691 = vmatprep.mubr.msk.bf16.mxu0 %vm965_vm0, %v3089_v43  ;;  %2723 = vmatprep.mubr.msk.bf16.mxu1 %vm965_vm0, %v3091_v44  ;;  %v3184_v42 = vld [vmem:[%s3280_s26 + $0x360] ss:$8 sps:$4 sm:$0xff]   ;;  %v3185_v43 = vld [vmem:[%s3280_s26 + $0x174] ss:$8 sps:$4 sm:$0xff]  }
  0x66   : > { %v3187_v44 = vld [vmem:[%s3280_s26 + $0x374] ss:$8 sps:$4 sm:$0xff]  }
  0x6c   : > { %1254 = vmatmul.mubr.bf16.gmra.mxu0 %v3093_v45  ;;  %1510 = vmatmul.mubr.bf16.gmra.mxu1 %v3094_v46  ;;  %v3189_v45 = vld [vmem:[%s3280_s26 + $0x170] ss:$8 sps:$4 sm:$0xff]  }
  0x6d   : > { %2692 = vmatprep.mubr.msk.bf16.mxu0 %vm965_vm0, %v3095_v47  ;;  %2724 = vmatprep.mubr.msk.bf16.mxu1 %vm965_vm0, %v3097_v48  ;;  %v3190_v46 = vld [vmem:[%s3280_s26 + $0x370] ss:$8 sps:$4 sm:$0xff]   ;;  %v3191_v47 = vld [vmem:[%s3280_s26 + $0x184] ss:$8 sps:$4 sm:$0xff]  }
  0x6e   : > { %v3193_v48 = vld [vmem:[%s3280_s26 + $0x384] ss:$8 sps:$4 sm:$0xff]  }
  0x74   : > { %1262 = vmatmul.mubr.bf16.gmra.mxu0 %v3099_v49  ;;  %1518 = vmatmul.mubr.bf16.gmra.mxu1 %v3100_v50  ;;  %v226_v49 = vld [vmem:[%s3280_s26 + $0x180] sm:$0xff]  ;;  %v227_v50 = vld [vmem:[%s3280_s26 + $0x188] sm:$0xff] }
  0x75   : > { %2693 = vmatprep.mubr.msk.bf16.mxu0 %vm965_vm0, %v3101_v51  ;;  %2725 = vmatprep.mubr.msk.bf16.mxu1 %vm965_vm0, %v3103_v52  ;;  %v290_v51 = vld [vmem:[%s3280_s26 + $0x380] sm:$0xff]  ;;  %v291_v52 = vld [vmem:[%s3280_s26 + $0x388] sm:$0xff] }
  0x7c   : > { %1270 = vmatmul.mubr.bf16.gmra.mxu0 %v3105_v53  ;;  %1526 = vmatmul.mubr.bf16.gmra.mxu1 %v3106_v54  ;;  %v2594_v53 = vcombine.low %v226_v49, %v227_v50  ;;  %v2658_v54 = vcombine.low %v290_v51, %v291_v52  ;;  %v232_v50 = vld [vmem:[%s3280_s26 + $0x1b0] sm:$0xff] }
  0x7d   : > { %2694 = vmatprep.mubr.msk.bf16.mxu0 %vm965_vm0, %v3107_v55  ;;  %2726 = vmatprep.mubr.msk.bf16.mxu1 %vm965_vm0, %v3109_v56  ;;  %v3195_v55 = vld [vmem:[%s3280_s26 + $0x194] ss:$8 sps:$4 sm:$0xff]  }
  0x7e   : > { %v3197_v56 = vld [vmem:[%s3280_s26 + $0x394] ss:$8 sps:$4 sm:$0xff]  }
  0x84   : > { %1278 = vmatmul.mubr.bf16.gmra.mxu0 %v3111_v57  ;;  %1534 = vmatmul.mubr.bf16.gmra.mxu1 %v3112_v58  ;;  %v3457_v57 = vld [vmem:[%s3913_s2] ss:$0 sm:$0xff] }
  0x85   : > { %2695 = vmatprep.mubr.msk.bf16.mxu0 %vm965_vm0, %v3113_v59  ;;  %2727 = vmatprep.mubr.msk.bf16.mxu1 %vm965_vm0, %v3115_v60  ;;  %v228_v60 = vld [vmem:[%s3280_s26 + $0x190] sm:$0xff] }
  0x8c   : > { %1286 = vmatmul.mubr.bf16.gmra.mxu0 %v3117_v61  ;;  %1542 = vmatmul.mubr.bf16.gmra.mxu1 %v3118_v62 }
  0x8d   : > { %2696 = vmatprep.mubr.msk.bf16.mxu0 %vm965_vm0, %v3119_v63  ;;  %2728 = vmatprep.mubr.msk.bf16.mxu1 %vm965_vm0, %v3121_v0  ;;  %v229_v63 = vld [vmem:[%s3280_s26 + $0x198] sm:$0xff]  ;;  %v292_v0 = vld [vmem:[%s3280_s26 + $0x390] sm:$0xff] }
  0x94   : > { %1294 = vmatmul.mubr.bf16.gmra.mxu0 %v3123_v1  ;;  %1550 = vmatmul.mubr.bf16.gmra.mxu1 %v3124_v2  ;;  %v293_v1 = vld [vmem:[%s3280_s26 + $0x398] sm:$0xff] }
  0x95   : > { %2697 = vmatprep.mubr.msk.bf16.mxu0 %vm965_vm0, %v3125_v3  ;;  %2729 = vmatprep.mubr.msk.bf16.mxu1 %vm965_vm0, %v3127_v4 }
  0x9c   : > { %1302 = vmatmul.mubr.bf16.gmra.mxu0 %v3129_v5  ;;  %1558 = vmatmul.mubr.bf16.gmra.mxu1 %v3130_v6 }
  0x9d   : > { %2698 = vmatprep.mubr.msk.bf16.mxu0 %vm965_vm0, %v3131_v7  ;;  %2730 = vmatprep.mubr.msk.bf16.mxu1 %vm965_vm0, %v3133_v8  ;;  %v2596_v8 = vcombine.low %v228_v60, %v229_v63 }
  0xa4   : > { %1310 = vmatmul.mubr.bf16.gmra.mxu0 %v3135_v9  ;;  %1566 = vmatmul.mubr.bf16.gmra.mxu1 %v3136_v10  ;;  %v2660_v9 = vcombine.low %v292_v0, %v293_v1 }
  0xa5   : > { %2699 = vmatprep.mubr.msk.bf16.mxu0 %vm965_vm0, %v3137_v11  ;;  %2731 = vmatprep.mubr.msk.bf16.mxu1 %vm965_vm0, %v3139_v12 }
  0xac   : > { %1318 = vmatmul.mubr.bf16.gmra.mxu0 %v3141_v13  ;;  %1574 = vmatmul.mubr.bf16.gmra.mxu1 %v3142_v14  ;;  %v3199_v14 = vld [vmem:[%s3280_s26 + $0x1a4] ss:$8 sps:$4 sm:$0xff]  }
  0xad   : > { %2700 = vmatprep.mubr.msk.bf16.mxu0 %vm965_vm0, %v3143_v15  ;;  %2732 = vmatprep.mubr.msk.bf16.mxu1 %vm965_vm0, %v3145_v16 }
  0xb4   : > { %1326 = vmatmul.mubr.bf16.gmra.mxu0 %v3147_v17  ;;  %1582 = vmatmul.mubr.bf16.gmra.mxu1 %v3148_v18  ;;  %v3201_v17 = vld [vmem:[%s3280_s26 + $0x3a4] ss:$8 sps:$4 sm:$0xff]  }
  0xb5   : > { %2701 = vmatprep.mubr.msk.bf16.mxu0 %vm965_vm0, %v3149_v19  ;;  %2733 = vmatprep.mubr.msk.bf16.mxu1 %vm965_vm0, %v3151_v20 }
  0xbc   : > { %1334 = vmatmul.mubr.bf16.gmra.mxu0 %v3153_v21  ;;  %1590 = vmatmul.mubr.bf16.gmra.mxu1 %v3154_v22  ;;  %v230_v22 = vld [vmem:[%s3280_s26 + $0x1a0] sm:$0xff] }
  0xbd   : > { %2702 = vmatprep.mubr.msk.bf16.mxu0 %vm965_vm0, %v3155_v23  ;;  %2734 = vmatprep.mubr.msk.bf16.mxu1 %vm965_vm0, %v3157_v24 }
  0xc4   : > { %1342 = vmatmul.mubr.bf16.gmra.mxu0 %v3159_v25  ;;  %1598 = vmatmul.mubr.bf16.gmra.mxu1 %v3160_v26 }
  0xc5   : > { %2703 = vmatprep.mubr.msk.bf16.mxu0 %vm965_vm0, %v3161_v27  ;;  %2735 = vmatprep.mubr.msk.bf16.mxu1 %vm965_vm0, %v3163_v28  ;;  %v231_v27 = vld [vmem:[%s3280_s26 + $0x1a8] sm:$0xff]  ;;  %v294_v28 = vld [vmem:[%s3280_s26 + $0x3a0] sm:$0xff] }
  0xcc   : > { %1350 = vmatmul.mubr.bf16.gmra.mxu0 %v3165_v29  ;;  %1606 = vmatmul.mubr.bf16.gmra.mxu1 %v3166_v30  ;;  %v295_v29 = vld [vmem:[%s3280_s26 + $0x3a8] sm:$0xff] }
  0xcd   : > { %2704 = vmatprep.mubr.msk.bf16.mxu0 %vm965_vm0, %v3167_v31  ;;  %2736 = vmatprep.mubr.msk.bf16.mxu1 %vm965_vm0, %v3169_v32 }
  0xd4   : > { %1358 = vmatmul.mubr.bf16.gmra.mxu0 %v3171_v33  ;;  %1614 = vmatmul.mubr.bf16.gmra.mxu1 %v3172_v34 }
  0xd5   : > { %2705 = vmatprep.mubr.msk.bf16.mxu0 %vm965_vm0, %v3173_v35  ;;  %2737 = vmatprep.mubr.msk.bf16.mxu1 %vm965_vm0, %v3175_v36  ;;  %v2598_v36 = vcombine.low %v230_v22, %v231_v27  ;;  %v299_v22 = vld [vmem:[%s3280_s26 + $0x3c8] sm:$0xff] }
  0xdc   : > { %1366 = vmatmul.mubr.bf16.gmra.mxu0 %v3177_v37  ;;  %1622 = vmatmul.mubr.bf16.gmra.mxu1 %v3178_v38  ;;  %v2662_v37 = vcombine.low %v294_v28, %v295_v29 }
  0xdd   : > { %2706 = vmatprep.mubr.msk.bf16.mxu0 %vm965_vm0, %v3179_v39  ;;  %2738 = vmatprep.mubr.msk.bf16.mxu1 %vm965_vm0, %v3181_v40 }
  0xe4   : > { %1374 = vmatmul.mubr.bf16.gmra.mxu0 %v3183_v41  ;;  %1630 = vmatmul.mubr.bf16.gmra.mxu1 %v3184_v42  ;;  %v3203_v42 = vld [vmem:[%s3280_s26 + $0x1b4] ss:$8 sps:$4 sm:$0xff]  }
  0xe5   : > { %2707 = vmatprep.mubr.msk.bf16.mxu0 %vm965_vm0, %v3185_v43  ;;  %2739 = vmatprep.mubr.msk.bf16.mxu1 %vm965_vm0, %v3187_v44 }
  0xec   : > { %1382 = vmatmul.mubr.bf16.gmra.mxu0 %v3189_v45  ;;  %1638 = vmatmul.mubr.bf16.gmra.mxu1 %v3190_v46  ;;  %v3205_v45 = vld [vmem:[%s3280_s26 + $0x3b4] ss:$8 sps:$4 sm:$0xff]  }
  0xed   : > { %2708 = vmatprep.mubr.msk.bf16.mxu0 %vm965_vm0, %v3191_v47  ;;  %2740 = vmatprep.mubr.msk.bf16.mxu1 %vm965_vm0, %v3193_v48 }
  0xf4   : > { %v1199_v58 = vpop.f32.mrf.mxu0  ;;  %1390 = vmatmul.mubr.bf16.gmra.mxu0 %v2594_v53  ;;  %v1455_v59 = vpop.f32.mrf.mxu1  ;;  %1646 = vmatmul.mubr.bf16.gmra.mxu1 %v2658_v54 }
  0xf5   : > { %v1200_v61 = vadd.f32 %v3457_v57, %v1199_v58  ;;  %v1456_v62 = vadd.f32 %v3457_v57, %v1455_v59  ;;  %2709 = vmatprep.mubr.msk.bf16.mxu0 %vm965_vm0, %v3195_v55  ;;  %2741 = vmatprep.mubr.msk.bf16.mxu1 %vm965_vm0, %v3197_v56  ;;  %v233_v55 = vld [vmem:[%s3280_s26 + $0x1b8] sm:$0xff]  ;;  %v296_v56 = vld [vmem:[%s3280_s26 + $0x3b0] sm:$0xff] }
  0xf6   : > { %v1201_v2 = vpop.f32.mrf.mxu0  ;;  %v1457_v3 = vpop.f32.mrf.mxu1  ;;  %v297_v58 = vld [vmem:[%s3280_s26 + $0x3b8] sm:$0xff]  ;;  %v2600_v1 = vcombine.low %v232_v50, %v233_v55 }
  0xf7   : > { %v1710_v4 = vmax.f32 %v1200_v61, 0.0  ;;  %v1774_v5 = vmax.f32 %v1456_v62, 0.0  ;;  %v2664_v2 = vcombine.low %v296_v56, %v297_v58  ;;  %v301_v50 = vld [vmem:[%s3280_s26 + $0x3d8] sm:$0xff] }
  0xf8   : > { %v1202_v6 = vpop.f32.mrf.mxu0  ;;  %v1458_v7 = vpop.f32.mrf.mxu1 }
  0xf9   : > { %v2879_v10 = vpack.c.bf16 %v1710_v4, %v1710_v4  ;;  %v2943_v11 = vpack.c.bf16 %v1774_v5, %v1774_v5  ;;  %v1203_v12 = vadd.f32 %v3457_v57, %v1202_v6  ;;  %v1459_v13 = vadd.f32 %v3457_v57, %v1458_v7  ;;  %v3207_v7 = vld [vmem:[%s3280_s26 + $0x1c4] ss:$8 sps:$4 sm:$0xff]  }
  0xfa   : > { %v1204_v15 = vpop.f32.mrf.mxu0  ;;  %v1460_v16 = vpop.f32.mrf.mxu1 }
  0xfb   : > { %2351 = vst.msk [vmem:[%s3471_s18] sm:$0xf] %vm2350_vm3, %v2879_v10  ;;  %2415 = vst.msk [vmem:[%s3471_s18 + $0x100] sm:$0xf] %vm2350_vm3, %v2943_v11  ;;  %v1711_v18 = vmax.f32 %v1203_v12, 0.0  ;;  %v1775_v19 = vmax.f32 %v1459_v13, 0.0 }
  0xfc   : > { %v1207_v20 = vpop.f32.mrf.mxu0  ;;  %1398 = vmatmul.mubr.bf16.gmra.mxu0 %v2596_v8  ;;  %v1463_v21 = vpop.f32.mrf.mxu1  ;;  %1654 = vmatmul.mubr.bf16.gmra.mxu1 %v2660_v9  ;;  %v3209_v10 = vld [vmem:[%s3280_s26 + $0x3c4] ss:$8 sps:$4 sm:$0xff]  }
  0xfd   : > { %v2880_v23 = vpack.c.bf16 %v1711_v18, %v1711_v18  ;;  %v2944_v24 = vpack.c.bf16 %v1775_v19, %v1775_v19  ;;  %v1208_v25 = vadd.f32 %v3457_v57, %v1207_v20  ;;  %v1464_v26 = vadd.f32 %v3457_v57, %v1463_v21  ;;  %2710 = vmatprep.mubr.msk.bf16.mxu0 %vm965_vm0, %v3199_v14  ;;  %v234_v15 = vld [vmem:[%s3280_s26 + $0x1c0] sm:$0xff]  ;;  %v235_v20 = vld [vmem:[%s3280_s26 + $0x1c8] sm:$0xff] }
  0xfe   : > { %v1209_v30 = vpop.f32.mrf.mxu0  ;;  %v1465_v31 = vpop.f32.mrf.mxu1  ;;  %2742 = vmatprep.mubr.msk.bf16.mxu1 %vm965_vm0, %v3201_v17  ;;  %v298_v21 = vld [vmem:[%s3280_s26 + $0x3c0] sm:$0xff]  ;;  %v2602_v29 = vcombine.low %v234_v15, %v235_v20  ;;  %v303_v15 = vld [vmem:[%s3280_s26 + $0x3e8] sm:$0xff] }
  0xff   : > { %2352 = vst.msk [vmem:[%s3471_s18 + $0x4] sm:$0xf] %vm2350_vm3, %v2880_v23  ;;  %2416 = vst.msk [vmem:[%s3471_s18 + $0x104] sm:$0xf] %vm2350_vm3, %v2944_v24  ;;  %v1712_v32 = vmax.f32 %v1208_v25, 0.0  ;;  %v1776_v33 = vmax.f32 %v1464_v26, 0.0  ;;  %v2666_v30 = vcombine.low %v298_v21, %v299_v22 }
 0x100   : > { %v1210_v34 = vpop.f32.mrf.mxu0  ;;  %v1466_v35 = vpop.f32.mrf.mxu1 }
 0x101   : > { %v2881_v38 = vpack.c.bf16 %v1712_v32, %v1712_v32  ;;  %v2945_v39 = vpack.c.bf16 %v1776_v33, %v1776_v33  ;;  %v1211_v40 = vadd.f32 %v3457_v57, %v1210_v34  ;;  %v1467_v41 = vadd.f32 %v3457_v57, %v1466_v35  ;;  %v3211_v35 = vld [vmem:[%s3280_s26 + $0x1d4] ss:$8 sps:$4 sm:$0xff]  }
 0x102   : > { %v1212_v43 = vpop.f32.mrf.mxu0  ;;  %v1468_v44 = vpop.f32.mrf.mxu1 }
 0x103   : > { %2353 = vst.msk [vmem:[%s3471_s18 + $0x8] sm:$0xf] %vm2350_vm3, %v2881_v38  ;;  %2417 = vst.msk [vmem:[%s3471_s18 + $0x108] sm:$0xf] %vm2350_vm3, %v2945_v39  ;;  %v1713_v46 = vmax.f32 %v1211_v40, 0.0  ;;  %v1777_v47 = vmax.f32 %v1467_v41, 0.0 }
 0x104   : > { %v1215_v48 = vpop.f32.mrf.mxu0  ;;  %1406 = vmatmul.mubr.bf16.gmra.mxu0 %v2598_v36  ;;  %v1471_v49 = vpop.f32.mrf.mxu1  ;;  %1662 = vmatmul.mubr.bf16.gmra.mxu1 %v2662_v37  ;;  %v3213_v38 = vld [vmem:[%s3280_s26 + $0x3d4] ss:$8 sps:$4 sm:$0xff]  }
 0x105   : > { %v2882_v51 = vpack.c.bf16 %v1713_v46, %v1713_v46  ;;  %v2946_v52 = vpack.c.bf16 %v1777_v47, %v1777_v47  ;;  %v1216_v53 = vadd.f32 %v3457_v57, %v1215_v48  ;;  %v1472_v54 = vadd.f32 %v3457_v57, %v1471_v49  ;;  %2711 = vmatprep.mubr.msk.bf16.mxu0 %vm965_vm0, %v3203_v42  ;;  %v236_v43 = vld [vmem:[%s3280_s26 + $0x1d0] sm:$0xff]  ;;  %v237_v48 = vld [vmem:[%s3280_s26 + $0x1d8] sm:$0xff] }
 0x106   : > { %v1217_v59 = vpop.f32.mrf.mxu0  ;;  %v1473_v60 = vpop.f32.mrf.mxu1  ;;  %2743 = vmatprep.mubr.msk.bf16.mxu1 %vm965_vm0, %v3205_v45  ;;  %v300_v49 = vld [vmem:[%s3280_s26 + $0x3d0] sm:$0xff]  ;;  %v2604_v58 = vcombine.low %v236_v43, %v237_v48  ;;  %v305_v43 = vld [vmem:[%s3280_s26 + $0x3f8] sm:$0xff] }
 0x107   : > { %2354 = vst.msk [vmem:[%s3471_s18 + $0xc] sm:$0xf] %vm2350_vm3, %v2882_v51  ;;  %2418 = vst.msk [vmem:[%s3471_s18 + $0x10c] sm:$0xf] %vm2350_vm3, %v2946_v52  ;;  %v1714_v61 = vmax.f32 %v1216_v53, 0.0  ;;  %v1778_v62 = vmax.f32 %v1472_v54, 0.0  ;;  %v2668_v59 = vcombine.low %v300_v49, %v301_v50 }
 0x108   : > { %v1218_v63 = vpop.f32.mrf.mxu0  ;;  %v1474_v0 = vpop.f32.mrf.mxu1 }
 0x109   : > { %v2883_v3 = vpack.c.bf16 %v1714_v61, %v1714_v61  ;;  %v2947_v4 = vpack.c.bf16 %v1778_v62, %v1778_v62  ;;  %v1219_v5 = vadd.f32 %v3457_v57, %v1218_v63  ;;  %v1475_v6 = vadd.f32 %v3457_v57, %v1474_v0  ;;  %v3215_v0 = vld [vmem:[%s3280_s26 + $0x1e4] ss:$8 sps:$4 sm:$0xff]  }
 0x10a   : > { %v1220_v8 = vpop.f32.mrf.mxu0  ;;  %v1476_v9 = vpop.f32.mrf.mxu1 }
 0x10b   : > { %2355 = vst.msk [vmem:[%s3471_s18 + $0x10] sm:$0xf] %vm2350_vm3, %v2883_v3  ;;  %2419 = vst.msk [vmem:[%s3471_s18 + $0x110] sm:$0xf] %vm2350_vm3, %v2947_v4  ;;  %v1715_v11 = vmax.f32 %v1219_v5, 0.0  ;;  %v1779_v12 = vmax.f32 %v1475_v6, 0.0 }
 0x10c   : > { %v1223_v13 = vpop.f32.mrf.mxu0  ;;  %1414 = vmatmul.mubr.bf16.gmra.mxu0 %v2600_v1  ;;  %v1479_v14 = vpop.f32.mrf.mxu1  ;;  %1670 = vmatmul.mubr.bf16.gmra.mxu1 %v2664_v2  ;;  %v3217_v3 = vld [vmem:[%s3280_s26 + $0x3e4] ss:$8 sps:$4 sm:$0xff]  }
 0x10d   : > { %v2884_v16 = vpack.c.bf16 %v1715_v11, %v1715_v11  ;;  %v2948_v17 = vpack.c.bf16 %v1779_v12, %v1779_v12  ;;  %v1224_v18 = vadd.f32 %v3457_v57, %v1223_v13  ;;  %v1480_v19 = vadd.f32 %v3457_v57, %v1479_v14  ;;  %2712 = vmatprep.mubr.msk.bf16.mxu0 %vm965_vm0, %v3207_v7  ;;  %v238_v8 = vld [vmem:[%s3280_s26 + $0x1e0] sm:$0xff]  ;;  %v239_v13 = vld [vmem:[%s3280_s26 + $0x1e8] sm:$0xff] }
 0x10e   : > { %v1225_v23 = vpop.f32.mrf.mxu0  ;;  %v1481_v24 = vpop.f32.mrf.mxu1  ;;  %2744 = vmatprep.mubr.msk.bf16.mxu1 %vm965_vm0, %v3209_v10  ;;  %v302_v14 = vld [vmem:[%s3280_s26 + $0x3e0] sm:$0xff]  ;;  %v2606_v22 = vcombine.low %v238_v8, %v239_v13 }
 0x10f   : > { %2356 = vst.msk [vmem:[%s3471_s18 + $0x14] sm:$0xf] %vm2350_vm3, %v2884_v16  ;;  %2420 = vst.msk [vmem:[%s3471_s18 + $0x114] sm:$0xf] %vm2350_vm3, %v2948_v17  ;;  %v1716_v25 = vmax.f32 %v1224_v18, 0.0  ;;  %v1780_v26 = vmax.f32 %v1480_v19, 0.0  ;;  %v2670_v23 = vcombine.low %v302_v14, %v303_v15 }
 0x110   : > { %v1226_v27 = vpop.f32.mrf.mxu0  ;;  %v1482_v28 = vpop.f32.mrf.mxu1 }
 0x111   : > { %v2885_v31 = vpack.c.bf16 %v1716_v25, %v1716_v25  ;;  %v2949_v32 = vpack.c.bf16 %v1780_v26, %v1780_v26  ;;  %v1227_v33 = vadd.f32 %v3457_v57, %v1226_v27  ;;  %v1483_v34 = vadd.f32 %v3457_v57, %v1482_v28  ;;  %v3219_v28 = vld [vmem:[%s3280_s26 + $0x1f4] ss:$8 sps:$4 sm:$0xff]  }
 0x112   : > { %v1228_v36 = vpop.f32.mrf.mxu0  ;;  %v1484_v37 = vpop.f32.mrf.mxu1 }
 0x113   : > { %2357 = vst.msk [vmem:[%s3471_s18 + $0x18] sm:$0xf] %vm2350_vm3, %v2885_v31  ;;  %2421 = vst.msk [vmem:[%s3471_s18 + $0x118] sm:$0xf] %vm2350_vm3, %v2949_v32  ;;  %v1717_v39 = vmax.f32 %v1227_v33, 0.0  ;;  %v1781_v40 = vmax.f32 %v1483_v34, 0.0 }
 0x114   : > { %v1231_v41 = vpop.f32.mrf.mxu0  ;;  %1422 = vmatmul.mubr.bf16.gmra.mxu0 %v2602_v29  ;;  %v1487_v42 = vpop.f32.mrf.mxu1  ;;  %1678 = vmatmul.mubr.bf16.gmra.mxu1 %v2666_v30  ;;  %v3221_v31 = vld [vmem:[%s3280_s26 + $0x3f4] ss:$8 sps:$4 sm:$0xff]  }
 0x115   : > { %v2886_v44 = vpack.c.bf16 %v1717_v39, %v1717_v39  ;;  %v2950_v45 = vpack.c.bf16 %v1781_v40, %v1781_v40  ;;  %v1232_v46 = vadd.f32 %v3457_v57, %v1231_v41  ;;  %v1488_v47 = vadd.f32 %v3457_v57, %v1487_v42  ;;  %2713 = vmatprep.mubr.msk.bf16.mxu0 %vm965_vm0, %v3211_v35  ;;  %v240_v36 = vld [vmem:[%s3280_s26 + $0x1f0] sm:$0xff]  ;;  %v241_v41 = vld [vmem:[%s3280_s26 + $0x1f8] sm:$0xff] }
 0x116   : > { %v1233_v51 = vpop.f32.mrf.mxu0  ;;  %v1489_v52 = vpop.f32.mrf.mxu1  ;;  %2745 = vmatprep.mubr.msk.bf16.mxu1 %vm965_vm0, %v3213_v38  ;;  %v304_v42 = vld [vmem:[%s3280_s26 + $0x3f0] sm:$0xff]  ;;  %v2608_v50 = vcombine.low %v240_v36, %v241_v41 }
 0x117   : > { %2358 = vst.msk [vmem:[%s3471_s18 + $0x1c] sm:$0xf] %vm2350_vm3, %v2886_v44  ;;  %2422 = vst.msk [vmem:[%s3471_s18 + $0x11c] sm:$0xf] %vm2350_vm3, %v2950_v45  ;;  %v1718_v53 = vmax.f32 %v1232_v46, 0.0  ;;  %v1782_v54 = vmax.f32 %v1488_v47, 0.0  ;;  %v2672_v51 = vcombine.low %v304_v42, %v305_v43 }
 0x118   : > { %v1234_v55 = vpop.f32.mrf.mxu0  ;;  %v1490_v56 = vpop.f32.mrf.mxu1 }
 0x119   : > { %v2887_v60 = vpack.c.bf16 %v1718_v53, %v1718_v53  ;;  %v2951_v61 = vpack.c.bf16 %v1782_v54, %v1782_v54  ;;  %v1235_v62 = vadd.f32 %v3457_v57, %v1234_v55  ;;  %v1491_v63 = vadd.f32 %v3457_v57, %v1490_v56 }
 0x11a   : > { %v1236_v1 = vpop.f32.mrf.mxu0  ;;  %v1492_v2 = vpop.f32.mrf.mxu1 }
 0x11b   : > { %2359 = vst.msk [vmem:[%s3471_s18 + $0x20] sm:$0xf] %vm2350_vm3, %v2887_v60  ;;  %2423 = vst.msk [vmem:[%s3471_s18 + $0x120] sm:$0xf] %vm2350_vm3, %v2951_v61  ;;  %v1719_v4 = vmax.f32 %v1235_v62, 0.0  ;;  %v1783_v5 = vmax.f32 %v1491_v63, 0.0 }
 0x11c   : > { %v1239_v6 = vpop.f32.mrf.mxu0  ;;  %1430 = vmatmul.mubr.bf16.gmra.mxu0 %v2604_v58  ;;  %v1495_v7 = vpop.f32.mrf.mxu1  ;;  %1686 = vmatmul.mubr.bf16.gmra.mxu1 %v2668_v59 }
 0x11d   : > { %v2888_v9 = vpack.c.bf16 %v1719_v4, %v1719_v4  ;;  %v2952_v10 = vpack.c.bf16 %v1783_v5, %v1783_v5  ;;  %v1240_v11 = vadd.f32 %v3457_v57, %v1239_v6  ;;  %v1496_v12 = vadd.f32 %v3457_v57, %v1495_v7  ;;  %2714 = vmatprep.mubr.msk.bf16.mxu0 %vm965_vm0, %v3215_v0 }
 0x11e   : > { %v1241_v16 = vpop.f32.mrf.mxu0  ;;  %v1497_v17 = vpop.f32.mrf.mxu1  ;;  %2746 = vmatprep.mubr.msk.bf16.mxu1 %vm965_vm0, %v3217_v3 }
 0x11f   : > { %2360 = vst.msk [vmem:[%s3471_s18 + $0x24] sm:$0xf] %vm2350_vm3, %v2888_v9  ;;  %2424 = vst.msk [vmem:[%s3471_s18 + $0x124] sm:$0xf] %vm2350_vm3, %v2952_v10  ;;  %v1720_v18 = vmax.f32 %v1240_v11, 0.0  ;;  %v1784_v19 = vmax.f32 %v1496_v12, 0.0 }
 0x120   : > { %v1242_v20 = vpop.f32.mrf.mxu0  ;;  %v1498_v21 = vpop.f32.mrf.mxu1 }
 0x121   : > { %v2889_v24 = vpack.c.bf16 %v1720_v18, %v1720_v18  ;;  %v2953_v25 = vpack.c.bf16 %v1784_v19, %v1784_v19  ;;  %v1243_v26 = vadd.f32 %v3457_v57, %v1242_v20  ;;  %v1499_v27 = vadd.f32 %v3457_v57, %v1498_v21 }
 0x122   : > { %v1244_v29 = vpop.f32.mrf.mxu0  ;;  %v1500_v30 = vpop.f32.mrf.mxu1 }
 0x123   : > { %2361 = vst.msk [vmem:[%s3471_s18 + $0x28] sm:$0xf] %vm2350_vm3, %v2889_v24  ;;  %2425 = vst.msk [vmem:[%s3471_s18 + $0x128] sm:$0xf] %vm2350_vm3, %v2953_v25  ;;  %v1721_v32 = vmax.f32 %v1243_v26, 0.0  ;;  %v1785_v33 = vmax.f32 %v1499_v27, 0.0 }
 0x124   : > { %v1247_v34 = vpop.f32.mrf.mxu0  ;;  %1438 = vmatmul.mubr.bf16.gmra.mxu0 %v2606_v22  ;;  %v1503_v35 = vpop.f32.mrf.mxu1  ;;  %1694 = vmatmul.mubr.bf16.gmra.mxu1 %v2670_v23 }
 0x125   : > { %v2890_v37 = vpack.c.bf16 %v1721_v32, %v1721_v32  ;;  %v2954_v38 = vpack.c.bf16 %v1785_v33, %v1785_v33  ;;  %v1248_v39 = vadd.f32 %v3457_v57, %v1247_v34  ;;  %v1504_v40 = vadd.f32 %v3457_v57, %v1503_v35  ;;  %2715 = vmatprep.mubr.msk.bf16.mxu0 %vm965_vm0, %v3219_v28 }
 0x126   : > { %v1249_v44 = vpop.f32.mrf.mxu0  ;;  %v1505_v45 = vpop.f32.mrf.mxu1  ;;  %2747 = vmatprep.mubr.msk.bf16.mxu1 %vm965_vm0, %v3221_v31 }
 0x127   : > { %2362 = vst.msk [vmem:[%s3471_s18 + $0x2c] sm:$0xf] %vm2350_vm3, %v2890_v37  ;;  %2426 = vst.msk [vmem:[%s3471_s18 + $0x12c] sm:$0xf] %vm2350_vm3, %v2954_v38  ;;  %v1722_v46 = vmax.f32 %v1248_v39, 0.0  ;;  %v1786_v47 = vmax.f32 %v1504_v40, 0.0 }
 0x128   : > { %v1250_v48 = vpop.f32.mrf.mxu0  ;;  %v1506_v49 = vpop.f32.mrf.mxu1 }
 0x129   : > { %v2891_v52 = vpack.c.bf16 %v1722_v46, %v1722_v46  ;;  %v2955_v53 = vpack.c.bf16 %v1786_v47, %v1786_v47  ;;  %v1251_v54 = vadd.f32 %v3457_v57, %v1250_v48  ;;  %v1507_v55 = vadd.f32 %v3457_v57, %v1506_v49 }
 0x12a   : > { %v1252_v56 = vpop.f32.mrf.mxu0  ;;  %v1508_v58 = vpop.f32.mrf.mxu1 }
 0x12b   : > { %2363 = vst.msk [vmem:[%s3471_s18 + $0x30] sm:$0xf] %vm2350_vm3, %v2891_v52  ;;  %2427 = vst.msk [vmem:[%s3471_s18 + $0x130] sm:$0xf] %vm2350_vm3, %v2955_v53  ;;  %v1723_v59 = vmax.f32 %v1251_v54, 0.0  ;;  %v1787_v60 = vmax.f32 %v1507_v55, 0.0 }
 0x12c   : > { %v1255_v61 = vpop.f32.mrf.mxu0  ;;  %1446 = vmatmul.mubr.bf16.gmra.mxu0 %v2608_v50  ;;  %v1511_v62 = vpop.f32.mrf.mxu1  ;;  %1702 = vmatmul.mubr.bf16.gmra.mxu1 %v2672_v51 }
 0x12d   : > { %v2892_v63 = vpack.c.bf16 %v1723_v59, %v1723_v59  ;;  %v2956_v0 = vpack.c.bf16 %v1787_v60, %v1787_v60  ;;  %v1256_v1 = vadd.f32 %v3457_v57, %v1255_v61  ;;  %v1512_v2 = vadd.f32 %v3457_v57, %v1511_v62 }
 0x12e   : > { %v1257_v3 = vpop.f32.mrf.mxu0  ;;  %v1513_v4 = vpop.f32.mrf.mxu1 }
 0x12f   : > { %2364 = vst.msk [vmem:[%s3471_s18 + $0x34] sm:$0xf] %vm2350_vm3, %v2892_v63  ;;  %2428 = vst.msk [vmem:[%s3471_s18 + $0x134] sm:$0xf] %vm2350_vm3, %v2956_v0  ;;  %v1724_v5 = vmax.f32 %v1256_v1, 0.0  ;;  %v1788_v6 = vmax.f32 %v1512_v2, 0.0 }
 0x130   : > { %v1258_v7 = vpop.f32.mrf.mxu0  ;;  %v1514_v8 = vpop.f32.mrf.mxu1 }
 0x131   : > { %v2893_v9 = vpack.c.bf16 %v1724_v5, %v1724_v5  ;;  %v2957_v10 = vpack.c.bf16 %v1788_v6, %v1788_v6  ;;  %v1259_v11 = vadd.f32 %v3457_v57, %v1258_v7  ;;  %v1515_v12 = vadd.f32 %v3457_v57, %v1514_v8 }
 0x132   : > { %v1260_v13 = vpop.f32.mrf.mxu0  ;;  %v1516_v14 = vpop.f32.mrf.mxu1 }
 0x133   : > { %2365 = vst.msk [vmem:[%s3471_s18 + $0x38] sm:$0xf] %vm2350_vm3, %v2893_v9  ;;  %2429 = vst.msk [vmem:[%s3471_s18 + $0x138] sm:$0xf] %vm2350_vm3, %v2957_v10  ;;  %v1725_v15 = vmax.f32 %v1259_v11, 0.0  ;;  %v1789_v16 = vmax.f32 %v1515_v12, 0.0 }
 0x134   : > { %v1263_v17 = vpop.f32.mrf.mxu0  ;;  %v1519_v18 = vpop.f32.mrf.mxu1 }
 0x135   : > { %v2894_v19 = vpack.c.bf16 %v1725_v15, %v1725_v15  ;;  %v2958_v20 = vpack.c.bf16 %v1789_v16, %v1789_v16  ;;  %v1264_v21 = vadd.f32 %v3457_v57, %v1263_v17  ;;  %v1520_v22 = vadd.f32 %v3457_v57, %v1519_v18 }
 0x136   : > { %v1265_v23 = vpop.f32.mrf.mxu0  ;;  %v1521_v24 = vpop.f32.mrf.mxu1 }
 0x137   : > { %2366 = vst.msk [vmem:[%s3471_s18 + $0x3c] sm:$0xf] %vm2350_vm3, %v2894_v19  ;;  %2430 = vst.msk [vmem:[%s3471_s18 + $0x13c] sm:$0xf] %vm2350_vm3, %v2958_v20  ;;  %v1726_v25 = vmax.f32 %v1264_v21, 0.0  ;;  %v1790_v26 = vmax.f32 %v1520_v22, 0.0 }
 0x138   : > { %v1266_v27 = vpop.f32.mrf.mxu0  ;;  %v1522_v28 = vpop.f32.mrf.mxu1 }
 0x139   : > { %v2895_v29 = vpack.c.bf16 %v1726_v25, %v1726_v25  ;;  %v2959_v30 = vpack.c.bf16 %v1790_v26, %v1790_v26  ;;  %v1267_v31 = vadd.f32 %v3457_v57, %v1266_v27  ;;  %v1523_v32 = vadd.f32 %v3457_v57, %v1522_v28 }
 0x13a   : > { %v1268_v33 = vpop.f32.mrf.mxu0  ;;  %v1524_v34 = vpop.f32.mrf.mxu1 }
 0x13b   : > { %2367 = vst.msk [vmem:[%s3471_s18 + $0x40] sm:$0xf] %vm2350_vm3, %v2895_v29  ;;  %2431 = vst.msk [vmem:[%s3471_s18 + $0x140] sm:$0xf] %vm2350_vm3, %v2959_v30  ;;  %v1727_v35 = vmax.f32 %v1267_v31, 0.0  ;;  %v1791_v36 = vmax.f32 %v1523_v32, 0.0 }
 0x13c   : > { %v1271_v37 = vpop.f32.mrf.mxu0  ;;  %v1527_v38 = vpop.f32.mrf.mxu1 }
 0x13d   : > { %v2896_v39 = vpack.c.bf16 %v1727_v35, %v1727_v35  ;;  %v2960_v40 = vpack.c.bf16 %v1791_v36, %v1791_v36  ;;  %v1272_v41 = vadd.f32 %v3457_v57, %v1271_v37  ;;  %v1528_v42 = vadd.f32 %v3457_v57, %v1527_v38 }
 0x13e   : > { %v1273_v43 = vpop.f32.mrf.mxu0  ;;  %v1529_v44 = vpop.f32.mrf.mxu1 }
 0x13f   : > { %2368 = vst.msk [vmem:[%s3471_s18 + $0x44] sm:$0xf] %vm2350_vm3, %v2896_v39  ;;  %2432 = vst.msk [vmem:[%s3471_s18 + $0x144] sm:$0xf] %vm2350_vm3, %v2960_v40  ;;  %v1728_v45 = vmax.f32 %v1272_v41, 0.0  ;;  %v1792_v46 = vmax.f32 %v1528_v42, 0.0 }
 0x140   : > { %v1274_v47 = vpop.f32.mrf.mxu0  ;;  %v1530_v48 = vpop.f32.mrf.mxu1 }
 0x141   : > { %v2897_v49 = vpack.c.bf16 %v1728_v45, %v1728_v45  ;;  %v2961_v50 = vpack.c.bf16 %v1792_v46, %v1792_v46  ;;  %v1275_v51 = vadd.f32 %v3457_v57, %v1274_v47  ;;  %v1531_v52 = vadd.f32 %v3457_v57, %v1530_v48 }
 0x142   : > { %v1276_v53 = vpop.f32.mrf.mxu0  ;;  %v1532_v54 = vpop.f32.mrf.mxu1 }
 0x143   : > { %2369 = vst.msk [vmem:[%s3471_s18 + $0x48] sm:$0xf] %vm2350_vm3, %v2897_v49  ;;  %2433 = vst.msk [vmem:[%s3471_s18 + $0x148] sm:$0xf] %vm2350_vm3, %v2961_v50  ;;  %v1729_v55 = vmax.f32 %v1275_v51, 0.0  ;;  %v1793_v56 = vmax.f32 %v1531_v52, 0.0 }
 0x144   : > { %v1279_v58 = vpop.f32.mrf.mxu0  ;;  %v1535_v59 = vpop.f32.mrf.mxu1 }
 0x145   : > { %v2898_v60 = vpack.c.bf16 %v1729_v55, %v1729_v55  ;;  %v2962_v61 = vpack.c.bf16 %v1793_v56, %v1793_v56  ;;  %v1280_v62 = vadd.f32 %v3457_v57, %v1279_v58  ;;  %v1536_v63 = vadd.f32 %v3457_v57, %v1535_v59 }
 0x146   : > { %v1281_v0 = vpop.f32.mrf.mxu0  ;;  %v1537_v1 = vpop.f32.mrf.mxu1 }
 0x147   : > { %2370 = vst.msk [vmem:[%s3471_s18 + $0x4c] sm:$0xf] %vm2350_vm3, %v2898_v60  ;;  %2434 = vst.msk [vmem:[%s3471_s18 + $0x14c] sm:$0xf] %vm2350_vm3, %v2962_v61  ;;  %v1730_v2 = vmax.f32 %v1280_v62, 0.0  ;;  %v1794_v3 = vmax.f32 %v1536_v63, 0.0 }
 0x148   : > { %v1282_v4 = vpop.f32.mrf.mxu0  ;;  %v1538_v5 = vpop.f32.mrf.mxu1 }
 0x149   : > { %v2899_v6 = vpack.c.bf16 %v1730_v2, %v1730_v2  ;;  %v2963_v7 = vpack.c.bf16 %v1794_v3, %v1794_v3  ;;  %v1283_v8 = vadd.f32 %v3457_v57, %v1282_v4  ;;  %v1539_v9 = vadd.f32 %v3457_v57, %v1538_v5 }
 0x14a   : > { %v1284_v10 = vpop.f32.mrf.mxu0  ;;  %v1540_v11 = vpop.f32.mrf.mxu1 }
 0x14b   : > { %2371 = vst.msk [vmem:[%s3471_s18 + $0x50] sm:$0xf] %vm2350_vm3, %v2899_v6  ;;  %2435 = vst.msk [vmem:[%s3471_s18 + $0x150] sm:$0xf] %vm2350_vm3, %v2963_v7  ;;  %v1731_v12 = vmax.f32 %v1283_v8, 0.0  ;;  %v1795_v13 = vmax.f32 %v1539_v9, 0.0 }
 0x14c   : > { %v1287_v14 = vpop.f32.mrf.mxu0  ;;  %v1543_v15 = vpop.f32.mrf.mxu1 }
 0x14d   : > { %v2900_v16 = vpack.c.bf16 %v1731_v12, %v1731_v12  ;;  %v2964_v17 = vpack.c.bf16 %v1795_v13, %v1795_v13  ;;  %v1288_v18 = vadd.f32 %v3457_v57, %v1287_v14  ;;  %v1544_v19 = vadd.f32 %v3457_v57, %v1543_v15 }
 0x14e   : > { %v1289_v20 = vpop.f32.mrf.mxu0  ;;  %v1545_v21 = vpop.f32.mrf.mxu1 }
 0x14f   : > { %2372 = vst.msk [vmem:[%s3471_s18 + $0x54] sm:$0xf] %vm2350_vm3, %v2900_v16  ;;  %2436 = vst.msk [vmem:[%s3471_s18 + $0x154] sm:$0xf] %vm2350_vm3, %v2964_v17  ;;  %v1732_v22 = vmax.f32 %v1288_v18, 0.0  ;;  %v1796_v23 = vmax.f32 %v1544_v19, 0.0 }
 0x150   : > { %v1290_v24 = vpop.f32.mrf.mxu0  ;;  %v1546_v25 = vpop.f32.mrf.mxu1 }
 0x151   : > { %v2901_v26 = vpack.c.bf16 %v1732_v22, %v1732_v22  ;;  %v2965_v27 = vpack.c.bf16 %v1796_v23, %v1796_v23  ;;  %v1291_v28 = vadd.f32 %v3457_v57, %v1290_v24  ;;  %v1547_v29 = vadd.f32 %v3457_v57, %v1546_v25 }
 0x152   : > { %v1292_v30 = vpop.f32.mrf.mxu0  ;;  %v1548_v31 = vpop.f32.mrf.mxu1 }
 0x153   : > { %2373 = vst.msk [vmem:[%s3471_s18 + $0x58] sm:$0xf] %vm2350_vm3, %v2901_v26  ;;  %2437 = vst.msk [vmem:[%s3471_s18 + $0x158] sm:$0xf] %vm2350_vm3, %v2965_v27  ;;  %v1733_v32 = vmax.f32 %v1291_v28, 0.0  ;;  %v1797_v33 = vmax.f32 %v1547_v29, 0.0 }
 0x154   : > { %v1295_v34 = vpop.f32.mrf.mxu0  ;;  %v1551_v35 = vpop.f32.mrf.mxu1 }
 0x155   : > { %v2902_v36 = vpack.c.bf16 %v1733_v32, %v1733_v32  ;;  %v2966_v37 = vpack.c.bf16 %v1797_v33, %v1797_v33  ;;  %v1296_v38 = vadd.f32 %v3457_v57, %v1295_v34  ;;  %v1552_v39 = vadd.f32 %v3457_v57, %v1551_v35 }
 0x156   : > { %v1297_v40 = vpop.f32.mrf.mxu0  ;;  %v1553_v41 = vpop.f32.mrf.mxu1 }
 0x157   : > { %2374 = vst.msk [vmem:[%s3471_s18 + $0x5c] sm:$0xf] %vm2350_vm3, %v2902_v36  ;;  %2438 = vst.msk [vmem:[%s3471_s18 + $0x15c] sm:$0xf] %vm2350_vm3, %v2966_v37  ;;  %v1734_v42 = vmax.f32 %v1296_v38, 0.0  ;;  %v1798_v43 = vmax.f32 %v1552_v39, 0.0 }
 0x158   : > { %v1298_v44 = vpop.f32.mrf.mxu0  ;;  %v1554_v45 = vpop.f32.mrf.mxu1 }
 0x159   : > { %v2903_v46 = vpack.c.bf16 %v1734_v42, %v1734_v42  ;;  %v2967_v47 = vpack.c.bf16 %v1798_v43, %v1798_v43  ;;  %v1299_v48 = vadd.f32 %v3457_v57, %v1298_v44  ;;  %v1555_v49 = vadd.f32 %v3457_v57, %v1554_v45 }
 0x15a   : > { %v1300_v50 = vpop.f32.mrf.mxu0  ;;  %v1556_v51 = vpop.f32.mrf.mxu1 }
 0x15b   : > { %2375 = vst.msk [vmem:[%s3471_s18 + $0x60] sm:$0xf] %vm2350_vm3, %v2903_v46  ;;  %2439 = vst.msk [vmem:[%s3471_s18 + $0x160] sm:$0xf] %vm2350_vm3, %v2967_v47  ;;  %v1735_v52 = vmax.f32 %v1299_v48, 0.0  ;;  %v1799_v53 = vmax.f32 %v1555_v49, 0.0 }
 0x15c   : > { %v1303_v54 = vpop.f32.mrf.mxu0  ;;  %v1559_v55 = vpop.f32.mrf.mxu1 }
 0x15d   : > { %v2904_v56 = vpack.c.bf16 %v1735_v52, %v1735_v52  ;;  %v2968_v58 = vpack.c.bf16 %v1799_v53, %v1799_v53  ;;  %v1304_v59 = vadd.f32 %v3457_v57, %v1303_v54  ;;  %v1560_v60 = vadd.f32 %v3457_v57, %v1559_v55 }
 0x15e   : > { %v1305_v61 = vpop.f32.mrf.mxu0  ;;  %v1561_v62 = vpop.f32.mrf.mxu1 }
 0x15f   : > { %2376 = vst.msk [vmem:[%s3471_s18 + $0x64] sm:$0xf] %vm2350_vm3, %v2904_v56  ;;  %2440 = vst.msk [vmem:[%s3471_s18 + $0x164] sm:$0xf] %vm2350_vm3, %v2968_v58  ;;  %v1736_v63 = vmax.f32 %v1304_v59, 0.0  ;;  %v1800_v0 = vmax.f32 %v1560_v60, 0.0 }
 0x160   : > { %v1306_v1 = vpop.f32.mrf.mxu0  ;;  %v1562_v2 = vpop.f32.mrf.mxu1 }
 0x161   : > { %v2905_v3 = vpack.c.bf16 %v1736_v63, %v1736_v63  ;;  %v2969_v4 = vpack.c.bf16 %v1800_v0, %v1800_v0  ;;  %v1307_v5 = vadd.f32 %v3457_v57, %v1306_v1  ;;  %v1563_v6 = vadd.f32 %v3457_v57, %v1562_v2 }
 0x162   : > { %v1308_v7 = vpop.f32.mrf.mxu0  ;;  %v1564_v8 = vpop.f32.mrf.mxu1 }
 0x163   : > { %2377 = vst.msk [vmem:[%s3471_s18 + $0x68] sm:$0xf] %vm2350_vm3, %v2905_v3  ;;  %2441 = vst.msk [vmem:[%s3471_s18 + $0x168] sm:$0xf] %vm2350_vm3, %v2969_v4  ;;  %v1737_v9 = vmax.f32 %v1307_v5, 0.0  ;;  %v1801_v10 = vmax.f32 %v1563_v6, 0.0 }
 0x164   : > { %v1311_v11 = vpop.f32.mrf.mxu0  ;;  %v1567_v12 = vpop.f32.mrf.mxu1 }
 0x165   : > { %v2906_v13 = vpack.c.bf16 %v1737_v9, %v1737_v9  ;;  %v2970_v14 = vpack.c.bf16 %v1801_v10, %v1801_v10  ;;  %v1312_v15 = vadd.f32 %v3457_v57, %v1311_v11  ;;  %v1568_v16 = vadd.f32 %v3457_v57, %v1567_v12 }
 0x166   : > { %v1313_v17 = vpop.f32.mrf.mxu0  ;;  %v1569_v18 = vpop.f32.mrf.mxu1 }
 0x167   : > { %2378 = vst.msk [vmem:[%s3471_s18 + $0x6c] sm:$0xf] %vm2350_vm3, %v2906_v13  ;;  %2442 = vst.msk [vmem:[%s3471_s18 + $0x16c] sm:$0xf] %vm2350_vm3, %v2970_v14  ;;  %v1738_v19 = vmax.f32 %v1312_v15, 0.0  ;;  %v1802_v20 = vmax.f32 %v1568_v16, 0.0 }
 0x168   : > { %v1314_v21 = vpop.f32.mrf.mxu0  ;;  %v1570_v22 = vpop.f32.mrf.mxu1 }
 0x169   : > { %v2907_v23 = vpack.c.bf16 %v1738_v19, %v1738_v19  ;;  %v2971_v24 = vpack.c.bf16 %v1802_v20, %v1802_v20  ;;  %v1315_v25 = vadd.f32 %v3457_v57, %v1314_v21  ;;  %v1571_v26 = vadd.f32 %v3457_v57, %v1570_v22 }
 0x16a   : > { %v1316_v27 = vpop.f32.mrf.mxu0  ;;  %v1572_v28 = vpop.f32.mrf.mxu1 }
 0x16b   : > { %2379 = vst.msk [vmem:[%s3471_s18 + $0x70] sm:$0xf] %vm2350_vm3, %v2907_v23  ;;  %2443 = vst.msk [vmem:[%s3471_s18 + $0x170] sm:$0xf] %vm2350_vm3, %v2971_v24  ;;  %v1739_v29 = vmax.f32 %v1315_v25, 0.0  ;;  %v1803_v30 = vmax.f32 %v1571_v26, 0.0 }
 0x16c   : > { %v1319_v31 = vpop.f32.mrf.mxu0  ;;  %v1575_v32 = vpop.f32.mrf.mxu1 }
 0x16d   : > { %v2908_v33 = vpack.c.bf16 %v1739_v29, %v1739_v29  ;;  %v2972_v34 = vpack.c.bf16 %v1803_v30, %v1803_v30  ;;  %v1320_v35 = vadd.f32 %v3457_v57, %v1319_v31  ;;  %v1576_v36 = vadd.f32 %v3457_v57, %v1575_v32  ;;  %v3734_v32 = vld [vmem:[%s3913_s2] ss:$0 sm:$0xff] }
 0x16e   : > { %v1321_v37 = vpop.f32.mrf.mxu0  ;;  %v1577_v38 = vpop.f32.mrf.mxu1 }
 0x16f   : > { %2380 = vst.msk [vmem:[%s3471_s18 + $0x74] sm:$0xf] %vm2350_vm3, %v2908_v33  ;;  %2444 = vst.msk [vmem:[%s3471_s18 + $0x174] sm:$0xf] %vm2350_vm3, %v2972_v34  ;;  %v1740_v39 = vmax.f32 %v1320_v35, 0.0  ;;  %v1804_v40 = vmax.f32 %v1576_v36, 0.0 }
 0x170   : > { %v1322_v41 = vpop.f32.mrf.mxu0  ;;  %v1578_v42 = vpop.f32.mrf.mxu1 }
 0x171   : > { %v2909_v43 = vpack.c.bf16 %v1740_v39, %v1740_v39  ;;  %v2973_v44 = vpack.c.bf16 %v1804_v40, %v1804_v40  ;;  %v1323_v45 = vadd.f32 %v3457_v57, %v1322_v41  ;;  %v1579_v46 = vadd.f32 %v3457_v57, %v1578_v42 }
 0x172   : > { %v1324_v47 = vpop.f32.mrf.mxu0  ;;  %v1580_v48 = vpop.f32.mrf.mxu1 }
 0x173   : > { %2381 = vst.msk [vmem:[%s3471_s18 + $0x78] sm:$0xf] %vm2350_vm3, %v2909_v43  ;;  %2445 = vst.msk [vmem:[%s3471_s18 + $0x178] sm:$0xf] %vm2350_vm3, %v2973_v44  ;;  %v1741_v49 = vmax.f32 %v1323_v45, 0.0  ;;  %v1805_v50 = vmax.f32 %v1579_v46, 0.0 }
 0x174   : > { %v1327_v51 = vpop.f32.mrf.mxu0  ;;  %v1583_v52 = vpop.f32.mrf.mxu1 }
 0x175   : > { %v2910_v53 = vpack.c.bf16 %v1741_v49, %v1741_v49  ;;  %v2974_v54 = vpack.c.bf16 %v1805_v50, %v1805_v50  ;;  %v1328_v55 = vadd.f32 %v3457_v57, %v1327_v51  ;;  %v1584_v56 = vadd.f32 %v3457_v57, %v1583_v52 }
 0x176   : > { %v1329_v58 = vpop.f32.mrf.mxu0  ;;  %v1585_v59 = vpop.f32.mrf.mxu1 }
 0x177   : > { %2382 = vst.msk [vmem:[%s3471_s18 + $0x7c] sm:$0xf] %vm2350_vm3, %v2910_v53  ;;  %2446 = vst.msk [vmem:[%s3471_s18 + $0x17c] sm:$0xf] %vm2350_vm3, %v2974_v54  ;;  %v1742_v60 = vmax.f32 %v1328_v55, 0.0  ;;  %v1806_v61 = vmax.f32 %v1584_v56, 0.0 }
 0x178   : > { %v1330_v62 = vpop.f32.mrf.mxu0  ;;  %v1586_v63 = vpop.f32.mrf.mxu1 }
 0x179   : > { %v2911_v0 = vpack.c.bf16 %v1742_v60, %v1742_v60  ;;  %v2975_v1 = vpack.c.bf16 %v1806_v61, %v1806_v61  ;;  %v1331_v2 = vadd.f32 %v3457_v57, %v1330_v62  ;;  %v1587_v3 = vadd.f32 %v3457_v57, %v1586_v63 }
 0x17a   : > { %v1332_v4 = vpop.f32.mrf.mxu0  ;;  %v1588_v5 = vpop.f32.mrf.mxu1 }
 0x17b   : > { %2383 = vst.msk [vmem:[%s3471_s18 + $0x80] sm:$0xf] %vm2350_vm3, %v2911_v0  ;;  %2447 = vst.msk [vmem:[%s3471_s18 + $0x180] sm:$0xf] %vm2350_vm3, %v2975_v1  ;;  %v1743_v6 = vmax.f32 %v1331_v2, 0.0  ;;  %v1807_v7 = vmax.f32 %v1587_v3, 0.0 }
 0x17c   : > { %v1335_v8 = vpop.f32.mrf.mxu0  ;;  %v1591_v9 = vpop.f32.mrf.mxu1 }
 0x17d   : > { %v2912_v10 = vpack.c.bf16 %v1743_v6, %v1743_v6  ;;  %v2976_v11 = vpack.c.bf16 %v1807_v7, %v1807_v7  ;;  %v1336_v12 = vadd.f32 %v3457_v57, %v1335_v8  ;;  %v1592_v13 = vadd.f32 %v3457_v57, %v1591_v9 }
 0x17e   : > { %v1337_v14 = vpop.f32.mrf.mxu0  ;;  %v1593_v15 = vpop.f32.mrf.mxu1 }
 0x17f   : > { %2384 = vst.msk [vmem:[%s3471_s18 + $0x84] sm:$0xf] %vm2350_vm3, %v2912_v10  ;;  %2448 = vst.msk [vmem:[%s3471_s18 + $0x184] sm:$0xf] %vm2350_vm3, %v2976_v11  ;;  %v1744_v16 = vmax.f32 %v1336_v12, 0.0  ;;  %v1808_v17 = vmax.f32 %v1592_v13, 0.0 }
 0x180   : > { %v1338_v18 = vpop.f32.mrf.mxu0  ;;  %v1594_v19 = vpop.f32.mrf.mxu1 }
 0x181   : > { %v2913_v20 = vpack.c.bf16 %v1744_v16, %v1744_v16  ;;  %v2977_v21 = vpack.c.bf16 %v1808_v17, %v1808_v17  ;;  %v1339_v22 = vadd.f32 %v3457_v57, %v1338_v18  ;;  %v1595_v23 = vadd.f32 %v3457_v57, %v1594_v19 }
 0x182   : > { %v1340_v24 = vpop.f32.mrf.mxu0  ;;  %v1596_v25 = vpop.f32.mrf.mxu1 }
 0x183   : > { %2385 = vst.msk [vmem:[%s3471_s18 + $0x88] sm:$0xf] %vm2350_vm3, %v2913_v20  ;;  %2449 = vst.msk [vmem:[%s3471_s18 + $0x188] sm:$0xf] %vm2350_vm3, %v2977_v21  ;;  %v1745_v26 = vmax.f32 %v1339_v22, 0.0  ;;  %v1809_v27 = vmax.f32 %v1595_v23, 0.0 }
 0x184   : > { %v1343_v28 = vpop.f32.mrf.mxu0  ;;  %v1599_v29 = vpop.f32.mrf.mxu1 }
 0x185   : > { %v2914_v30 = vpack.c.bf16 %v1745_v26, %v1745_v26  ;;  %v2978_v31 = vpack.c.bf16 %v1809_v27, %v1809_v27  ;;  %v1344_v57 = vadd.f32 %v3734_v32, %v1343_v28  ;;  %v1600_v33 = vadd.f32 %v3734_v32, %v1599_v29 }
 0x186   : > { %v1345_v34 = vpop.f32.mrf.mxu0  ;;  %v1601_v35 = vpop.f32.mrf.mxu1 }
 0x187   : > { %2386 = vst.msk [vmem:[%s3471_s18 + $0x8c] sm:$0xf] %vm2350_vm3, %v2914_v30  ;;  %2450 = vst.msk [vmem:[%s3471_s18 + $0x18c] sm:$0xf] %vm2350_vm3, %v2978_v31  ;;  %v1746_v36 = vmax.f32 %v1344_v57, 0.0  ;;  %v1810_v37 = vmax.f32 %v1600_v33, 0.0 }
 0x188   : > { %v1346_v38 = vpop.f32.mrf.mxu0  ;;  %v1602_v39 = vpop.f32.mrf.mxu1 }
 0x189   : > { %v2915_v40 = vpack.c.bf16 %v1746_v36, %v1746_v36  ;;  %v2979_v41 = vpack.c.bf16 %v1810_v37, %v1810_v37  ;;  %v1347_v42 = vadd.f32 %v3734_v32, %v1346_v38  ;;  %v1603_v43 = vadd.f32 %v3734_v32, %v1602_v39 }
 0x18a   : > { %v1348_v44 = vpop.f32.mrf.mxu0  ;;  %v1604_v45 = vpop.f32.mrf.mxu1 }
 0x18b   : > { %2387 = vst.msk [vmem:[%s3471_s18 + $0x90] sm:$0xf] %vm2350_vm3, %v2915_v40  ;;  %2451 = vst.msk [vmem:[%s3471_s18 + $0x190] sm:$0xf] %vm2350_vm3, %v2979_v41  ;;  %v1747_v46 = vmax.f32 %v1347_v42, 0.0  ;;  %v1811_v47 = vmax.f32 %v1603_v43, 0.0 }
 0x18c   : > { %v1351_v48 = vpop.f32.mrf.mxu0  ;;  %v1607_v49 = vpop.f32.mrf.mxu1 }
 0x18d   : > { %v2916_v50 = vpack.c.bf16 %v1747_v46, %v1747_v46  ;;  %v2980_v51 = vpack.c.bf16 %v1811_v47, %v1811_v47  ;;  %v1352_v52 = vadd.f32 %v3734_v32, %v1351_v48  ;;  %v1608_v53 = vadd.f32 %v3734_v32, %v1607_v49 }
 0x18e   : > { %v1353_v54 = vpop.f32.mrf.mxu0  ;;  %v1609_v55 = vpop.f32.mrf.mxu1 }
 0x18f   : > { %2388 = vst.msk [vmem:[%s3471_s18 + $0x94] sm:$0xf] %vm2350_vm3, %v2916_v50  ;;  %2452 = vst.msk [vmem:[%s3471_s18 + $0x194] sm:$0xf] %vm2350_vm3, %v2980_v51  ;;  %v1748_v56 = vmax.f32 %v1352_v52, 0.0  ;;  %v1812_v58 = vmax.f32 %v1608_v53, 0.0 }
 0x190   : > { %v1354_v59 = vpop.f32.mrf.mxu0  ;;  %v1610_v60 = vpop.f32.mrf.mxu1 }
 0x191   : > { %v2917_v61 = vpack.c.bf16 %v1748_v56, %v1748_v56  ;;  %v2981_v62 = vpack.c.bf16 %v1812_v58, %v1812_v58  ;;  %v1355_v63 = vadd.f32 %v3734_v32, %v1354_v59  ;;  %v1611_v0 = vadd.f32 %v3734_v32, %v1610_v60 }
 0x192   : > { %v1356_v1 = vpop.f32.mrf.mxu0  ;;  %v1612_v2 = vpop.f32.mrf.mxu1 }
 0x193   : > { %2389 = vst.msk [vmem:[%s3471_s18 + $0x98] sm:$0xf] %vm2350_vm3, %v2917_v61  ;;  %2453 = vst.msk [vmem:[%s3471_s18 + $0x198] sm:$0xf] %vm2350_vm3, %v2981_v62  ;;  %v1749_v3 = vmax.f32 %v1355_v63, 0.0  ;;  %v1813_v4 = vmax.f32 %v1611_v0, 0.0 }
 0x194   : > { %v1359_v5 = vpop.f32.mrf.mxu0  ;;  %v1615_v6 = vpop.f32.mrf.mxu1 }
 0x195   : > { %v2918_v7 = vpack.c.bf16 %v1749_v3, %v1749_v3  ;;  %v2982_v8 = vpack.c.bf16 %v1813_v4, %v1813_v4  ;;  %v1360_v9 = vadd.f32 %v3734_v32, %v1359_v5  ;;  %v1616_v10 = vadd.f32 %v3734_v32, %v1615_v6 }
 0x196   : > { %v1361_v11 = vpop.f32.mrf.mxu0  ;;  %v1617_v12 = vpop.f32.mrf.mxu1 }
 0x197   : > { %2390 = vst.msk [vmem:[%s3471_s18 + $0x9c] sm:$0xf] %vm2350_vm3, %v2918_v7  ;;  %2454 = vst.msk [vmem:[%s3471_s18 + $0x19c] sm:$0xf] %vm2350_vm3, %v2982_v8  ;;  %v1750_v13 = vmax.f32 %v1360_v9, 0.0  ;;  %v1814_v14 = vmax.f32 %v1616_v10, 0.0 }
 0x198   : > { %v1362_v15 = vpop.f32.mrf.mxu0  ;;  %v1618_v16 = vpop.f32.mrf.mxu1 }
 0x199   : > { %v2919_v17 = vpack.c.bf16 %v1750_v13, %v1750_v13  ;;  %v2983_v18 = vpack.c.bf16 %v1814_v14, %v1814_v14  ;;  %v1363_v19 = vadd.f32 %v3734_v32, %v1362_v15  ;;  %v1619_v20 = vadd.f32 %v3734_v32, %v1618_v16 }
 0x19a   : > { %v1364_v21 = vpop.f32.mrf.mxu0  ;;  %v1620_v22 = vpop.f32.mrf.mxu1 }
 0x19b   : > { %2391 = vst.msk [vmem:[%s3471_s18 + $0xa0] sm:$0xf] %vm2350_vm3, %v2919_v17  ;;  %2455 = vst.msk [vmem:[%s3471_s18 + $0x1a0] sm:$0xf] %vm2350_vm3, %v2983_v18  ;;  %v1751_v23 = vmax.f32 %v1363_v19, 0.0  ;;  %v1815_v24 = vmax.f32 %v1619_v20, 0.0 }
 0x19c   : > { %v1367_v25 = vpop.f32.mrf.mxu0  ;;  %v1623_v26 = vpop.f32.mrf.mxu1 }
 0x19d   : > { %v2920_v27 = vpack.c.bf16 %v1751_v23, %v1751_v23  ;;  %v2984_v28 = vpack.c.bf16 %v1815_v24, %v1815_v24  ;;  %v1368_v29 = vadd.f32 %v3734_v32, %v1367_v25  ;;  %v1624_v30 = vadd.f32 %v3734_v32, %v1623_v26 }
 0x19e   : > { %v1369_v31 = vpop.f32.mrf.mxu0  ;;  %v1625_v57 = vpop.f32.mrf.mxu1 }
 0x19f   : > { %2392 = vst.msk [vmem:[%s3471_s18 + $0xa4] sm:$0xf] %vm2350_vm3, %v2920_v27  ;;  %2456 = vst.msk [vmem:[%s3471_s18 + $0x1a4] sm:$0xf] %vm2350_vm3, %v2984_v28  ;;  %v1752_v33 = vmax.f32 %v1368_v29, 0.0  ;;  %v1816_v34 = vmax.f32 %v1624_v30, 0.0 }
 0x1a0   : > { %v1370_v35 = vpop.f32.mrf.mxu0  ;;  %v1626_v36 = vpop.f32.mrf.mxu1 }
 0x1a1   : > { %v2921_v37 = vpack.c.bf16 %v1752_v33, %v1752_v33  ;;  %v2985_v38 = vpack.c.bf16 %v1816_v34, %v1816_v34  ;;  %v1371_v39 = vadd.f32 %v3734_v32, %v1370_v35  ;;  %v1627_v40 = vadd.f32 %v3734_v32, %v1626_v36 }
 0x1a2   : > { %v1372_v41 = vpop.f32.mrf.mxu0  ;;  %v1628_v42 = vpop.f32.mrf.mxu1 }
 0x1a3   : > { %2393 = vst.msk [vmem:[%s3471_s18 + $0xa8] sm:$0xf] %vm2350_vm3, %v2921_v37  ;;  %2457 = vst.msk [vmem:[%s3471_s18 + $0x1a8] sm:$0xf] %vm2350_vm3, %v2985_v38  ;;  %v1753_v43 = vmax.f32 %v1371_v39, 0.0  ;;  %v1817_v44 = vmax.f32 %v1627_v40, 0.0 }
 0x1a4   : > { %v1375_v45 = vpop.f32.mrf.mxu0  ;;  %v1631_v46 = vpop.f32.mrf.mxu1 }
 0x1a5   : > { %v2922_v47 = vpack.c.bf16 %v1753_v43, %v1753_v43  ;;  %v2986_v48 = vpack.c.bf16 %v1817_v44, %v1817_v44  ;;  %v1376_v49 = vadd.f32 %v3734_v32, %v1375_v45  ;;  %v1632_v50 = vadd.f32 %v3734_v32, %v1631_v46 }
 0x1a6   : > { %v1377_v51 = vpop.f32.mrf.mxu0  ;;  %v1633_v52 = vpop.f32.mrf.mxu1 }
 0x1a7   : > { %2394 = vst.msk [vmem:[%s3471_s18 + $0xac] sm:$0xf] %vm2350_vm3, %v2922_v47  ;;  %2458 = vst.msk [vmem:[%s3471_s18 + $0x1ac] sm:$0xf] %vm2350_vm3, %v2986_v48  ;;  %v1754_v53 = vmax.f32 %v1376_v49, 0.0  ;;  %v1818_v54 = vmax.f32 %v1632_v50, 0.0 }
 0x1a8   : > { %v1378_v55 = vpop.f32.mrf.mxu0  ;;  %v1634_v56 = vpop.f32.mrf.mxu1 }
 0x1a9   : > { %v2923_v58 = vpack.c.bf16 %v1754_v53, %v1754_v53  ;;  %v2987_v59 = vpack.c.bf16 %v1818_v54, %v1818_v54  ;;  %v1379_v60 = vadd.f32 %v3734_v32, %v1378_v55  ;;  %v1635_v61 = vadd.f32 %v3734_v32, %v1634_v56 }
 0x1aa   : > { %v1380_v62 = vpop.f32.mrf.mxu0  ;;  %v1636_v63 = vpop.f32.mrf.mxu1 }
 0x1ab   : > { %2395 = vst.msk [vmem:[%s3471_s18 + $0xb0] sm:$0xf] %vm2350_vm3, %v2923_v58  ;;  %2459 = vst.msk [vmem:[%s3471_s18 + $0x1b0] sm:$0xf] %vm2350_vm3, %v2987_v59  ;;  %v1755_v0 = vmax.f32 %v1379_v60, 0.0  ;;  %v1819_v1 = vmax.f32 %v1635_v61, 0.0 }
 0x1ac   : > { %v1383_v2 = vpop.f32.mrf.mxu0  ;;  %v1639_v3 = vpop.f32.mrf.mxu1 }
 0x1ad   : > { %v2924_v4 = vpack.c.bf16 %v1755_v0, %v1755_v0  ;;  %v2988_v5 = vpack.c.bf16 %v1819_v1, %v1819_v1  ;;  %v1384_v6 = vadd.f32 %v3734_v32, %v1383_v2  ;;  %v1640_v7 = vadd.f32 %v3734_v32, %v1639_v3 }
 0x1ae   : > { %v1385_v8 = vpop.f32.mrf.mxu0  ;;  %v1641_v9 = vpop.f32.mrf.mxu1 }
 0x1af   : > { %2396 = vst.msk [vmem:[%s3471_s18 + $0xb4] sm:$0xf] %vm2350_vm3, %v2924_v4  ;;  %2460 = vst.msk [vmem:[%s3471_s18 + $0x1b4] sm:$0xf] %vm2350_vm3, %v2988_v5  ;;  %v1756_v10 = vmax.f32 %v1384_v6, 0.0  ;;  %v1820_v11 = vmax.f32 %v1640_v7, 0.0 }
 0x1b0   : > { %v1386_v12 = vpop.f32.mrf.mxu0  ;;  %v1642_v13 = vpop.f32.mrf.mxu1 }
 0x1b1   : > { %v2925_v14 = vpack.c.bf16 %v1756_v10, %v1756_v10  ;;  %v2989_v15 = vpack.c.bf16 %v1820_v11, %v1820_v11  ;;  %v1387_v16 = vadd.f32 %v3734_v32, %v1386_v12  ;;  %v1643_v17 = vadd.f32 %v3734_v32, %v1642_v13 }
 0x1b2   : > { %v1388_v18 = vpop.f32.mrf.mxu0  ;;  %v1644_v19 = vpop.f32.mrf.mxu1 }
 0x1b3   : > { %2397 = vst.msk [vmem:[%s3471_s18 + $0xb8] sm:$0xf] %vm2350_vm3, %v2925_v14  ;;  %2461 = vst.msk [vmem:[%s3471_s18 + $0x1b8] sm:$0xf] %vm2350_vm3, %v2989_v15  ;;  %v1757_v20 = vmax.f32 %v1387_v16, 0.0  ;;  %v1821_v21 = vmax.f32 %v1643_v17, 0.0 }
 0x1b4   : > { %v1391_v22 = vpop.f32.mrf.mxu0  ;;  %v1647_v23 = vpop.f32.mrf.mxu1 }
 0x1b5   : > { %v2926_v24 = vpack.c.bf16 %v1757_v20, %v1757_v20  ;;  %v2990_v25 = vpack.c.bf16 %v1821_v21, %v1821_v21  ;;  %v1392_v26 = vadd.f32 %v3734_v32, %v1391_v22  ;;  %v1648_v27 = vadd.f32 %v3734_v32, %v1647_v23 }
 0x1b6   : > { %v1393_v28 = vpop.f32.mrf.mxu0  ;;  %v1649_v29 = vpop.f32.mrf.mxu1 }
 0x1b7   : > { %2398 = vst.msk [vmem:[%s3471_s18 + $0xbc] sm:$0xf] %vm2350_vm3, %v2926_v24  ;;  %2462 = vst.msk [vmem:[%s3471_s18 + $0x1bc] sm:$0xf] %vm2350_vm3, %v2990_v25  ;;  %v1758_v30 = vmax.f32 %v1392_v26, 0.0  ;;  %v1822_v31 = vmax.f32 %v1648_v27, 0.0 }
 0x1b8   : > { %v1394_v57 = vpop.f32.mrf.mxu0  ;;  %v1650_v33 = vpop.f32.mrf.mxu1 }
 0x1b9   : > { %v2927_v34 = vpack.c.bf16 %v1758_v30, %v1758_v30  ;;  %v2991_v35 = vpack.c.bf16 %v1822_v31, %v1822_v31  ;;  %v1395_v36 = vadd.f32 %v3734_v32, %v1394_v57  ;;  %v1651_v37 = vadd.f32 %v3734_v32, %v1650_v33 }
 0x1ba   : > { %v1396_v38 = vpop.f32.mrf.mxu0  ;;  %v1652_v39 = vpop.f32.mrf.mxu1 }
 0x1bb   : > { %2399 = vst.msk [vmem:[%s3471_s18 + $0xc0] sm:$0xf] %vm2350_vm3, %v2927_v34  ;;  %2463 = vst.msk [vmem:[%s3471_s18 + $0x1c0] sm:$0xf] %vm2350_vm3, %v2991_v35  ;;  %v1759_v40 = vmax.f32 %v1395_v36, 0.0  ;;  %v1823_v41 = vmax.f32 %v1651_v37, 0.0 }
 0x1bc   : > { %v1399_v42 = vpop.f32.mrf.mxu0  ;;  %v1655_v43 = vpop.f32.mrf.mxu1 }
 0x1bd   : > { %v2928_v44 = vpack.c.bf16 %v1759_v40, %v1759_v40  ;;  %v2992_v45 = vpack.c.bf16 %v1823_v41, %v1823_v41  ;;  %v1400_v46 = vadd.f32 %v3734_v32, %v1399_v42  ;;  %v1656_v47 = vadd.f32 %v3734_v32, %v1655_v43 }
 0x1be   : > { %v1401_v48 = vpop.f32.mrf.mxu0  ;;  %v1657_v49 = vpop.f32.mrf.mxu1 }
 0x1bf   : > { %2400 = vst.msk [vmem:[%s3471_s18 + $0xc4] sm:$0xf] %vm2350_vm3, %v2928_v44  ;;  %2464 = vst.msk [vmem:[%s3471_s18 + $0x1c4] sm:$0xf] %vm2350_vm3, %v2992_v45  ;;  %v1760_v50 = vmax.f32 %v1400_v46, 0.0  ;;  %v1824_v51 = vmax.f32 %v1656_v47, 0.0 }
 0x1c0   : > { %v1402_v52 = vpop.f32.mrf.mxu0  ;;  %v1658_v53 = vpop.f32.mrf.mxu1 }
 0x1c1   : > { %v2929_v54 = vpack.c.bf16 %v1760_v50, %v1760_v50  ;;  %v2993_v55 = vpack.c.bf16 %v1824_v51, %v1824_v51  ;;  %v1403_v56 = vadd.f32 %v3734_v32, %v1402_v52  ;;  %v1659_v58 = vadd.f32 %v3734_v32, %v1658_v53 }
 0x1c2   : > { %v1404_v59 = vpop.f32.mrf.mxu0  ;;  %v1660_v60 = vpop.f32.mrf.mxu1 }
 0x1c3   : > { %2401 = vst.msk [vmem:[%s3471_s18 + $0xc8] sm:$0xf] %vm2350_vm3, %v2929_v54  ;;  %2465 = vst.msk [vmem:[%s3471_s18 + $0x1c8] sm:$0xf] %vm2350_vm3, %v2993_v55  ;;  %v1761_v61 = vmax.f32 %v1403_v56, 0.0  ;;  %v1825_v62 = vmax.f32 %v1659_v58, 0.0 }
 0x1c4   : > { %v1407_v63 = vpop.f32.mrf.mxu0  ;;  %v1663_v0 = vpop.f32.mrf.mxu1 }
 0x1c5   : > { %v2930_v1 = vpack.c.bf16 %v1761_v61, %v1761_v61  ;;  %v2994_v2 = vpack.c.bf16 %v1825_v62, %v1825_v62  ;;  %v1408_v3 = vadd.f32 %v3734_v32, %v1407_v63  ;;  %v1664_v4 = vadd.f32 %v3734_v32, %v1663_v0 }
 0x1c6   : > { %v1409_v5 = vpop.f32.mrf.mxu0  ;;  %v1665_v6 = vpop.f32.mrf.mxu1 }
 0x1c7   : > { %2402 = vst.msk [vmem:[%s3471_s18 + $0xcc] sm:$0xf] %vm2350_vm3, %v2930_v1  ;;  %2466 = vst.msk [vmem:[%s3471_s18 + $0x1cc] sm:$0xf] %vm2350_vm3, %v2994_v2  ;;  %v1762_v7 = vmax.f32 %v1408_v3, 0.0  ;;  %v1826_v8 = vmax.f32 %v1664_v4, 0.0 }
 0x1c8   : > { %v1410_v9 = vpop.f32.mrf.mxu0  ;;  %v1666_v10 = vpop.f32.mrf.mxu1 }
 0x1c9   : > { %v2931_v11 = vpack.c.bf16 %v1762_v7, %v1762_v7  ;;  %v2995_v12 = vpack.c.bf16 %v1826_v8, %v1826_v8  ;;  %v1411_v13 = vadd.f32 %v3734_v32, %v1410_v9  ;;  %v1667_v14 = vadd.f32 %v3734_v32, %v1666_v10 }
 0x1ca   : > { %v1412_v15 = vpop.f32.mrf.mxu0  ;;  %v1668_v16 = vpop.f32.mrf.mxu1 }
 0x1cb   : > { %2403 = vst.msk [vmem:[%s3471_s18 + $0xd0] sm:$0xf] %vm2350_vm3, %v2931_v11  ;;  %2467 = vst.msk [vmem:[%s3471_s18 + $0x1d0] sm:$0xf] %vm2350_vm3, %v2995_v12  ;;  %v1763_v17 = vmax.f32 %v1411_v13, 0.0  ;;  %v1827_v18 = vmax.f32 %v1667_v14, 0.0 }
 0x1cc   : > { %v1415_v19 = vpop.f32.mrf.mxu0  ;;  %v1671_v20 = vpop.f32.mrf.mxu1 }
 0x1cd   : > { %v2932_v21 = vpack.c.bf16 %v1763_v17, %v1763_v17  ;;  %v2996_v22 = vpack.c.bf16 %v1827_v18, %v1827_v18  ;;  %v1416_v23 = vadd.f32 %v3734_v32, %v1415_v19  ;;  %v1672_v24 = vadd.f32 %v3734_v32, %v1671_v20 }
 0x1ce   : > { %v1417_v25 = vpop.f32.mrf.mxu0  ;;  %v1673_v26 = vpop.f32.mrf.mxu1 }
 0x1cf   : > { %2404 = vst.msk [vmem:[%s3471_s18 + $0xd4] sm:$0xf] %vm2350_vm3, %v2932_v21  ;;  %2468 = vst.msk [vmem:[%s3471_s18 + $0x1d4] sm:$0xf] %vm2350_vm3, %v2996_v22  ;;  %v1764_v27 = vmax.f32 %v1416_v23, 0.0  ;;  %v1828_v28 = vmax.f32 %v1672_v24, 0.0 }
 0x1d0   : > { %v1418_v29 = vpop.f32.mrf.mxu0  ;;  %v1674_v30 = vpop.f32.mrf.mxu1 }
 0x1d1   : > { %v2933_v31 = vpack.c.bf16 %v1764_v27, %v1764_v27  ;;  %v2997_v57 = vpack.c.bf16 %v1828_v28, %v1828_v28  ;;  %v1419_v33 = vadd.f32 %v3734_v32, %v1418_v29  ;;  %v1675_v34 = vadd.f32 %v3734_v32, %v1674_v30 }
 0x1d2   : > { %v1420_v35 = vpop.f32.mrf.mxu0  ;;  %v1676_v36 = vpop.f32.mrf.mxu1 }
 0x1d3   : > { %2405 = vst.msk [vmem:[%s3471_s18 + $0xd8] sm:$0xf] %vm2350_vm3, %v2933_v31  ;;  %2469 = vst.msk [vmem:[%s3471_s18 + $0x1d8] sm:$0xf] %vm2350_vm3, %v2997_v57  ;;  %v1765_v37 = vmax.f32 %v1419_v33, 0.0  ;;  %v1829_v38 = vmax.f32 %v1675_v34, 0.0 }
 0x1d4   : > { %v1423_v39 = vpop.f32.mrf.mxu0  ;;  %v1679_v40 = vpop.f32.mrf.mxu1 }
 0x1d5   : > { %v2934_v41 = vpack.c.bf16 %v1765_v37, %v1765_v37  ;;  %v2998_v42 = vpack.c.bf16 %v1829_v38, %v1829_v38  ;;  %v1424_v43 = vadd.f32 %v3734_v32, %v1423_v39  ;;  %v1680_v44 = vadd.f32 %v3734_v32, %v1679_v40 }
 0x1d6   : > { %v1425_v45 = vpop.f32.mrf.mxu0  ;;  %v1681_v46 = vpop.f32.mrf.mxu1 }
 0x1d7   : > { %2406 = vst.msk [vmem:[%s3471_s18 + $0xdc] sm:$0xf] %vm2350_vm3, %v2934_v41  ;;  %2470 = vst.msk [vmem:[%s3471_s18 + $0x1dc] sm:$0xf] %vm2350_vm3, %v2998_v42  ;;  %v1766_v47 = vmax.f32 %v1424_v43, 0.0  ;;  %v1830_v48 = vmax.f32 %v1680_v44, 0.0 }
 0x1d8   : > { %v1426_v49 = vpop.f32.mrf.mxu0  ;;  %v1682_v50 = vpop.f32.mrf.mxu1 }
 0x1d9   : > { %v2935_v51 = vpack.c.bf16 %v1766_v47, %v1766_v47  ;;  %v2999_v52 = vpack.c.bf16 %v1830_v48, %v1830_v48  ;;  %v1427_v53 = vadd.f32 %v3734_v32, %v1426_v49  ;;  %v1683_v54 = vadd.f32 %v3734_v32, %v1682_v50 }
 0x1da   : > { %v1428_v55 = vpop.f32.mrf.mxu0  ;;  %v1684_v56 = vpop.f32.mrf.mxu1 }
 0x1db   : > { %2407 = vst.msk [vmem:[%s3471_s18 + $0xe0] sm:$0xf] %vm2350_vm3, %v2935_v51  ;;  %2471 = vst.msk [vmem:[%s3471_s18 + $0x1e0] sm:$0xf] %vm2350_vm3, %v2999_v52  ;;  %v1767_v58 = vmax.f32 %v1427_v53, 0.0  ;;  %v1831_v59 = vmax.f32 %v1683_v54, 0.0 }
 0x1dc   : > { %v1431_v60 = vpop.f32.mrf.mxu0  ;;  %v1687_v61 = vpop.f32.mrf.mxu1 }
 0x1dd   : > { %v2936_v62 = vpack.c.bf16 %v1767_v58, %v1767_v58  ;;  %v3000_v63 = vpack.c.bf16 %v1831_v59, %v1831_v59  ;;  %v1432_v0 = vadd.f32 %v3734_v32, %v1431_v60  ;;  %v1688_v1 = vadd.f32 %v3734_v32, %v1687_v61 }
 0x1de   : > { %v1433_v2 = vpop.f32.mrf.mxu0  ;;  %v1689_v3 = vpop.f32.mrf.mxu1 }
 0x1df   : > { %2408 = vst.msk [vmem:[%s3471_s18 + $0xe4] sm:$0xf] %vm2350_vm3, %v2936_v62  ;;  %2472 = vst.msk [vmem:[%s3471_s18 + $0x1e4] sm:$0xf] %vm2350_vm3, %v3000_v63  ;;  %v1768_v4 = vmax.f32 %v1432_v0, 0.0  ;;  %v1832_v5 = vmax.f32 %v1688_v1, 0.0 }
 0x1e0   : > { %v1434_v6 = vpop.f32.mrf.mxu0  ;;  %v1690_v7 = vpop.f32.mrf.mxu1 }
 0x1e1   : > { %v2937_v8 = vpack.c.bf16 %v1768_v4, %v1768_v4  ;;  %v3001_v9 = vpack.c.bf16 %v1832_v5, %v1832_v5  ;;  %v1435_v10 = vadd.f32 %v3734_v32, %v1434_v6  ;;  %v1691_v11 = vadd.f32 %v3734_v32, %v1690_v7 }
 0x1e2   : > { %v1436_v12 = vpop.f32.mrf.mxu0  ;;  %v1692_v13 = vpop.f32.mrf.mxu1 }
 0x1e3   : > { %2409 = vst.msk [vmem:[%s3471_s18 + $0xe8] sm:$0xf] %vm2350_vm3, %v2937_v8  ;;  %2473 = vst.msk [vmem:[%s3471_s18 + $0x1e8] sm:$0xf] %vm2350_vm3, %v3001_v9  ;;  %v1769_v14 = vmax.f32 %v1435_v10, 0.0  ;;  %v1833_v15 = vmax.f32 %v1691_v11, 0.0 }
 0x1e4   : > { %v1439_v16 = vpop.f32.mrf.mxu0  ;;  %v1695_v17 = vpop.f32.mrf.mxu1 }
 0x1e5   : > { %v2938_v18 = vpack.c.bf16 %v1769_v14, %v1769_v14  ;;  %v3002_v19 = vpack.c.bf16 %v1833_v15, %v1833_v15  ;;  %v1440_v20 = vadd.f32 %v3734_v32, %v1439_v16  ;;  %v1696_v21 = vadd.f32 %v3734_v32, %v1695_v17 }
 0x1e6   : > { %v1441_v22 = vpop.f32.mrf.mxu0  ;;  %v1697_v23 = vpop.f32.mrf.mxu1 }
 0x1e7   : > { %2410 = vst.msk [vmem:[%s3471_s18 + $0xec] sm:$0xf] %vm2350_vm3, %v2938_v18  ;;  %2474 = vst.msk [vmem:[%s3471_s18 + $0x1ec] sm:$0xf] %vm2350_vm3, %v3002_v19  ;;  %v1770_v24 = vmax.f32 %v1440_v20, 0.0  ;;  %v1834_v25 = vmax.f32 %v1696_v21, 0.0 }
 0x1e8   : > { %v1442_v26 = vpop.f32.mrf.mxu0  ;;  %v1698_v27 = vpop.f32.mrf.mxu1 }
 0x1e9   : > { %v2939_v28 = vpack.c.bf16 %v1770_v24, %v1770_v24  ;;  %v3003_v29 = vpack.c.bf16 %v1834_v25, %v1834_v25  ;;  %v1443_v30 = vadd.f32 %v3734_v32, %v1442_v26  ;;  %v1699_v31 = vadd.f32 %v3734_v32, %v1698_v27 }
 0x1ea   : > { %v1444_v57 = vpop.f32.mrf.mxu0  ;;  %v1700_v33 = vpop.f32.mrf.mxu1 }
 0x1eb   : > { %2411 = vst.msk [vmem:[%s3471_s18 + $0xf0] sm:$0xf] %vm2350_vm3, %v2939_v28  ;;  %2475 = vst.msk [vmem:[%s3471_s18 + $0x1f0] sm:$0xf] %vm2350_vm3, %v3003_v29  ;;  %v1771_v34 = vmax.f32 %v1443_v30, 0.0  ;;  %v1835_v35 = vmax.f32 %v1699_v31, 0.0 }
 0x1ec   : > { %v1447_v36 = vpop.f32.mrf.mxu0  ;;  %v1703_v37 = vpop.f32.mrf.mxu1 }
 0x1ed   : > { %v2940_v38 = vpack.c.bf16 %v1771_v34, %v1771_v34  ;;  %v3004_v39 = vpack.c.bf16 %v1835_v35, %v1835_v35  ;;  %v1448_v40 = vadd.f32 %v3734_v32, %v1447_v36  ;;  %v1704_v41 = vadd.f32 %v3734_v32, %v1703_v37 }
 0x1ee   : > { %v1449_v42 = vpop.f32.mrf.mxu0  ;;  %v1705_v43 = vpop.f32.mrf.mxu1 }
 0x1ef   : > { %2412 = vst.msk [vmem:[%s3471_s18 + $0xf4] sm:$0xf] %vm2350_vm3, %v2940_v38  ;;  %2476 = vst.msk [vmem:[%s3471_s18 + $0x1f4] sm:$0xf] %vm2350_vm3, %v3004_v39  ;;  %v1772_v44 = vmax.f32 %v1448_v40, 0.0  ;;  %v1836_v45 = vmax.f32 %v1704_v41, 0.0 }
 0x1f0   : > { %v1450_v46 = vpop.f32.mrf.mxu0  ;;  %v1706_v47 = vpop.f32.mrf.mxu1 }
 0x1f1   : > { %v2941_v48 = vpack.c.bf16 %v1772_v44, %v1772_v44  ;;  %v3005_v49 = vpack.c.bf16 %v1836_v45, %v1836_v45  ;;  %v1451_v50 = vadd.f32 %v3734_v32, %v1450_v46  ;;  %v1707_v51 = vadd.f32 %v3734_v32, %v1706_v47 }
 0x1f2   : > { %v1452_v52 = vpop.f32.mrf.mxu0  ;;  %v1708_v53 = vpop.f32.mrf.mxu1 }
 0x1f3   : > { %2413 = vst.msk [vmem:[%s3471_s18 + $0xf8] sm:$0xf] %vm2350_vm3, %v2941_v48  ;;  %2477 = vst.msk [vmem:[%s3471_s18 + $0x1f8] sm:$0xf] %vm2350_vm3, %v3005_v49  ;;  %v1773_v54 = vmax.f32 %v1451_v50, 0.0  ;;  %v1837_v55 = vmax.f32 %v1707_v51, 0.0 }
 0x1f5   : > { %v2942_v56 = vpack.c.bf16 %v1773_v54, %v1773_v54  ;;  %v3006_v58 = vpack.c.bf16 %v1837_v55, %v1837_v55 }
 0x1f7   : > { %2414 = vst.msk [vmem:[%s3471_s18 + $0xfc] sm:$0xf] %vm2350_vm3, %v2942_v56  ;;  %2478 = vst.msk [vmem:[%s3471_s18 + $0x1fc] sm:$0xf] %vm2350_vm3, %v3006_v58 }
 0x1f8 PF: > { %s13_s12 = sadd.s32 1, %s3230_s12  }
 0x1f9   : > { %p10_p4 = scmp.ge.s32.totalorder %s13_s12, 4  }
 0x1fb   :  { %12 = sbr.rel (!%p10_p4) target bundleno = 1 (0x1), region = 62 }

// kernel: _resnet_stem.3
= control target key start
LH: loop header
LB: loop body
LE: loop exit
PB: predicated region body
PF: predicated region fallthrough
CT: control target
= control target key end

     0   :  { %7 = vsyncpa [#allocation3], 0  ;;  %s1627_s0 = inlined_call_operand.vmem [shape: bf16[2,34,17,128], index: 0, kind: input, shape index: {}, may-alias: {0,1}]   ;;  %s1628_s1 = inlined_call_operand.vmem [shape: bf16[2,34,17,128], index: 1, kind: input, shape index: {}, may-alias: {0,1}]   ;;  %s1629_s2 = inlined_call_operand.hbm [shape: bf16[2,16,16,64], index: 2, kind: output, shape index: {}]  }
   0x1   :  { %9 = vsyncpa [#allocation3 + $0x1], 0  ;;  %s1141_s9 = smov 0   ;;  %s1143_s10 = smov 0  }
   0x2   :  { %s1145_s11 = smov 0   ;;  %s1147_s12 = smov 0  }
   0x3   :  { %s1149_s13 = smov 0   ;;  %s1151_s14 = smov 0  }
   0x4   :  { %s1153_s15 = smov 0   ;;  %s1155_s16 = smov 0  }
   0x5 LB: > { %s843_s17 = sadd.s32 4294967295, %s1121_s16   ;;  %s844_s18 = sadd.s32 4294967294, %s1121_s16   ;;  %s1121_s16 = sphi %s1155_s16, %s15_s16   ;;  %s1117_s15 = sphi %s1153_s15, %s1641_s15   ;;  %s1113_s14 = sphi %s1151_s14, %s1640_s14   ;;  %s1109_s13 = sphi %s1149_s13, %s1639_s13   ;;  %s1105_s12 = sphi %s1147_s12, %s1638_s12   ;;  %s1101_s11 = sphi %s1145_s11, %s1637_s11   ;;  %s1097_s10 = sphi %s1143_s10, %s1636_s10   ;;  %s1093_s9 = sphi %s1141_s9, %s1635_s9  }
   0x6   : > { %s24_s19 = sadd.s32 1, %s1113_s14  ;;  %s27_s20 = sadd.s32 1, %s1117_s15 }
   0x7   : > { %p25_p0 = scmp.ge.s32.totalorder %s24_s19, 2  ;;  %p106_p1 = scmp.ne.s32.totalorder %s1101_s11, %s1097_s10 }
   0x8   : > { %p107_p2 = scmp.eq.s32.totalorder %s843_s17, 3  ;;  %p112_p5 = scmp.ne.s32.totalorder %s1097_s10, %s1093_s9 }
   0x9   : > { %s1643_s19 = smov (%p25_p0, %s24_s19), 0  ;;  %s1645_s20 = smov (!%p25_p0, %s27_s20), %s1117_s15 }
   0xa   : > { %s92_s21 = ssub.s32 %s1113_s14, %s1643_s19  ;;  %p1192_p3 = por %p107_p2, %p106_p1 }
   0xb   : > { %p29_p4 = scmp.ge.s32.totalorder %s1645_s20, 2  ;;  %p113_p6 = scmp.eq.s32.totalorder %s844_s18, 3 }
   0xc   : > { %p849_p7 = scmp.ge.s32.totalorder %s1121_s16, 1  ;;  %p173_p9 = scmp.lt.s32.totalorder %s1121_s16, 5 }
   0xd   : > { %s1647_s20 = smov (%p29_p4, %s1645_s20), 0  ;;  %p1201_p8 = por %p113_p6, %p112_p5 }
   0xe   : > { %s91_s24 = ssub.s32 %s1117_s15, %s1647_s20  ;;  %s96_s25 = sadd.s32 1, %s1101_s11 }
   0xf   : > { %s93_s26 = sor.u32 %s92_s21, %s91_s24  ;;  %p174_p10 = pnand %p849_p7, %p173_p9 }
  0x10   : > { %p94_p11 = scmp.eq.s32.totalorder %s93_s26, 0  ;;  %s1213_s28 = sshll.u32 (!%p174_p10), %s1105_s12, 4 }
  0x11   : > { %177 = sbr.rel (%p174_p10) target bundleno = 197 (0xc5), region = 28  ;;  %p223_p12 = scmp.lt.s32.totalorder (!%p174_p10), %s1109_s13, 1 }
  0x12   : > { %s1210_s27 = scalar_select %p94_p11, %s1101_s11, %s96_s25  }
  0x13   : > { %p225_p13 = scmp.lt.s32.totalorder (!%p174_p10), %s1213_s28, 33  ;;  %s1123_s12 = smov (!%p174_p10), 64  }
  0x14   : > { %s952_s18 = sadd.s32 (!%p174_p10), 16, %s1213_s28  ;;  %s939_s7 = sshll.u32 (!%p174_p10), %s1109_s13, 5 }
  0x15   : > { %p1270_p0 = scmp.lt.s32.totalorder (!%p174_p10), %s952_s18, 33 }
  0x16   : > { %s1218_s29 = scalar_select %p223_p12, %s1109_s13, 1  ;;  %vm281_vm0 = vsmask.f32 3328  ;;  %vm282_vm1 = vsmask.f32 7440  ;;  %vm312_vm3 = vcmask 519168  }
  0x17   : > { %s226_s30 = scalar_select %p225_p13, %s1213_s28, 33  ;;  %vm1405_vm2 = vmor %vm281_vm0, %vm282_vm1 }
  0x18   : > { %s954_s3 = smul.u32 102, %s1218_s29  ;;  %s1649_s18 = smov (!%p1270_p0, %s952_s18), 33 }
  0x19   : > { %s953_s4 = smul.u32 3, %s226_s30  ;;  %s734_s13 = sadd.s32 %s939_s7, %s1213_s28 }
  0x1a   : > { %s955_s24 = smul.u32 3, %s1649_s18  ;;  %s940_s8 = sshll.u32 %s734_s13, 6 }
  0x1b   : > { %s229_s5 = sadd.s32 %s954_s3, %s953_s4  ;;  %s214_s4 = sand.u32 1, %s1097_s10  }
  0x1c   : > { %s852_s6 = sshll.u32 %s229_s5, 2  ;;  %s247_s25 = sadd.s32 %s955_s24, %s954_s3 }
  0x1d   : > { %s1227_s17 = scalar_lea.vmem %s1627_s0, %s852_s6  ;;  %s855_s26 = sshll.u32 %s247_s25, 2 }
  0x1e   : > { %v862_v0 = vld [vmem:[%s1227_s17 + $0x18] sm:$0xf]  ;;  %v865_v1 = vld [vmem:[%s1227_s17 + $0x24] sm:$0xf]  ;;  %v868_v2 = vld [vmem:[%s1227_s17 + $0x30] sm:$0xf]  ;;  %s249_s3 = scalar_lea.vmem %s1628_s1, %s855_s26  ;;  %s1564_s21 = scalar_lea.hbm %s1629_s2, %s940_s8 }
  0x1f   : > { %v326_v3 = vmax.bf16 %v865_v1, %v862_v0  ;;  %v254_v4 = vld [vmem:[%s1227_s17] sm:$0xf]  ;;  %v856_v5 = vld [vmem:[%s1227_s17 + $0xc] sm:$0xf]  ;;  %v859_v6 = vld [vmem:[%s1227_s17 + $0x18] sm:$0xf] }
  0x20   : > { %v265_v7 = vmax.bf16 %v856_v5, %v254_v4  ;;  %v863_v8 = vld [vmem:[%s1227_s17 + $0x1c] sm:$0xf]  ;;  %v866_v9 = vld [vmem:[%s1227_s17 + $0x28] sm:$0xf]  ;;  %v869_v10 = vld [vmem:[%s1227_s17 + $0x34] sm:$0xf] }
  0x21   : > { %v1238_v11 = vmax.bf16 %v868_v2, %v326_v3  ;;  %v327_v12 = vmax.bf16 %v866_v9, %v863_v8  ;;  %v255_v13 = vld [vmem:[%s1227_s17 + $0x4] sm:$0xf]  ;;  %v857_v14 = vld [vmem:[%s1227_s17 + $0x10] sm:$0xf]  ;;  %v860_v15 = vld [vmem:[%s1227_s17 + $0x1c] sm:$0xf] }
  0x22   : > { %v1243_v16 = vmax.bf16 %v859_v6, %v265_v7  ;;  %v266_v17 = vmax.bf16 %v857_v14, %v255_v13  ;;  %v874_v18 = vld [vmem:[%s1227_s17 + $0x34] sm:$0xf]  ;;  %v877_v19 = vld [vmem:[%s1227_s17 + $0x40] sm:$0xf]  ;;  %v873_v22 = vld [vmem:[%s1227_s17 + $0x30] sm:$0xf] }
  0x23   : > { %334 = vrot.lane.b32.xlu1 %v1238_v11, %s1123_s12  ;;  %v1249_v20 = vmax.bf16 %v869_v10, %v327_v12  ;;  %v385_v21 = vmax.bf16 %v877_v19, %v874_v18  ;;  %v876_v23 = vld [vmem:[%s1227_s17 + $0x3c] sm:$0xf]  ;;  %v880_v25 = vld [vmem:[%s1227_s17 + $0x4c] sm:$0xf]  ;;  %v888_v28 = vld [vmem:[%s1227_s17 + $0x58] sm:$0xf] }
  0x24   : > { %273 = vrot.lane.b32.xlu0 %v1243_v16, %s1123_s12  ;;  %v1256_v24 = vmax.bf16 %v860_v15, %v266_v17  ;;  %v384_v26 = vmax.bf16 %v876_v23, %v873_v22  ;;  %v885_v27 = vld [vmem:[%s1227_s17 + $0x4c] sm:$0xf]  ;;  %v879_v29 = vld [vmem:[%s1227_s17 + $0x48] sm:$0xf]  ;;  %v887_v31 = vld [vmem:[%s1227_s17 + $0x54] sm:$0xf] }
  0x25   : > { %v884_v30 = vld [vmem:[%s1227_s17 + $0x48] sm:$0xf]  ;;  %v1266_v32 = vmax.bf16 %v880_v25, %v385_v21  ;;  %v443_v33 = vmax.bf16 %v888_v28, %v885_v27  ;;  %v891_v35 = vld [vmem:[%s1227_s17 + $0x64] sm:$0xf]  ;;  %v899_v38 = vld [vmem:[%s1227_s17 + $0x70] sm:$0xf] }
  0x26   : > { %v1276_v34 = vmax.bf16 %v879_v29, %v384_v26  ;;  %v442_v36 = vmax.bf16 %v887_v31, %v884_v30  ;;  %v896_v37 = vld [vmem:[%s1227_s17 + $0x64] sm:$0xf]  ;;  %v890_v39 = vld [vmem:[%s1227_s17 + $0x60] sm:$0xf]  ;;  %v898_v41 = vld [vmem:[%s1227_s17 + $0x6c] sm:$0xf] }
  0x27   : > { %336 = vrot.lane.b32.xlu1 %v1249_v20, %s1123_s12  ;;  %v895_v40 = vld [vmem:[%s1227_s17 + $0x60] sm:$0xf]  ;;  %v1286_v42 = vmax.bf16 %v891_v35, %v443_v33  ;;  %v902_v43 = vld [vmem:[%s1227_s17 + $0x7c] sm:$0xf]  ;;  %v501_v44 = vmax.bf16 %v899_v38, %v896_v37  ;;  %v910_v48 = vld [vmem:[%s1227_s17 + $0x88] sm:$0xf] }
  0x28   : > { %275 = vrot.lane.b32.xlu0 %v1256_v24, %s1123_s12  ;;  %v1291_v45 = vmax.bf16 %v890_v39, %v442_v36  ;;  %v500_v46 = vmax.bf16 %v898_v41, %v895_v40  ;;  %v907_v47 = vld [vmem:[%s1227_s17 + $0x7c] sm:$0xf]  ;;  %v901_v49 = vld [vmem:[%s1227_s17 + $0x78] sm:$0xf]  ;;  %v909_v51 = vld [vmem:[%s1227_s17 + $0x84] sm:$0xf] }
  0x29   : > { %v906_v50 = vld [vmem:[%s1227_s17 + $0x78] sm:$0xf]  ;;  %v1304_v52 = vmax.bf16 %v902_v43, %v501_v44  ;;  %v559_v53 = vmax.bf16 %v910_v48, %v907_v47  ;;  %v913_v55 = vld [vmem:[%s1227_s17 + $0x94] sm:$0xf]  ;;  %v921_v58 = vld [vmem:[%s1227_s17 + $0xa0] sm:$0xf] }
  0x2a   : > { %v1308_v54 = vmax.bf16 %v901_v49, %v500_v46  ;;  %v558_v56 = vmax.bf16 %v909_v51, %v906_v50  ;;  %v918_v57 = vld [vmem:[%s1227_s17 + $0x94] sm:$0xf]  ;;  %v912_v59 = vld [vmem:[%s1227_s17 + $0x90] sm:$0xf]  ;;  %v920_v61 = vld [vmem:[%s1227_s17 + $0x9c] sm:$0xf] }
  0x2b   : > { %394 = vrot.lane.b32.xlu1 %v1266_v32, %s1123_s12  ;;  %v917_v60 = vld [vmem:[%s1227_s17 + $0x90] sm:$0xf]  ;;  %v1320_v62 = vmax.bf16 %v913_v55, %v559_v53  ;;  %v617_v63 = vmax.bf16 %v921_v58, %v918_v57  ;;  %v924_v1 = vld [vmem:[%s1227_s17 + $0xac] sm:$0xf]  ;;  %v932_v4 = vld [vmem:[%s1227_s17 + $0xb8] sm:$0xf] }
  0x2c   : > { %392 = vrot.lane.b32.xlu0 %v1276_v34, %s1123_s12  ;;  %v1324_v0 = vmax.bf16 %v912_v59, %v558_v56  ;;  %v616_v2 = vmax.bf16 %v920_v61, %v917_v60  ;;  %v929_v3 = vld [vmem:[%s1227_s17 + $0xac] sm:$0xf]  ;;  %v923_v5 = vld [vmem:[%s1227_s17 + $0xa8] sm:$0xf]  ;;  %v931_v7 = vld [vmem:[%s1227_s17 + $0xb4] sm:$0xf] }
  0x2d   : > { %v928_v6 = vld [vmem:[%s1227_s17 + $0xa8] sm:$0xf]  ;;  %v1337_v8 = vmax.bf16 %v924_v1, %v617_v63  ;;  %v674_v9 = vmax.bf16 %v932_v4, %v929_v3  ;;  %v671_v12 = vld [vmem:[%s249_s3 + $0x4] sm:$0xf]  ;;  %v670_v14 = vld [vmem:[%s249_s3] sm:$0xf] }
  0x2e   : > { %v1341_v10 = vmax.bf16 %v923_v5, %v616_v2  ;;  %v673_v13 = vmax.bf16 %v931_v7, %v928_v6  ;;  %v930_v18 = vld [vmem:[%s1227_s17 + $0xb0] sm:$0x1]  ;;  %v933_v19 = vld [vmem:[%s1227_s17 + $0xbc] sm:$0x1]  ;;  %v672_v21 = vld [vmem:[%s249_s3 + $0x8] sm:$0x1] }
  0x2f   : > { %452 = vrot.lane.b32.xlu1 %v1286_v42, %s1123_s12  ;;  %v1345_v15 = vmax.bf16 %v674_v9, %v671_v12  ;;  %v675_v22 = vmax.bf16 %v933_v19, %v930_v18  ;;  %v352_v25 = vshll.u32 %v1249_v20, 16  ;;  %v343_v26 = vshrl.u32 %v1238_v11, 16  ;;  %v864_v29 = vld [vmem:[%s1227_s17 + $0x20] sm:$0x1]  ;;  %v867_v30 = vld [vmem:[%s1227_s17 + $0x2c] sm:$0x1] }
  0x30   : > { %450 = vrot.lane.b32.xlu0 %v1291_v45, %s1123_s12  ;;  %v1349_v17 = vmax.bf16 %v673_v13, %v670_v14  ;;  %v346_v27 = vshll.u32 %v1238_v11, 16  ;;  %v294_v28 = vshll.u32 %v1256_v24, 16  ;;  %v256_v31 = vld [vmem:[%s1227_s17 + $0x8] sm:$0x1]  ;;  %v858_v33 = vld [vmem:[%s1227_s17 + $0x14] sm:$0x1]  ;;  %v328_v38 = vmax.bf16 %v867_v30, %v864_v29 }
  0x31   : > { %v1357_v23 = vmax.bf16 %v675_v22, %v672_v21  ;;  %v285_v35 = vshrl.u32 %v1243_v16, 16  ;;  %v288_v36 = vshll.u32 %v1243_v16, 16  ;;  %v1369_v37 = vrot.slane %v352_v25, 5  ;;  %v870_v46 = vld [vmem:[%s1227_s17 + $0x38] sm:$0x1]  ;;  %s1443_s5 = sshll.u32 %s214_s4, 6 }
  0x32   : > { %v356_v39 = vshrl.u32 %v1249_v20, 16  ;;  %v298_v40 = vshrl.u32 %v1256_v24, 16  ;;  %v345_v41 = vrot.slane %v343_v26, 4  ;;  %v348_v43 = vrot.slane %v346_v27, 5  ;;  %v861_v48 = vld [vmem:[%s1227_s17 + $0x20] sm:$0x1] }
  0x33   : > { %510 = vrot.lane.b32.xlu1 %v1304_v52, %s1123_s12  ;;  %v1373_v44 = vrot.slane %v294_v28, 5  ;;  %v267_v47 = vmax.bf16 %v858_v33, %v256_v31  ;;  %v875_v49 = vld [vmem:[%s1227_s17 + $0x38] sm:$0x1]  ;;  %v878_v50 = vld [vmem:[%s1227_s17 + $0x44] sm:$0x1]  ;;  %v287_v51 = vrot.slane %v285_v35, 4  ;;  %v331_v57 = vmax.bf16 %v870_v46, %v328_v38 }
  0x34   : > { %508 = vrot.lane.b32.xlu0 %v1308_v54, %s1123_s12  ;;  %v290_v53 = vrot.slane %v288_v36, 5  ;;  %v886_v55 = vld [vmem:[%s1227_s17 + $0x50] sm:$0x1]  ;;  %v889_v56 = vld [vmem:[%s1227_s17 + $0x5c] sm:$0x1]  ;;  %v358_v58 = vrot.slane %v356_v39, 4  ;;  %v386_v63 = vmax.bf16 %v878_v50, %v875_v49  ;;  %v349_v9 = vor.u32 %v348_v43, %v345_v41 }
  0x35   : > { %v300_v59 = vrot.slane %v298_v40, 4  ;;  %v410_v60 = vshll.u32 %v1266_v32, 16  ;;  %v270_v61 = vmax.bf16 %v861_v48, %v267_v47  ;;  %v414_v1 = vshrl.u32 %v1266_v32, 16  ;;  %v881_v3 = vld [vmem:[%s1227_s17 + $0x50] sm:$0x1]  ;;  %s1476_s6 = scalar_lea.vmem [#allocation2], %s1443_s5 }
  0x36   : > { %v401_v2 = vshrl.u32 %v1276_v34, 16  ;;  %v404_v4 = vshll.u32 %v1276_v34, 16  ;;  %v444_v5 = vmax.bf16 %v889_v56, %v886_v55  ;;  %v468_v6 = vshll.u32 %v1286_v42, 16  ;;  %v892_v13 = vld [vmem:[%s1227_s17 + $0x68] sm:$0x1]  ;;  %s737_s28 = sshll.u32 %s1476_s6, 4  ;;  %s1566_s28 = int_to_ptr.vmem [resolvable:$true] %s737_s28 }
  0x37   : > { %568 = vrot.lane.b32.xlu1 %v1320_v62, %s1123_s12  ;;  %v472_v7 = vshrl.u32 %v1286_v42, 16  ;;  %v291_v12 = vor.u32 %v290_v53, %v287_v51  ;;  %v359_v14 = vor.u32 %v358_v58, %v1369_v37  ;;  %v362_v18 = vshll.u32 %v331_v57, 16  ;;  %v897_v36 = vld [vmem:[%s1227_s17 + $0x68] sm:$0x1]  ;;  %v900_v38 = vld [vmem:[%s1227_s17 + $0x74] sm:$0x1] }
  0x38   : > { %566 = vrot.lane.b32.xlu0 %v1324_v0, %s1123_s12  ;;  %v301_v19 = vor.u32 %v300_v59, %v1373_v44  ;;  %v1391_v21 = vrot.slane %v410_v60, 5  ;;  %v304_v22 = vshll.u32 %v270_v61, 16  ;;  %v389_v25 = vmax.bf16 %v881_v3, %v386_v63  ;;  %v903_v59 = vld [vmem:[%s1227_s17 + $0x80] sm:$0x1]  ;;  %s1574_s24 = scalar_lea.sflag [#allocation3], %s214_s4  ;;  %s1029_s25 = scalar_lea.vmem %s1566_s28, 1024 }
  0x39   : > { %v416_v26 = vrot.slane %v414_v1, 4  ;;  %v403_v27 = vrot.slane %v401_v2, 4  ;;  %v406_v28 = vrot.slane %v404_v4, 5  ;;  %v447_v29 = vmax.bf16 %v892_v13, %v444_v5  ;;  %v908_v4 = vld [vmem:[%s1227_s17 + $0x80] sm:$0x1]  ;;  %p1030_p1 = scmp.ne.s32.totalorder %s1566_s28, %s1029_s25  ;;  %s1124_s26 = smov [#allocation2]  }
  0x3a   : > { %v1393_v30 = vrot.slane %v468_v6, 5  ;;  %v474_v31 = vrot.slane %v472_v7, 4  ;;  %v459_v33 = vshrl.u32 %v1291_v45, 16  ;;  %v462_v35 = vshll.u32 %v1291_v45, 16  ;;  %v911_v5 = vld [vmem:[%s1227_s17 + $0x8c] sm:$0x1] }
  0x3b   : > { %626 = vrot.lane.b32.xlu1 %v1337_v8, %s1123_s12  ;;  %v350_v39 = vrot.slane %v349_v9, 4  ;;  %v292_v40 = vrot.slane %v291_v12, 4  ;;  %v1399_v41 = vrot.slane %v359_v14, 4  ;;  %v1401_v43 = vrot.slane %v362_v18, 5  ;;  %p1031_p2 = pnand %p1030_p1, %p1192_p3  ;;  %s1033_s29 = sshll.u32 %s1124_s26, 4  ;;  %s1034_s29 = int_to_ptr.vmem [resolvable:$false] %s1033_s29 }
  0x3c   : > { %624 = vrot.lane.b32.xlu0 %v1341_v10, %s1123_s12  ;;  %v1409_v47 = vrot.slane %v301_v19, 4  ;;  %v1411_v48 = vrot.slane %v304_v22, 5  ;;  %v417_v49 = vor.u32 %v416_v26, %v1391_v21  ;;  %v420_v50 = vshll.u32 %v389_v25, 16  ;;  %s1035_s30 = scalar_lea.vmem %s1034_s29, 2048  ;;  %p1036_p5 = scmp.lt.s32.totalorder %s1566_s28, %s1034_s29 }
  0x3d   : > { %v407_v51 = vor.u32 %v406_v28, %v403_v27  ;;  %v475_v53 = vor.u32 %v474_v31, %v1393_v30  ;;  %v478_v55 = vshll.u32 %v447_v29, 16  ;;  %v502_v56 = vmax.bf16 %v900_v38, %v897_v36  ;;  %v914_v38 = vld [vmem:[%s1227_s17 + $0x98] sm:$0x1]  ;;  %p1032_p4 = pneg %p1031_p2  ;;  %p1037_p6 = scmp.lt.s32.totalorder %s1035_s30, %s1029_s25 }
  0x3e   : > { %v461_v57 = vrot.slane %v459_v33, 4  ;;  %v464_v58 = vrot.slane %v462_v35, 5  ;;  %v526_v60 = vshll.u32 %v1304_v52, 16  ;;  %v530_v61 = vshrl.u32 %v1304_v52, 16 }
  0x3f   : > { %683 = vrot.lane.b32.xlu1 %v1345_v15, %s1123_s12  ;;  %v355_v63 = vsel %vm1405_vm2, %v350_v39, %v1369_v37  ;;  %v297_v1 = vsel %vm1405_vm2, %v292_v40, %v1373_v44  ;;  %v517_v2 = vshrl.u32 %v1308_v54, 16  ;;  %v520_v3 = vshll.u32 %v1308_v54, 16  ;;  %p1038_p7 = por %p1037_p6, %p1036_p5 }
  0x40   : > { %681 = vrot.lane.b32.xlu0 %v1349_v17, %s1123_s12  ;;  %v365_v6 = vsel %vm1405_vm2, %v1399_v41, %v1401_v43  ;;  %v307_v37 = vsel %vm1405_vm2, %v1409_v47, %v1411_v48  ;;  %v1437_v7 = vrot.slane %v417_v49, 4  ;;  %v1439_v9 = vrot.slane %v420_v50, 5  ;;  %v919_v47 = vld [vmem:[%s1227_s17 + $0x98] sm:$0x1]  ;;  %v922_v48 = vld [vmem:[%s1227_s17 + $0xa4] sm:$0x1] }
  0x41   : > { %v1445_v44 = vrot.slane %v407_v51, 4  ;;  %v1447_v12 = vrot.slane %v475_v53, 4  ;;  %v1449_v13 = vrot.slane %v478_v55, 5  ;;  %v505_v14 = vmax.bf16 %v903_v59, %v502_v56  ;;  %p1039_p9 = pnand %p1038_p7, %p1032_p4 }
  0x42   : > { %v465_v19 = vor.u32 %v464_v58, %v461_v57  ;;  %v1451_v22 = vrot.slane %v526_v60, 5  ;;  %v532_v25 = vrot.slane %v530_v61, 4  ;;  %v560_v26 = vmax.bf16 %v911_v5, %v908_v4  ;;  %v925_v4 = vld [vmem:[%s1227_s17 + $0xb0] sm:$0x1] }
  0x43   : > { %v519_v29 = vrot.slane %v517_v2, 4  ;;  %v522_v31 = vrot.slane %v520_v3, 5  ;;  %v584_v33 = vshll.u32 %v1320_v62, 16  ;;  %v423_v36 = vsel %vm1405_vm2, %v1437_v7, %v1439_v9 }
  0x44   : > { %v588_v39 = vshrl.u32 %v1320_v62, 16  ;;  %v575_v40 = vshrl.u32 %v1324_v0, 16  ;;  %v536_v43 = vshll.u32 %v505_v14, 16  ;;  %v481_v51 = vsel %vm1405_vm2, %v1447_v12, %v1449_v13 }
  0x45   : > { %v466_v53 = vrot.slane %v465_v19, 4  ;;  %v533_v55 = vor.u32 %v532_v25, %v1451_v22  ;;  %v523_v57 = vor.u32 %v522_v31, %v519_v29  ;;  %v563_v58 = vmax.bf16 %v914_v38, %v560_v26 }
  0x46   : > { %v1481_v59 = vrot.slane %v584_v33, 5  ;;  %v590_v61 = vrot.slane %v588_v39, 4  ;;  %v642_v5 = vshll.u32 %v1337_v8, 16  ;;  %v538_v12 = vrot.slane %v536_v43, 5 }
  0x47   : > { %v534_v14 = vrot.slane %v533_v55, 4  ;;  %v636_v19 = vshll.u32 %v1341_v10, 16  ;;  %v524_v25 = vrot.slane %v523_v57, 4  ;;  %v699_v38 = vshll.u32 %v1345_v15, 16 }
  0x48   : > { %v1501_v29 = vrot.slane %v642_v5, 5  ;;  %v703_v39 = vshrl.u32 %v1345_v15, 16  ;;  %v690_v43 = vshrl.u32 %v1349_v17, 16 }
  0x49   : > { %v701_v57 = vrot.slane %v699_v38, 5 }
  0x95   : > { %v335_v18 = vpop.permute.xlu1 %334 }
  0x96   : > { %v340_v27 = vmax.bf16 %v335_v18, %v1238_v11  ;;  %v274_v28 = vpop.permute.xlu0 %273  ;;  %v413_v11 = vsel %vm1405_vm2, %v1445_v44, %v1391_v21  ;;  %v471_v44 = vsel %vm1405_vm2, %v466_v53, %v1393_v30  ;;  %v594_v18 = vshll.u32 %v563_v58, 16 }
  0x97   : > { %v279_v35 = vmax.bf16 %v274_v28, %v1243_v16  ;;  %v578_v16 = vshll.u32 %v1324_v0, 16  ;;  %v591_v30 = vor.u32 %v590_v61, %v1481_v59  ;;  %v705_v58 = vrot.slane %v703_v39, 4 }
  0x98   : > { %v368_v41 = vmax.bf16 %v355_v63, %v340_v27  ;;  %v577_v63 = vrot.slane %v575_v40, 4 }
  0x99   : > { %v310_v49 = vmax.bf16 %v297_v1, %v279_v35  ;;  %v337_v50 = vpop.permute.xlu1 %336  ;;  %v618_v1 = vmax.bf16 %v922_v48, %v919_v47  ;;  %v580_v3 = vrot.slane %v578_v16, 5  ;;  %v539_v16 = vsel %vm1405_vm2, %v534_v14, %v538_v12 }
  0x9a   : > { %871 = vst.msk [vmem:[%s1476_s6 + $0x8] sm:$0xf] %vm312_vm3, %v368_v41  ;;  %v341_v21 = vmax.bf16 %v337_v50, %v1249_v20  ;;  %v276_v56 = vpop.permute.xlu0 %275  ;;  %v646_v20 = vshrl.u32 %v1337_v8, 16  ;;  %v638_v41 = vrot.slane %v636_v19, 5  ;;  %v529_v47 = vsel %vm1405_vm2, %v524_v25, %v1451_v22 }
  0x9b   : > { %313 = vst.msk [vmem:[%s1476_s6] sm:$0xf] %vm312_vm3, %v310_v49  ;;  %v280_v60 = vmax.bf16 %v276_v56, %v1256_v24  ;;  %v633_v24 = vshrl.u32 %v1341_v10, 16  ;;  %v621_v26 = vmax.bf16 %v925_v4, %v618_v1  ;;  %v581_v28 = vor.u32 %v580_v3, %v577_v63 }
  0x9c   : > { %v369_v2 = vmax.bf16 %v365_v6, %v341_v21  ;;  %v596_v48 = vrot.slane %v594_v18, 5  ;;  %v592_v49 = vrot.slane %v591_v30, 4  ;;  %v692_v22 = vrot.slane %v690_v43, 4 }
  0x9d   : > { %v311_v7 = vmax.bf16 %v307_v37, %v280_v60  ;;  %v395_v9 = vpop.permute.xlu1 %394  ;;  %v635_v35 = vrot.slane %v633_v24, 4  ;;  %v582_v50 = vrot.slane %v581_v28, 4  ;;  %v652_v53 = vshll.u32 %v621_v26, 16 }
  0x9e   : > { %872 = vst.msk [vmem:[%s1476_s6 + $0xc] sm:$0xf] %vm312_vm3, %v369_v2  ;;  %v399_v6 = vmax.bf16 %v395_v9, %v1266_v32  ;;  %v393_v13 = vpop.permute.xlu0 %392  ;;  %v648_v32 = vrot.slane %v646_v20, 4  ;;  %v597_v2 = vsel %vm1405_vm2, %v592_v49, %v596_v48 }
  0x9f   : > { %314 = vst.msk [vmem:[%s1476_s6 + $0x4] sm:$0xf] %vm312_vm3, %v311_v7  ;;  %v398_v37 = vmax.bf16 %v393_v13, %v1276_v34  ;;  %v639_v61 = vor.u32 %v638_v41, %v635_v35  ;;  %v654_v3 = vrot.slane %v652_v53, 5  ;;  %v706_v7 = vor.u32 %v705_v58, %v701_v57 }
  0xa0   : > { %v427_v27 = vmax.bf16 %v423_v36, %v399_v6  ;;  %v693_v36 = vshll.u32 %v1349_v17, 16  ;;  %v649_v56 = vor.u32 %v648_v32, %v1501_v29 }
  0xa1   : > { %v426_v31 = vmax.bf16 %v413_v11, %v398_v37  ;;  %v453_v33 = vpop.permute.xlu1 %452  ;;  %v640_v12 = vrot.slane %v639_v61, 4  ;;  %v707_v18 = vrot.slane %v706_v7, 4 }
  0xa2   : > { %883 = vst.msk [vmem:[%s1476_s6 + $0x14] sm:$0xf] %vm312_vm3, %v427_v27  ;;  %v457_v34 = vmax.bf16 %v453_v33, %v1286_v42  ;;  %v451_v40 = vpop.permute.xlu0 %450  ;;  %v695_v63 = vrot.slane %v693_v36, 5  ;;  %v650_v20 = vrot.slane %v649_v56, 4 }
  0xa3   : > { %882 = vst.msk [vmem:[%s1476_s6 + $0x10] sm:$0xf] %vm312_vm3, %v426_v31  ;;  %v456_v11 = vmax.bf16 %v451_v40, %v1291_v45  ;;  %v645_v37 = vsel %vm1405_vm2, %v640_v12, %v1501_v29 }
  0xa4   : > { %v485_v42 = vmax.bf16 %v481_v51, %v457_v34  ;;  %v696_v24 = vor.u32 %v695_v63, %v692_v22  ;;  %v655_v14 = vsel %vm1405_vm2, %v650_v20, %v654_v3 }
  0xa5   : > { %v484_v55 = vmax.bf16 %v471_v44, %v456_v11  ;;  %v511_v21 = vpop.permute.xlu1 %510 }
  0xa6   : > { %894 = vst.msk [vmem:[%s1476_s6 + $0x1c] sm:$0xf] %vm312_vm3, %v485_v42  ;;  %v515_v45 = vmax.bf16 %v511_v21, %v1304_v52  ;;  %v509_v60 = vpop.permute.xlu0 %508  ;;  %v709_v52 = vshll.u32 %v1357_v23, 16  ;;  %v697_v25 = vrot.slane %v696_v24, 4 }
  0xa7   : > { %893 = vst.msk [vmem:[%s1476_s6 + $0x18] sm:$0xf] %vm312_vm3, %v484_v55  ;;  %v514_v51 = vmax.bf16 %v509_v60, %v1308_v54  ;;  %v587_v54 = vsel %vm1405_vm2, %v582_v50, %v1481_v59 }
  0xa8   : > { %v543_v1 = vmax.bf16 %v539_v16, %v515_v45  ;;  %v711_v19 = vrot.slane %v709_v52, 5  ;;  %v702_v32 = vsel %vm1405_vm2, %v697_v25, %v701_v57 }
  0xa9   : > { %v542_v4 = vmax.bf16 %v529_v47, %v514_v51  ;;  %v569_v5 = vpop.permute.xlu1 %568 }
  0xaa   : > { %905 = vst.msk [vmem:[%s1476_s6 + $0x24] sm:$0xf] %vm312_vm3, %v543_v1  ;;  %v573_v9 = vmax.bf16 %v569_v5, %v1320_v62  ;;  %v567_v44 = vpop.permute.xlu0 %566 }
  0xab   : > { %904 = vst.msk [vmem:[%s1476_s6 + $0x20] sm:$0xf] %vm312_vm3, %v542_v4  ;;  %v572_v6 = vmax.bf16 %v567_v44, %v1324_v0 }
  0xac   : > { %v601_v23 = vmax.bf16 %v597_v2, %v573_v9 }
  0xad   : > { %v600_v13 = vmax.bf16 %v587_v54, %v572_v6  ;;  %v627_v62 = vpop.permute.xlu1 %626 }
  0xae   : > { %916 = vst.msk [vmem:[%s1476_s6 + $0x2c] sm:$0xf] %vm312_vm3, %v601_v23  ;;  %v631_v59 = vmax.bf16 %v627_v62, %v1337_v8  ;;  %v625_v0 = vpop.permute.xlu0 %624  ;;  %v712_v8 = vsel %vm1405_vm2, %v707_v18, %v711_v19 }
  0xaf   : > { %915 = vst.msk [vmem:[%s1476_s6 + $0x28] sm:$0xf] %vm312_vm3, %v600_v13  ;;  %v630_v30 = vmax.bf16 %v625_v0, %v1341_v10 }
  0xb0   : > { %v659_v26 = vmax.bf16 %v655_v14, %v631_v59 }
  0xb1   : > { %v658_v27 = vmax.bf16 %v645_v37, %v630_v30  ;;  %v684_v28 = vpop.permute.xlu1 %683 }
  0xb2   : > { %927 = vst.msk [vmem:[%s1476_s6 + $0x34] sm:$0xf] %vm312_vm3, %v659_v26  ;;  %v688_v29 = vmax.bf16 %v684_v28, %v1345_v15  ;;  %v682_v31 = vpop.permute.xlu0 %681 }
  0xb3   : > { %926 = vst.msk [vmem:[%s1476_s6 + $0x30] sm:$0xf] %vm312_vm3, %v658_v27  ;;  %v687_v10 = vmax.bf16 %v682_v31, %v1349_v17 }
  0xb4   : > { %v716_v33 = vmax.bf16 %v712_v8, %v688_v29 }
  0xb5   : > { %v715_v35 = vmax.bf16 %v702_v32, %v687_v10 }
  0xb6   : > { %935 = vst.msk [vmem:[%s1476_s6 + $0x3c] sm:$0xf] %vm312_vm3, %v716_v33 }
  0xb7   : > { %934 = vst.msk [vmem:[%s1476_s6 + $0x38] sm:$0xf] %vm312_vm3, %v715_v35 }
  0xb8   : > { %1042 = shalt.err (!%p1039_p9)
}
  0xb9   : > { %s1043_s3 = scalar_lea.hbm %s1564_s21, 1024  ;;  %s1047_s6 = scalar_lea.hbm %s1629_s2, 4096 }
  0xba   : > { %p1044_p10 = scmp.ne.s32.totalorder %s1564_s21, %s1043_s3  ;;  %p1048_p13 = scmp.lt.s32.totalorder %s1564_s21, %s1629_s2 }
  0xbb   : > { %p1049_p0 = scmp.lt.s32.totalorder %s1047_s6, %s1043_s3 }
  0xbc   : > { %p1045_p11 = pnand %p1044_p10, %p1192_p3 }
  0xbd   : > { %p1050_p1 = por %p1049_p0, %p1048_p13 }
  0xbe   : > { %p1046_p12 = pneg %p1045_p11 }
  0xc0   : > { %p1051_p2 = pnand %p1050_p1, %p1046_p12 }
  0xc2   : > { %1054 = shalt.err (!%p1051_p2)
}
  0xc3   : > { %s1125_s8 = smov 4  }
  0xc4   : > { %956 = dma.vmem_to_hbm [thread:$0]  (%p1192_p3), %s1566_s28, 1024, %s1564_s21, %s1574_s24, %s1123_s12, %s1123_s12, %s1125_s8  }
  0xc5 PF: > { %p962_p4 = scmp.ge.s32.totalorder %s1121_s16, 2  ;;  %s752_s17 = sand.u32 1, %s1093_s9  }
  0xc6   : > { %s753_s18 = scalar_lea.sflag [#allocation3], %s752_s17 }
  0xc7   : > { %p959_p5 = pnand %p962_p4, %p1201_p8 }
  0xc9   : > { %p960_p6 = pneg %p959_p5 }
  0xcb   : > { %1088 = dma.done.wait (%p960_p6), %s753_s18, 1024  }
  0xcc   : > { %1090 = vsyncadd (%p960_p6), %s753_s18, 4294966272  ;;  %s15_s16 = sadd.s32 1, %s1121_s16   ;;  %s1635_s9 = smov %s1097_s10 }
  0xcd   : > { %p12_p7 = scmp.ge.s32.totalorder %s15_s16, 6   ;;  %s1636_s10 = smov %s1101_s11 }
  0xce   : > { %s1637_s11 = smov %s1210_s27  ;;  %s1638_s12 = smov %s1113_s14 }
  0xcf   : > { %s1639_s13 = smov %s1117_s15  ;;  %s1640_s14 = smov %s1643_s19 }
  0xd0   : > { %s1641_s15 = smov %s1647_s20  ;;  %14 = sbr.rel (!%p12_p7) target bundleno = 5 (0x5), region = 88 }
  0xd5   :  { %758 = vsyncpa [#allocation3], 1 }
  0xd6   :  { %760 = vsyncpa [#allocation3 + $0x1], 1 }

</bundles_post_ra>
